<compile_context>
chip_gen: v6e
topology: v6e:2x2x1
jax: 0.10.0
libtpu: 0.0.40
codegen_flags: <defaults>
</compile_context>

<pallas_src>
import numpy as np
import jax
import jax.numpy as jnp
from jax.experimental import pallas as pl
from jax.experimental.pallas import tpu as pltpu

EPS_IN = 1e-5   # InstanceNorm1d default eps
EPS_BN = 1e-5   # BatchNorm1d default eps


# ---------------------------------------------------------------------------
# Host-side helpers: 0/1 gather matrices and the flat parameter pack
# ---------------------------------------------------------------------------

def _round8(n):
    return ((n + 7) // 8) * 8


class _Packer:
    """Packs many small 2-D f32 arrays into one lane-dense (rows, 128) array.

    Each chunk starts at an 8-aligned sublane offset and lane offset 0, so all
    in-kernel loads are plain static slices of a single VMEM ref (one DMA).
    """

    def __init__(self, width=128):
        self.width = width
        self.rows = 0
        self.chunks = []

    def add(self, mat):
        mat = np.asarray(mat, np.float32)
        r, c = mat.shape
        assert c <= self.width, (r, c)
        rp = _round8(max(r, 1))
        buf = np.zeros((rp, self.width), np.float32)
        buf[:r, :c] = mat
        idx = (self.rows, r, c)          # (row offset, rows, cols) -- all static
        self.rows += rp
        self.chunks.append(buf)
        return idx

    def finalize(self):
        return np.concatenate(self.chunks, axis=0)


def _reflect_src(L, p):
    """PyTorch ReflectionPad1d(p) source indices for an input of length L."""
    out = []
    for j in range(L + 2 * p):
        if j < p:
            out.append(p - j)
        elif j < L + p:
            out.append(j - p)
        else:
            out.append(2 * L + p - 2 - j)
    return out


def _zero_src(L, left, right):
    return [(j - left) if left <= j < L + left else -1
            for j in range(L + left + right)]


def _dilate_src(L, stride, left, right):
    """ConvTranspose prep: zero-dilate by `stride` and zero-pad left/right."""
    Ld = (L - 1) * stride + 1 + left + right
    out = []
    for j in range(Ld):
        t = j - left
        ok = (0 <= t <= (L - 1) * stride) and (t % stride == 0)
        out.append(t // stride if ok else -1)
    return out


def _gather_mat(src, Lin, B):
    """(B*Lin, B*len(src)) 0/1 matrix for the interleaved (C, B*L) layout:
    out[:, j*B+b] = in[:, src[j]*B+b]  (zero column when src[j] < 0)."""
    M = np.zeros((B * Lin, B * len(src)), np.float32)
    for j, s in enumerate(src):
        if s >= 0:
            for b in range(B):
                M[s * B + b, j * B + b] = 1.0
    return M


# ---------------------------------------------------------------------------
# One-time parameter preparation (hoisted out of the per-call forward path)
# ---------------------------------------------------------------------------

def prepare_generator(params, batch_size):
    B = batch_size
    pk = _Packer()

    embed = np.asarray(params["embed"], np.float32)
    L0 = embed.shape[1]

    def add_weight(w_oik):                      # (Cout, Cin, K) -> tap-major pack
        w_oik = np.asarray(w_oik, np.float32)
        cout, cin, K = w_oik.shape
        cout_pad = _round8(cout)
        wt = np.zeros((K, cout_pad, cin), np.float32)
        wt[:, :cout, :] = np.transpose(w_oik, (2, 0, 1))
        off, _, _ = pk.add(wt.reshape(K * cout_pad, cin))
        return {"off": off, "cout": cout, "cout_pad": cout_pad, "cin": cin, "K": K}

    in_cache = {}

    def in_meta(L):                             # per-sample sum / broadcast matrices
        if L not in in_cache:
            asum = np.zeros((B * L, B), np.float32)
            for t in range(L):
                for b in range(B):
                    asum[t * B + b, b] = 1.0
            in_cache[L] = {"asum": pk.add(asum), "abro": pk.add(asum.T), "L": L}
        return in_cache[L]

    # stem: ReflectionPad1d(1) + Conv1d(1, ngf, 8) + InstanceNorm + ReLU
    # (conv bias dropped: cancelled exactly by the InstanceNorm mean subtraction)
    L = L0
    stem_pad = pk.add(_gather_mat(_reflect_src(L, 1), L, B))
    L = L + 2 - 8 + 1
    stem = {"w": add_weight(params["c0_w"]), "pad": stem_pad,
            "Lout": L, "in": in_meta(L)}

    # downsampling: Conv1d(k=3, s=2, p=1) + InstanceNorm + ReLU
    downs = []
    for d in params["downs"]:
        Lp = L + 2
        Lout = (Lp - 3) // 2 + 1
        src = _zero_src(L, 1, 1)
        even = [src[2 * t] for t in range(Lout + 1)]   # padded positions 2t, 2t+2
        odd = [src[2 * t + 1] for t in range(Lout)]    # padded positions 2t+1
        downs.append({"w": add_weight(d["w"]),
                      "me": pk.add(_gather_mat(even, L, B)),
                      "mo": pk.add(_gather_mat(odd, L, B)),
                      "Lout": Lout, "in": in_meta(Lout)})
        L = Lout

    # ResnetBlocks: reflect-pad + conv + BN(eval) + ReLU + Dropout(id) + ... + residual
    res_pad = pk.add(_gather_mat(_reflect_src(L, 1), L, B))
    res_L = L
    blocks = []
    for blk in params["blocks"]:
        convs = []
        for j in (1, 2):
            # fold eval-mode BatchNorm1d AND the conv bias into one affine
            s = np.asarray(blk[f"gamma{j}"], np.float32) / np.sqrt(
                np.asarray(blk[f"rv{j}"], np.float32) + EPS_BN)
            t = (np.asarray(blk[f"beta{j}"], np.float32)
                 - np.asarray(blk[f"rm{j}"], np.float32) * s
                 + s * np.asarray(blk[f"b{j}"], np.float32))
            convs.append({"w": add_weight(blk[f"w{j}"]),
                          "scale": pk.add(s.reshape(-1, 1)),
                          "shift": pk.add(t.reshape(-1, 1))})
        blocks.append(convs)

    # upsampling: ConvTranspose1d(k=4, s=2, p=1, op=1) + InstanceNorm + ReLU
    ups = []
    for u in params["ups"]:
        w = np.asarray(u["w"], np.float32)                 # (Cin, Cout, K)
        w_eff = np.transpose(w[:, :, ::-1], (1, 0, 2))     # equivalent stride-1 conv
        pad = pk.add(_gather_mat(_dilate_src(L, 2, 2, 3), L, B))
        L = ((L - 1) * 2 + 1 + 5) - 4 + 1
        ups.append({"w": add_weight(w_eff), "pad": pad, "Lout": L, "in": in_meta(L)})

    # head: ReflectionPad1d(3) + Conv1d(ngf, 1, 8, padding=1) + Tanh
    src_r = _reflect_src(L, 3)
    src_z = _zero_src(len(src_r), 1, 1)
    composed = [src_r[s] if s >= 0 else -1 for s in src_z]  # compose both pads
    head_pad = pk.add(_gather_mat(composed, L, B))
    L_out = len(composed) - 8 + 1
    perm = np.zeros((B * L_out, B * L_out), np.float32)     # interleaved -> blocked
    for t in range(L_out):
        for b in range(B):
            perm[t * B + b, b * L_out + t] = 1.0
    cf_b = np.asarray(params["cf_b"], np.float32)
    head = {"w": add_weight(params["cf_w"]), "pad": head_pad,
            "perm": pk.add(perm), "bias": pk.add(cf_b.reshape(-1, 1)),
            "Lout": L_out}

    plan = {"B": B, "L0": L0, "L_out": L_out,
            "stem": stem, "downs": downs, "blocks": blocks,
            "res_pad": res_pad, "res_L": res_L, "ups": ups, "head": head}
    return {"plan": plan,
            "packed": jnp.asarray(pk.finalize()),
            "embed": jnp.asarray(embed)}


# ---------------------------------------------------------------------------
# Fused generator kernel (single pallas_call, everything VMEM-resident)
# ---------------------------------------------------------------------------

def _make_kernel(plan):
    B = plan["B"]

    def load(pk, idx):
        off, r, c = idx
        return pk[off:off + r, 0:c]

    def wtap(pk, w, k):
        r0 = w["off"] + k * w["cout_pad"]
        return pk[r0:r0 + w["cout"], 0:w["cin"]]

    def conv_taps(pk, xp, w, Lout):
        # valid stride-1 conv as a sum of K shifted-slice matmuls (Cin==1 -> VPU)
        y = None
        for k in range(w["K"]):
            wk = wtap(pk, w, k)
            xk = xp[:, k * B:(k + Lout) * B]
            if w["cin"] == 1:
                yk = wk * xk
            else:
                yk = jnp.dot(wk, xk, preferred_element_type=jnp.float32)
            y = yk if y is None else y + yk
        return y

    def inorm_relu(pk, y, meta):
        # InstanceNorm1d (affine=False) + ReLU; per-sample stats via one fused
        # sum / sum-of-squares pass with tiny 0/1 reduce & broadcast matmuls.
        asum = load(pk, meta["asum"])
        abro = load(pk, meta["abro"])
        inv_l = 1.0 / meta["L"]
        s1 = jnp.dot(y, asum, preferred_element_type=jnp.float32)
        s2 = jnp.dot(y * y, asum, preferred_element_type=jnp.float32)
        mean = s1 * inv_l
        var = jnp.maximum(s2 * inv_l - mean * mean, 0.0)
        scale = jax.lax.rsqrt(var + EPS_IN)
        shift = -mean * scale
        sf = jnp.dot(scale, abro, preferred_element_type=jnp.float32)
        tf = jnp.dot(shift, abro, preferred_element_type=jnp.float32)
        return jnp.maximum(y * sf + tf, 0.0)

    def kernel(zi_ref, ei_ref, pk, out_ref):
        # modulate: z * embedded_labels   -> (1, B*L0), batch interleaved on lanes
        x = zi_ref[...] * ei_ref[...]

        # stem
        st = plan["stem"]
        xp = jnp.dot(x, load(pk, st["pad"]), preferred_element_type=jnp.float32)
        x = inorm_relu(pk, conv_taps(pk, xp, st["w"], st["Lout"]), st["in"])

        # downsampling (stride 2 folded into even/odd phase-gather matrices)
        for d in plan["downs"]:
            Lout = d["Lout"]
            xe = jnp.dot(x, load(pk, d["me"]), preferred_element_type=jnp.float32)
            xo = jnp.dot(x, load(pk, d["mo"]), preferred_element_type=jnp.float32)
            w = d["w"]
            y = (jnp.dot(wtap(pk, w, 0), xe[:, 0:B * Lout],
                         preferred_element_type=jnp.float32)
                 + jnp.dot(wtap(pk, w, 1), xo,
                           preferred_element_type=jnp.float32)
                 + jnp.dot(wtap(pk, w, 2), xe[:, B:B * (Lout + 1)],
                           preferred_element_type=jnp.float32))
            x = inorm_relu(pk, y, d["in"])

        # ResnetBlocks
        # TODO(synk): train-mode Dropout(0.5) / BatchNorm batch statistics are not
        #             modeled; eval-mode semantics (identity / running stats) used.
        res_pad = load(pk, plan["res_pad"])
        res_L = plan["res_L"]
        for convs in plan["blocks"]:
            h = x
            for cv in convs:
                hp = jnp.dot(h, res_pad, preferred_element_type=jnp.float32)
                y = conv_taps(pk, hp, cv["w"], res_L)
                h = jnp.maximum(y * load(pk, cv["scale"]) + load(pk, cv["shift"]), 0.0)
            x = x + h

        # upsampling: ConvTranspose1d = zero-dilate+pad matrix, then stride-1 conv
        for u in plan["ups"]:
            xp = jnp.dot(x, load(pk, u["pad"]), preferred_element_type=jnp.float32)
            x = inorm_relu(pk, conv_taps(pk, xp, u["w"], u["Lout"]), u["in"])

        # head: composed reflect(3)+zero(1) pad, conv(ngf -> 1, k=8), de-interleave, tanh
        hd = plan["head"]
        L = hd["Lout"]
        xp = jnp.dot(x, load(pk, hd["pad"]), preferred_element_type=jnp.float32)
        y = conv_taps(pk, xp, hd["w"], L) + load(pk, hd["bias"])
        y = jnp.dot(y, load(pk, hd["perm"]), preferred_element_type=jnp.float32)
        y = jnp.tanh(y)
        for b in range(B):
            out_ref[b] = y[0:1, b * L:(b + 1) * L]

    return kernel


def generator_forward(prepped, z, labels):
    plan = prepped["plan"]
    B, L0, L_out = plan["B"], plan["L0"], plan["L_out"]
    # embedding lookup (dynamic gather) stays outside the kernel
    emb = jnp.take(prepped["embed"], labels, axis=0)                  # (B, L0)
    zi = jnp.transpose(z.reshape(B, L0).astype(jnp.float32)).reshape(1, B * L0)
    ei = jnp.transpose(emb.astype(jnp.float32)).reshape(1, B * L0)
    vmem = pl.BlockSpec(memory_space=pltpu.MemorySpace.VMEM)
    return pl.pallas_call(
        _make_kernel(plan),
        out_shape=jax.ShapeDtypeStruct((B, 1, L_out), jnp.float32),
        in_specs=[vmem, vmem, vmem],
        out_specs=vmem,
    )(zi, ei, prepped["packed"])


# ---------------------------------------------------------------------------
# Deterministic in-script parameters (PyTorch layouts)
# ---------------------------------------------------------------------------

def init_params(key, classes, input_acc_size, input_nc=1, output_nc=1,
                ngf=16, n_blocks=2):
    n_down = 2
    keys = {"k": key}

    def nxt():
        keys["k"], sub = jax.random.split(keys["k"])
        return sub

    p = {}
    p["embed"] = jax.random.normal(nxt(), (classes, input_acc_size), jnp.float32) * 0.1
    p["c0_w"] = jax.random.normal(nxt(), (ngf, input_nc, 8), jnp.float32) * 0.1
    p["c0_b"] = jax.random.normal(nxt(), (ngf,), jnp.float32) * 0.1

    downs = []
    for i in range(n_down):
        cin = ngf * (2 ** i)
        cout = cin * 2
        downs.append({"w": jax.random.normal(nxt(), (cout, cin, 3), jnp.float32) * 0.1,
                      "b": jax.random.normal(nxt(), (cout,), jnp.float32) * 0.1})
    p["downs"] = downs

    dim = ngf * (2 ** n_down)
    blocks = []
    for _ in range(n_blocks):
        blk = {}
        for j in (1, 2):
            blk[f"w{j}"] = jax.random.normal(nxt(), (dim, dim, 3), jnp.float32) * 0.05
            blk[f"b{j}"] = jax.random.normal(nxt(), (dim,), jnp.float32) * 0.05
            blk[f"gamma{j}"] = jnp.ones((dim,), jnp.float32)
            blk[f"beta{j}"] = jnp.zeros((dim,), jnp.float32)
            blk[f"rm{j}"] = jnp.zeros((dim,), jnp.float32)
            blk[f"rv{j}"] = jnp.ones((dim,), jnp.float32)
        blocks.append(blk)
    p["blocks"] = blocks

    ups = []
    for i in range(n_down):
        mult = 2 ** (n_down - i)
        cin = ngf * mult
        cout = cin // 2
        # ConvTranspose1d weight layout: (in_channels, out_channels, K)
        ups.append({"w": jax.random.normal(nxt(), (cin, cout, 4), jnp.float32) * 0.1,
                    "b": jax.random.normal(nxt(), (cout,), jnp.float32) * 0.1})
    p["ups"] = ups

    p["cf_w"] = jax.random.normal(nxt(), (output_nc, ngf, 8), jnp.float32) * 0.1
    p["cf_b"] = jax.random.normal(nxt(), (output_nc,), jnp.float32) * 0.1
    return p


# ---------------------------------------------------------------------------

if __name__ == "__main__":
    classes = 10
    input_acc_size = 32
    ngf = 16
    n_blocks = 2
    B = 2

    key = jax.random.PRNGKey(0)
    pkey, zkey, lkey = jax.random.split(key, 3)

    params = init_params(pkey, classes, input_acc_size, ngf=ngf, n_blocks=n_blocks)
    prepped = prepare_generator(params, batch_size=B)     # one-time prep

    z = jax.random.normal(zkey, (B, 1, input_acc_size), jnp.float32)
    labels = jax.random.randint(lkey, (B,), 0, classes)

    fwd = jax.jit(lambda z_, l_: generator_forward(prepped, z_, l_))
    out = jax.block_until_ready(fwd(z, labels))

    assert out.shape == (B, 1, prepped["plan"]["L_out"]), out.shape
    assert prepped["plan"]["L_out"] == input_acc_size
    assert bool(jnp.all(jnp.isfinite(out)))
    print("KERNEL_OK")
</pallas_src>

<mosaic_0001>
module attributes {stable_mosaic.version = 11 : i64} {
  func.func @kernel(%arg0: memref<1x64xf32, #tpu.memory_space<vmem>>, %arg1: memref<1x64xf32, #tpu.memory_space<vmem>>, %arg2: memref<2632x128xf32, #tpu.memory_space<vmem>>, %arg3: memref<2x1x32xf32, #tpu.memory_space<vmem>>) attributes {dimension_semantics = [], scalar_prefetch = 0 : i64, scratch_operands = 0 : i64, tpu.core_type = #tpu.core_type<tc>} {
    %c0 = arith.constant 0 : index
    %c0_0 = arith.constant 0 : index
    %0 = vector.load %arg0[%c0, %c0_0] : memref<1x64xf32, #tpu.memory_space<vmem>>, vector<1x64xf32>
    %c0_1 = arith.constant 0 : index
    %c0_2 = arith.constant 0 : index
    %1 = vector.load %arg1[%c0_1, %c0_2] : memref<1x64xf32, #tpu.memory_space<vmem>>, vector<1x64xf32>
    %2 = arith.mulf %0, %1 : vector<1x64xf32>
    %c0_3 = arith.constant 0 : index
    %c0_4 = arith.constant 0 : index
    %3 = vector.load %arg2[%c0_3, %c0_4] : memref<2632x128xf32, #tpu.memory_space<vmem>>, vector<64x68xf32>
    %cst = arith.constant dense<0.000000e+00> : vector<1x68xf32>
    %4 = tpu.matmul %2, %3, %cst {dimension_numbers = #tpu.dot_dimension_numbers<[1], [0], [0], [1], [0, 0, 1, 1], [], []>} : vector<1x64xf32>, vector<64x68xf32>, vector<1x68xf32> -> vector<1x68xf32>
    %c64 = arith.constant 64 : index
    %c0_5 = arith.constant 0 : index
    %5 = vector.load %arg2[%c64, %c0_5] : memref<2632x128xf32, #tpu.memory_space<vmem>>, vector<16x1xf32>
    %6 = vector.extract_strided_slice %4 {offsets = [0, 0], sizes = [1, 54], strides = [1, 1]} : vector<1x68xf32> to vector<1x54xf32>
    %7 = vector.broadcast %5 : vector<16x1xf32> to vector<16x54xf32>
    %8 = vector.broadcast %6 : vector<1x54xf32> to vector<16x54xf32>
    %9 = arith.mulf %7, %8 : vector<16x54xf32>
    %c80 = arith.constant 80 : index
    %c0_6 = arith.constant 0 : index
    %10 = vector.load %arg2[%c80, %c0_6] : memref<2632x128xf32, #tpu.memory_space<vmem>>, vector<16x1xf32>
    %11 = vector.extract_strided_slice %4 {offsets = [0, 2], sizes = [1, 54], strides = [1, 1]} : vector<1x68xf32> to vector<1x54xf32>
    %12 = vector.broadcast %10 : vector<16x1xf32> to vector<16x54xf32>
    %13 = vector.broadcast %11 : vector<1x54xf32> to vector<16x54xf32>
    %14 = arith.mulf %12, %13 : vector<16x54xf32>
    %15 = arith.addf %9, %14 : vector<16x54xf32>
    %c96 = arith.constant 96 : index
    %c0_7 = arith.constant 0 : index
    %16 = vector.load %arg2[%c96, %c0_7] : memref<2632x128xf32, #tpu.memory_space<vmem>>, vector<16x1xf32>
    %17 = vector.extract_strided_slice %4 {offsets = [0, 4], sizes = [1, 54], strides = [1, 1]} : vector<1x68xf32> to vector<1x54xf32>
    %18 = vector.broadcast %16 : vector<16x1xf32> to vector<16x54xf32>
    %19 = vector.broadcast %17 : vector<1x54xf32> to vector<16x54xf32>
    %20 = arith.mulf %18, %19 : vector<16x54xf32>
    %21 = arith.addf %15, %20 : vector<16x54xf32>
    %c112 = arith.constant 112 : index
    %c0_8 = arith.constant 0 : index
    %22 = vector.load %arg2[%c112, %c0_8] : memref<2632x128xf32, #tpu.memory_space<vmem>>, vector<16x1xf32>
    %23 = vector.extract_strided_slice %4 {offsets = [0, 6], sizes = [1, 54], strides = [1, 1]} : vector<1x68xf32> to vector<1x54xf32>
    %24 = vector.broadcast %22 : vector<16x1xf32> to vector<16x54xf32>
    %25 = vector.broadcast %23 : vector<1x54xf32> to vector<16x54xf32>
    %26 = arith.mulf %24, %25 : vector<16x54xf32>
    %27 = arith.addf %21, %26 : vector<16x54xf32>
    %c128 = arith.constant 128 : index
    %c0_9 = arith.constant 0 : index
    %28 = vector.load %arg2[%c128, %c0_9] : memref<2632x128xf32, #tpu.memory_space<vmem>>, vector<16x1xf32>
    %29 = vector.extract_strided_slice %4 {offsets = [0, 8], sizes = [1, 54], strides = [1, 1]} : vector<1x68xf32> to vector<1x54xf32>
    %30 = vector.broadcast %28 : vector<16x1xf32> to vector<16x54xf32>
    %31 = vector.broadcast %29 : vector<1x54xf32> to vector<16x54xf32>
    %32 = arith.mulf %30, %31 : vector<16x54xf32>
    %33 = arith.addf %27, %32 : vector<16x54xf32>
    %c144 = arith.constant 144 : index
    %c0_10 = arith.constant 0 : index
    %34 = vector.load %arg2[%c144, %c0_10] : memref<2632x128xf32, #tpu.memory_space<vmem>>, vector<16x1xf32>
    %35 = vector.extract_strided_slice %4 {offsets = [0, 10], sizes = [1, 54], strides = [1, 1]} : vector<1x68xf32> to vector<1x54xf32>
    %36 = vector.broadcast %34 : vector<16x1xf32> to vector<16x54xf32>
    %37 = vector.broadcast %35 : vector<1x54xf32> to vector<16x54xf32>
    %38 = arith.mulf %36, %37 : vector<16x54xf32>
    %39 = arith.addf %33, %38 : vector<16x54xf32>
    %c160 = arith.constant 160 : index
    %c0_11 = arith.constant 0 : index
    %40 = vector.load %arg2[%c160, %c0_11] : memref<2632x128xf32, #tpu.memory_space<vmem>>, vector<16x1xf32>
    %41 = vector.extract_strided_slice %4 {offsets = [0, 12], sizes = [1, 54], strides = [1, 1]} : vector<1x68xf32> to vector<1x54xf32>
    %42 = vector.broadcast %40 : vector<16x1xf32> to vector<16x54xf32>
    %43 = vector.broadcast %41 : vector<1x54xf32> to vector<16x54xf32>
    %44 = arith.mulf %42, %43 : vector<16x54xf32>
    %45 = arith.addf %39, %44 : vector<16x54xf32>
    %c176 = arith.constant 176 : index
    %c0_12 = arith.constant 0 : index
    %46 = vector.load %arg2[%c176, %c0_12] : memref<2632x128xf32, #tpu.memory_space<vmem>>, vector<16x1xf32>
    %47 = vector.extract_strided_slice %4 {offsets = [0, 14], sizes = [1, 54], strides = [1, 1]} : vector<1x68xf32> to vector<1x54xf32>
    %48 = vector.broadcast %46 : vector<16x1xf32> to vector<16x54xf32>
    %49 = vector.broadcast %47 : vector<1x54xf32> to vector<16x54xf32>
    %50 = arith.mulf %48, %49 : vector<16x54xf32>
    %51 = arith.addf %45, %50 : vector<16x54xf32>
    %c192 = arith.constant 192 : index
    %c0_13 = arith.constant 0 : index
    %52 = vector.load %arg2[%c192, %c0_13] : memref<2632x128xf32, #tpu.memory_space<vmem>>, vector<54x2xf32>
    %c248 = arith.constant 248 : index
    %c0_14 = arith.constant 0 : index
    %53 = vector.load %arg2[%c248, %c0_14] : memref<2632x128xf32, #tpu.memory_space<vmem>>, vector<2x54xf32>
    %cst_15 = arith.constant dense<0.000000e+00> : vector<16x2xf32>
    %54 = tpu.matmul %51, %52, %cst_15 {dimension_numbers = #tpu.dot_dimension_numbers<[1], [0], [0], [1], [0, 0, 1, 1], [], []>} : vector<16x54xf32>, vector<54x2xf32>, vector<16x2xf32> -> vector<16x2xf32>
    %55 = arith.mulf %51, %51 : vector<16x54xf32>
    %cst_16 = arith.constant dense<0.000000e+00> : vector<16x2xf32>
    %56 = tpu.matmul %55, %52, %cst_16 {dimension_numbers = #tpu.dot_dimension_numbers<[1], [0], [0], [1], [0, 0, 1, 1], [], []>} : vector<16x54xf32>, vector<54x2xf32>, vector<16x2xf32> -> vector<16x2xf32>
    %cst_17 = arith.constant 0.0370370373 : f32
    %57 = vector.broadcast %cst_17 : f32 to vector<16x2xf32>
    %58 = arith.mulf %54, %57 : vector<16x2xf32>
    %cst_18 = arith.constant 0.0370370373 : f32
    %59 = vector.broadcast %cst_18 : f32 to vector<16x2xf32>
    %60 = arith.mulf %56, %59 : vector<16x2xf32>
    %61 = arith.mulf %58, %58 : vector<16x2xf32>
    %62 = arith.subf %60, %61 : vector<16x2xf32>
    %cst_19 = arith.constant 0.000000e+00 : f32
    %63 = vector.broadcast %cst_19 : f32 to vector<16x2xf32>
    %64 = arith.maximumf %62, %63 : vector<16x2xf32>
    %cst_20 = arith.constant 9.99999974E-6 : f32
    %65 = vector.broadcast %cst_20 : f32 to vector<16x2xf32>
    %66 = arith.addf %64, %65 : vector<16x2xf32>
    %67 = math.rsqrt %66 : vector<16x2xf32>
    %cst_21 = arith.constant 0.000000e+00 : f32
    %68 = vector.broadcast %cst_21 : f32 to vector<16x2xf32>
    %69 = arith.subf %68, %58 : vector<16x2xf32>
    %70 = arith.mulf %69, %67 : vector<16x2xf32>
    %cst_22 = arith.constant dense<0.000000e+00> : vector<16x54xf32>
    %71 = tpu.matmul %67, %53, %cst_22 {dimension_numbers = #tpu.dot_dimension_numbers<[1], [0], [0], [1], [0, 0, 1, 1], [], []>} : vector<16x2xf32>, vector<2x54xf32>, vector<16x54xf32> -> vector<16x54xf32>
    %cst_23 = arith.constant dense<0.000000e+00> : vector<16x54xf32>
    %72 = tpu.matmul %70, %53, %cst_23 {dimension_numbers = #tpu.dot_dimension_numbers<[1], [0], [0], [1], [0, 0, 1, 1], [], []>} : vector<16x2xf32>, vector<2x54xf32>, vector<16x54xf32> -> vector<16x54xf32>
    %73 = arith.mulf %51, %71 : vector<16x54xf32>
    %74 = arith.addf %73, %72 : vector<16x54xf32>
    %cst_24 = arith.constant 0.000000e+00 : f32
    %75 = vector.broadcast %cst_24 : f32 to vector<16x54xf32>
    %76 = arith.maximumf %74, %75 : vector<16x54xf32>
    %c352 = arith.constant 352 : index
    %c0_25 = arith.constant 0 : index
    %77 = vector.load %arg2[%c352, %c0_25] : memref<2632x128xf32, #tpu.memory_space<vmem>>, vector<54x30xf32>
    %cst_26 = arith.constant dense<0.000000e+00> : vector<16x30xf32>
    %78 = tpu.matmul %76, %77, %cst_26 {dimension_numbers = #tpu.dot_dimension_numbers<[1], [0], [0], [1], [0, 0, 1, 1], [], []>} : vector<16x54xf32>, vector<54x30xf32>, vector<16x30xf32> -> vector<16x30xf32>
    %c408 = arith.constant 408 : index
    %c0_27 = arith.constant 0 : index
    %79 = vector.load %arg2[%c408, %c0_27] : memref<2632x128xf32, #tpu.memory_space<vmem>>, vector<54x28xf32>
    %cst_28 = arith.constant dense<0.000000e+00> : vector<16x28xf32>
    %80 = tpu.matmul %76, %79, %cst_28 {dimension_numbers = #tpu.dot_dimension_numbers<[1], [0], [0], [1], [0, 0, 1, 1], [], []>} : vector<16x54xf32>, vector<54x28xf32>, vector<16x28xf32> -> vector<16x28xf32>
    %c256 = arith.constant 256 : index
    %c0_29 = arith.constant 0 : index
    %81 = vector.load %arg2[%c256, %c0_29] : memref<2632x128xf32, #tpu.memory_space<vmem>>, vector<32x16xf32>
    %82 = vector.extract_strided_slice %78 {offsets = [0, 0], sizes = [16, 28], strides = [1, 1]} : vector<16x30xf32> to vector<16x28xf32>
    %cst_30 = arith.constant dense<0.000000e+00> : vector<32x28xf32>
    %83 = tpu.matmul %81, %82, %cst_30 {dimension_numbers = #tpu.dot_dimension_numbers<[1], [0], [0], [1], [0, 0, 1, 1], [], []>} : vector<32x16xf32>, vector<16x28xf32>, vector<32x28xf32> -> vector<32x28xf32>
    %c288 = arith.constant 288 : index
    %c0_31 = arith.constant 0 : index
    %84 = vector.load %arg2[%c288, %c0_31] : memref<2632x128xf32, #tpu.memory_space<vmem>>, vector<32x16xf32>
    %cst_32 = arith.constant dense<0.000000e+00> : vector<32x28xf32>
    %85 = tpu.matmul %84, %80, %cst_32 {dimension_numbers = #tpu.dot_dimension_numbers<[1], [0], [0], [1], [0, 0, 1, 1], [], []>} : vector<32x16xf32>, vector<16x28xf32>, vector<32x28xf32> -> vector<32x28xf32>
    %86 = arith.addf %83, %85 : vector<32x28xf32>
    %c320 = arith.constant 320 : index
    %c0_33 = arith.constant 0 : index
    %87 = vector.load %arg2[%c320, %c0_33] : memref<2632x128xf32, #tpu.memory_space<vmem>>, vector<32x16xf32>
    %88 = vector.extract_strided_slice %78 {offsets = [0, 2], sizes = [16, 28], strides = [1, 1]} : vector<16x30xf32> to vector<16x28xf32>
    %cst_34 = arith.constant dense<0.000000e+00> : vector<32x28xf32>
    %89 = tpu.matmul %87, %88, %cst_34 {dimension_numbers = #tpu.dot_dimension_numbers<[1], [0], [0], [1], [0, 0, 1, 1], [], []>} : vector<32x16xf32>, vector<16x28xf32>, vector<32x28xf32> -> vector<32x28xf32>
    %90 = arith.addf %86, %89 : vector<32x28xf32>
    %c464 = arith.constant 464 : index
    %c0_35 = arith.constant 0 : index
    %91 = vector.load %arg2[%c464, %c0_35] : memref<2632x128xf32, #tpu.memory_space<vmem>>, vector<28x2xf32>
    %c496 = arith.constant 496 : index
    %c0_36 = arith.constant 0 : index
    %92 = vector.load %arg2[%c496, %c0_36] : memref<2632x128xf32, #tpu.memory_space<vmem>>, vector<2x28xf32>
    %cst_37 = arith.constant dense<0.000000e+00> : vector<32x2xf32>
    %93 = tpu.matmul %90, %91, %cst_37 {dimension_numbers = #tpu.dot_dimension_numbers<[1], [0], [0], [1], [0, 0, 1, 1], [], []>} : vector<32x28xf32>, vector<28x2xf32>, vector<32x2xf32> -> vector<32x2xf32>
    %94 = arith.mulf %90, %90 : vector<32x28xf32>
    %cst_38 = arith.constant dense<0.000000e+00> : vector<32x2xf32>
    %95 = tpu.matmul %94, %91, %cst_38 {dimension_numbers = #tpu.dot_dimension_numbers<[1], [0], [0], [1], [0, 0, 1, 1], [], []>} : vector<32x28xf32>, vector<28x2xf32>, vector<32x2xf32> -> vector<32x2xf32>
    %cst_39 = arith.constant 0.0714285746 : f32
    %96 = vector.broadcast %cst_39 : f32 to vector<32x2xf32>
    %97 = arith.mulf %93, %96 : vector<32x2xf32>
    %cst_40 = arith.constant 0.0714285746 : f32
    %98 = vector.broadcast %cst_40 : f32 to vector<32x2xf32>
    %99 = arith.mulf %95, %98 : vector<32x2xf32>
    %100 = arith.mulf %97, %97 : vector<32x2xf32>
    %101 = arith.subf %99, %100 : vector<32x2xf32>
    %cst_41 = arith.constant 0.000000e+00 : f32
    %102 = vector.broadcast %cst_41 : f32 to vector<32x2xf32>
    %103 = arith.maximumf %101, %102 : vector<32x2xf32>
    %cst_42 = arith.constant 9.99999974E-6 : f32
    %104 = vector.broadcast %cst_42 : f32 to vector<32x2xf32>
    %105 = arith.addf %103, %104 : vector<32x2xf32>
    %106 = math.rsqrt %105 : vector<32x2xf32>
    %cst_43 = arith.constant 0.000000e+00 : f32
    %107 = vector.broadcast %cst_43 : f32 to vector<32x2xf32>
    %108 = arith.subf %107, %97 : vector<32x2xf32>
    %109 = arith.mulf %108, %106 : vector<32x2xf32>
    %cst_44 = arith.constant dense<0.000000e+00> : vector<32x28xf32>
    %110 = tpu.matmul %106, %92, %cst_44 {dimension_numbers = #tpu.dot_dimension_numbers<[1], [0], [0], [1], [0, 0, 1, 1], [], []>} : vector<32x2xf32>, vector<2x28xf32>, vector<32x28xf32> -> vector<32x28xf32>
    %cst_45 = arith.constant dense<0.000000e+00> : vector<32x28xf32>
    %111 = tpu.matmul %109, %92, %cst_45 {dimension_numbers = #tpu.dot_dimension_numbers<[1], [0], [0], [1], [0, 0, 1, 1], [], []>} : vector<32x2xf32>, vector<2x28xf32>, vector<32x28xf32> -> vector<32x28xf32>
    %112 = arith.mulf %90, %110 : vector<32x28xf32>
    %113 = arith.addf %112, %111 : vector<32x28xf32>
    %cst_46 = arith.constant 0.000000e+00 : f32
    %114 = vector.broadcast %cst_46 : f32 to vector<32x28xf32>
    %115 = arith.maximumf %113, %114 : vector<32x28xf32>
    %c696 = arith.constant 696 : index
    %c0_47 = arith.constant 0 : index
    %116 = vector.load %arg2[%c696, %c0_47] : memref<2632x128xf32, #tpu.memory_space<vmem>>, vector<28x16xf32>
    %cst_48 = arith.constant dense<0.000000e+00> : vector<32x16xf32>
    %117 = tpu.matmul %115, %116, %cst_48 {dimension_numbers = #tpu.dot_dimension_numbers<[1], [0], [0], [1], [0, 0, 1, 1], [], []>} : vector<32x28xf32>, vector<28x16xf32>, vector<32x16xf32> -> vector<32x16xf32>
    %c728 = arith.constant 728 : index
    %c0_49 = arith.constant 0 : index
    %118 = vector.load %arg2[%c728, %c0_49] : memref<2632x128xf32, #tpu.memory_space<vmem>>, vector<28x14xf32>
    %cst_50 = arith.constant dense<0.000000e+00> : vector<32x14xf32>
    %119 = tpu.matmul %115, %118, %cst_50 {dimension_numbers = #tpu.dot_dimension_numbers<[1], [0], [0], [1], [0, 0, 1, 1], [], []>} : vector<32x28xf32>, vector<28x14xf32>, vector<32x14xf32> -> vector<32x14xf32>
    %c504 = arith.constant 504 : index
    %c0_51 = arith.constant 0 : index
    %120 = vector.load %arg2[%c504, %c0_51] : memref<2632x128xf32, #tpu.memory_space<vmem>>, vector<64x32xf32>
    %121 = vector.extract_strided_slice %117 {offsets = [0, 0], sizes = [32, 14], strides = [1, 1]} : vector<32x16xf32> to vector<32x14xf32>
    %cst_52 = arith.constant dense<0.000000e+00> : vector<64x14xf32>
    %122 = tpu.matmul %120, %121, %cst_52 {dimension_numbers = #tpu.dot_dimension_numbers<[1], [0], [0], [1], [0, 0, 1, 1], [], []>} : vector<64x32xf32>, vector<32x14xf32>, vector<64x14xf32> -> vector<64x14xf32>
    %c568 = arith.constant 568 : index
    %c0_53 = arith.constant 0 : index
    %123 = vector.load %arg2[%c568, %c0_53] : memref<2632x128xf32, #tpu.memory_space<vmem>>, vector<64x32xf32>
    %cst_54 = arith.constant dense<0.000000e+00> : vector<64x14xf32>
    %124 = tpu.matmul %123, %119, %cst_54 {dimension_numbers = #tpu.dot_dimension_numbers<[1], [0], [0], [1], [0, 0, 1, 1], [], []>} : vector<64x32xf32>, vector<32x14xf32>, vector<64x14xf32> -> vector<64x14xf32>
    %125 = arith.addf %122, %124 : vector<64x14xf32>
    %c632 = arith.constant 632 : index
    %c0_55 = arith.constant 0 : index
    %126 = vector.load %arg2[%c632, %c0_55] : memref<2632x128xf32, #tpu.memory_space<vmem>>, vector<64x32xf32>
    %127 = vector.extract_strided_slice %117 {offsets = [0, 2], sizes = [32, 14], strides = [1, 1]} : vector<32x16xf32> to vector<32x14xf32>
    %cst_56 = arith.constant dense<0.000000e+00> : vector<64x14xf32>
    %128 = tpu.matmul %126, %127, %cst_56 {dimension_numbers = #tpu.dot_dimension_numbers<[1], [0], [0], [1], [0, 0, 1, 1], [], []>} : vector<64x32xf32>, vector<32x14xf32>, vector<64x14xf32> -> vector<64x14xf32>
    %129 = arith.addf %125, %128 : vector<64x14xf32>
    %c760 = arith.constant 760 : index
    %c0_57 = arith.constant 0 : index
    %130 = vector.load %arg2[%c760, %c0_57] : memref<2632x128xf32, #tpu.memory_space<vmem>>, vector<14x2xf32>
    %c776 = arith.constant 776 : index
    %c0_58 = arith.constant 0 : index
    %131 = vector.load %arg2[%c776, %c0_58] : memref<2632x128xf32, #tpu.memory_space<vmem>>, vector<2x14xf32>
    %cst_59 = arith.constant dense<0.000000e+00> : vector<64x2xf32>
    %132 = tpu.matmul %129, %130, %cst_59 {dimension_numbers = #tpu.dot_dimension_numbers<[1], [0], [0], [1], [0, 0, 1, 1], [], []>} : vector<64x14xf32>, vector<14x2xf32>, vector<64x2xf32> -> vector<64x2xf32>
    %133 = arith.mulf %129, %129 : vector<64x14xf32>
    %cst_60 = arith.constant dense<0.000000e+00> : vector<64x2xf32>
    %134 = tpu.matmul %133, %130, %cst_60 {dimension_numbers = #tpu.dot_dimension_numbers<[1], [0], [0], [1], [0, 0, 1, 1], [], []>} : vector<64x14xf32>, vector<14x2xf32>, vector<64x2xf32> -> vector<64x2xf32>
    %cst_61 = arith.constant 0.142857149 : f32
    %135 = vector.broadcast %cst_61 : f32 to vector<64x2xf32>
    %136 = arith.mulf %132, %135 : vector<64x2xf32>
    %cst_62 = arith.constant 0.142857149 : f32
    %137 = vector.broadcast %cst_62 : f32 to vector<64x2xf32>
    %138 = arith.mulf %134, %137 : vector<64x2xf32>
    %139 = arith.mulf %136, %136 : vector<64x2xf32>
    %140 = arith.subf %138, %139 : vector<64x2xf32>
    %cst_63 = arith.constant 0.000000e+00 : f32
    %141 = vector.broadcast %cst_63 : f32 to vector<64x2xf32>
    %142 = arith.maximumf %140, %141 : vector<64x2xf32>
    %cst_64 = arith.constant 9.99999974E-6 : f32
    %143 = vector.broadcast %cst_64 : f32 to vector<64x2xf32>
    %144 = arith.addf %142, %143 : vector<64x2xf32>
    %145 = math.rsqrt %144 : vector<64x2xf32>
    %cst_65 = arith.constant 0.000000e+00 : f32
    %146 = vector.broadcast %cst_65 : f32 to vector<64x2xf32>
    %147 = arith.subf %146, %136 : vector<64x2xf32>
    %148 = arith.mulf %147, %145 : vector<64x2xf32>
    %cst_66 = arith.constant dense<0.000000e+00> : vector<64x14xf32>
    %149 = tpu.matmul %145, %131, %cst_66 {dimension_numbers = #tpu.dot_dimension_numbers<[1], [0], [0], [1], [0, 0, 1, 1], [], []>} : vector<64x2xf32>, vector<2x14xf32>, vector<64x14xf32> -> vector<64x14xf32>
    %cst_67 = arith.constant dense<0.000000e+00> : vector<64x14xf32>
    %150 = tpu.matmul %148, %131, %cst_67 {dimension_numbers = #tpu.dot_dimension_numbers<[1], [0], [0], [1], [0, 0, 1, 1], [], []>} : vector<64x2xf32>, vector<2x14xf32>, vector<64x14xf32> -> vector<64x14xf32>
    %151 = arith.mulf %129, %149 : vector<64x14xf32>
    %152 = arith.addf %151, %150 : vector<64x14xf32>
    %cst_68 = arith.constant 0.000000e+00 : f32
    %153 = vector.broadcast %cst_68 : f32 to vector<64x14xf32>
    %154 = arith.maximumf %152, %153 : vector<64x14xf32>
    %c784 = arith.constant 784 : index
    %c0_69 = arith.constant 0 : index
    %155 = vector.load %arg2[%c784, %c0_69] : memref<2632x128xf32, #tpu.memory_space<vmem>>, vector<14x18xf32>
    %cst_70 = arith.constant dense<0.000000e+00> : vector<64x18xf32>
    %156 = tpu.matmul %154, %155, %cst_70 {dimension_numbers = #tpu.dot_dimension_numbers<[1], [0], [0], [1], [0, 0, 1, 1], [], []>} : vector<64x14xf32>, vector<14x18xf32>, vector<64x18xf32> -> vector<64x18xf32>
    %c800 = arith.constant 800 : index
    %c0_71 = arith.constant 0 : index
    %157 = vector.load %arg2[%c800, %c0_71] : memref<2632x128xf32, #tpu.memory_space<vmem>>, vector<64x64xf32>
    %158 = vector.extract_strided_slice %156 {offsets = [0, 0], sizes = [64, 14], strides = [1, 1]} : vector<64x18xf32> to vector<64x14xf32>
    %cst_72 = arith.constant dense<0.000000e+00> : vector<64x14xf32>
    %159 = tpu.matmul %157, %158, %cst_72 {dimension_numbers = #tpu.dot_dimension_numbers<[1], [0], [0], [1], [0, 0, 1, 1], [], []>} : vector<64x64xf32>, vector<64x14xf32>, vector<64x14xf32> -> vector<64x14xf32>
    %c864 = arith.constant 864 : index
    %c0_73 = arith.constant 0 : index
    %160 = vector.load %arg2[%c864, %c0_73] : memref<2632x128xf32, #tpu.memory_space<vmem>>, vector<64x64xf32>
    %161 = vector.extract_strided_slice %156 {offsets = [0, 2], sizes = [64, 14], strides = [1, 1]} : vector<64x18xf32> to vector<64x14xf32>
    %cst_74 = arith.constant dense<0.000000e+00> : vector<64x14xf32>
    %162 = tpu.matmul %160, %161, %cst_74 {dimension_numbers = #tpu.dot_dimension_numbers<[1], [0], [0], [1], [0, 0, 1, 1], [], []>} : vector<64x64xf32>, vector<64x14xf32>, vector<64x14xf32> -> vector<64x14xf32>
    %163 = arith.addf %159, %162 : vector<64x14xf32>
    %c928 = arith.constant 928 : index
    %c0_75 = arith.constant 0 : index
    %164 = vector.load %arg2[%c928, %c0_75] : memref<2632x128xf32, #tpu.memory_space<vmem>>, vector<64x64xf32>
    %165 = vector.extract_strided_slice %156 {offsets = [0, 4], sizes = [64, 14], strides = [1, 1]} : vector<64x18xf32> to vector<64x14xf32>
    %cst_76 = arith.constant dense<0.000000e+00> : vector<64x14xf32>
    %166 = tpu.matmul %164, %165, %cst_76 {dimension_numbers = #tpu.dot_dimension_numbers<[1], [0], [0], [1], [0, 0, 1, 1], [], []>} : vector<64x64xf32>, vector<64x14xf32>, vector<64x14xf32> -> vector<64x14xf32>
    %167 = arith.addf %163, %166 : vector<64x14xf32>
    %c992 = arith.constant 992 : index
    %c0_77 = arith.constant 0 : index
    %168 = vector.load %arg2[%c992, %c0_77] : memref<2632x128xf32, #tpu.memory_space<vmem>>, vector<64x1xf32>
    %169 = vector.broadcast %168 : vector<64x1xf32> to vector<64x14xf32>
    %170 = arith.mulf %167, %169 : vector<64x14xf32>
    %c1056 = arith.constant 1056 : index
    %c0_78 = arith.constant 0 : index
    %171 = vector.load %arg2[%c1056, %c0_78] : memref<2632x128xf32, #tpu.memory_space<vmem>>, vector<64x1xf32>
    %172 = vector.broadcast %171 : vector<64x1xf32> to vector<64x14xf32>
    %173 = arith.addf %170, %172 : vector<64x14xf32>
    %cst_79 = arith.constant 0.000000e+00 : f32
    %174 = vector.broadcast %cst_79 : f32 to vector<64x14xf32>
    %175 = arith.maximumf %173, %174 : vector<64x14xf32>
    %cst_80 = arith.constant dense<0.000000e+00> : vector<64x18xf32>
    %176 = tpu.matmul %175, %155, %cst_80 {dimension_numbers = #tpu.dot_dimension_numbers<[1], [0], [0], [1], [0, 0, 1, 1], [], []>} : vector<64x14xf32>, vector<14x18xf32>, vector<64x18xf32> -> vector<64x18xf32>
    %c1120 = arith.constant 1120 : index
    %c0_81 = arith.constant 0 : index
    %177 = vector.load %arg2[%c1120, %c0_81] : memref<2632x128xf32, #tpu.memory_space<vmem>>, vector<64x64xf32>
    %178 = vector.extract_strided_slice %176 {offsets = [0, 0], sizes = [64, 14], strides = [1, 1]} : vector<64x18xf32> to vector<64x14xf32>
    %cst_82 = arith.constant dense<0.000000e+00> : vector<64x14xf32>
    %179 = tpu.matmul %177, %178, %cst_82 {dimension_numbers = #tpu.dot_dimension_numbers<[1], [0], [0], [1], [0, 0, 1, 1], [], []>} : vector<64x64xf32>, vector<64x14xf32>, vector<64x14xf32> -> vector<64x14xf32>
    %c1184 = arith.constant 1184 : index
    %c0_83 = arith.constant 0 : index
    %180 = vector.load %arg2[%c1184, %c0_83] : memref<2632x128xf32, #tpu.memory_space<vmem>>, vector<64x64xf32>
    %181 = vector.extract_strided_slice %176 {offsets = [0, 2], sizes = [64, 14], strides = [1, 1]} : vector<64x18xf32> to vector<64x14xf32>
    %cst_84 = arith.constant dense<0.000000e+00> : vector<64x14xf32>
    %182 = tpu.matmul %180, %181, %cst_84 {dimension_numbers = #tpu.dot_dimension_numbers<[1], [0], [0], [1], [0, 0, 1, 1], [], []>} : vector<64x64xf32>, vector<64x14xf32>, vector<64x14xf32> -> vector<64x14xf32>
    %183 = arith.addf %179, %182 : vector<64x14xf32>
    %c1248 = arith.constant 1248 : index
    %c0_85 = arith.constant 0 : index
    %184 = vector.load %arg2[%c1248, %c0_85] : memref<2632x128xf32, #tpu.memory_space<vmem>>, vector<64x64xf32>
    %185 = vector.extract_strided_slice %176 {offsets = [0, 4], sizes = [64, 14], strides = [1, 1]} : vector<64x18xf32> to vector<64x14xf32>
    %cst_86 = arith.constant dense<0.000000e+00> : vector<64x14xf32>
    %186 = tpu.matmul %184, %185, %cst_86 {dimension_numbers = #tpu.dot_dimension_numbers<[1], [0], [0], [1], [0, 0, 1, 1], [], []>} : vector<64x64xf32>, vector<64x14xf32>, vector<64x14xf32> -> vector<64x14xf32>
    %187 = arith.addf %183, %186 : vector<64x14xf32>
    %c1312 = arith.constant 1312 : index
    %c0_87 = arith.constant 0 : index
    %188 = vector.load %arg2[%c1312, %c0_87] : memref<2632x128xf32, #tpu.memory_space<vmem>>, vector<64x1xf32>
    %189 = vector.broadcast %188 : vector<64x1xf32> to vector<64x14xf32>
    %190 = arith.mulf %187, %189 : vector<64x14xf32>
    %c1376 = arith.constant 1376 : index
    %c0_88 = arith.constant 0 : index
    %191 = vector.load %arg2[%c1376, %c0_88] : memref<2632x128xf32, #tpu.memory_space<vmem>>, vector<64x1xf32>
    %192 = vector.broadcast %191 : vector<64x1xf32> to vector<64x14xf32>
    %193 = arith.addf %190, %192 : vector<64x14xf32>
    %cst_89 = arith.constant 0.000000e+00 : f32
    %194 = vector.broadcast %cst_89 : f32 to vector<64x14xf32>
    %195 = arith.maximumf %193, %194 : vector<64x14xf32>
    %196 = arith.addf %154, %195 : vector<64x14xf32>
    %cst_90 = arith.constant dense<0.000000e+00> : vector<64x18xf32>
    %197 = tpu.matmul %196, %155, %cst_90 {dimension_numbers = #tpu.dot_dimension_numbers<[1], [0], [0], [1], [0, 0, 1, 1], [], []>} : vector<64x14xf32>, vector<14x18xf32>, vector<64x18xf32> -> vector<64x18xf32>
    %c1440 = arith.constant 1440 : index
    %c0_91 = arith.constant 0 : index
    %198 = vector.load %arg2[%c1440, %c0_91] : memref<2632x128xf32, #tpu.memory_space<vmem>>, vector<64x64xf32>
    %199 = vector.extract_strided_slice %197 {offsets = [0, 0], sizes = [64, 14], strides = [1, 1]} : vector<64x18xf32> to vector<64x14xf32>
    %cst_92 = arith.constant dense<0.000000e+00> : vector<64x14xf32>
    %200 = tpu.matmul %198, %199, %cst_92 {dimension_numbers = #tpu.dot_dimension_numbers<[1], [0], [0], [1], [0, 0, 1, 1], [], []>} : vector<64x64xf32>, vector<64x14xf32>, vector<64x14xf32> -> vector<64x14xf32>
    %c1504 = arith.constant 1504 : index
    %c0_93 = arith.constant 0 : index
    %201 = vector.load %arg2[%c1504, %c0_93] : memref<2632x128xf32, #tpu.memory_space<vmem>>, vector<64x64xf32>
    %202 = vector.extract_strided_slice %197 {offsets = [0, 2], sizes = [64, 14], strides = [1, 1]} : vector<64x18xf32> to vector<64x14xf32>
    %cst_94 = arith.constant dense<0.000000e+00> : vector<64x14xf32>
    %203 = tpu.matmul %201, %202, %cst_94 {dimension_numbers = #tpu.dot_dimension_numbers<[1], [0], [0], [1], [0, 0, 1, 1], [], []>} : vector<64x64xf32>, vector<64x14xf32>, vector<64x14xf32> -> vector<64x14xf32>
    %204 = arith.addf %200, %203 : vector<64x14xf32>
    %c1568 = arith.constant 1568 : index
    %c0_95 = arith.constant 0 : index
    %205 = vector.load %arg2[%c1568, %c0_95] : memref<2632x128xf32, #tpu.memory_space<vmem>>, vector<64x64xf32>
    %206 = vector.extract_strided_slice %197 {offsets = [0, 4], sizes = [64, 14], strides = [1, 1]} : vector<64x18xf32> to vector<64x14xf32>
    %cst_96 = arith.constant dense<0.000000e+00> : vector<64x14xf32>
    %207 = tpu.matmul %205, %206, %cst_96 {dimension_numbers = #tpu.dot_dimension_numbers<[1], [0], [0], [1], [0, 0, 1, 1], [], []>} : vector<64x64xf32>, vector<64x14xf32>, vector<64x14xf32> -> vector<64x14xf32>
    %208 = arith.addf %204, %207 : vector<64x14xf32>
    %c1632 = arith.constant 1632 : index
    %c0_97 = arith.constant 0 : index
    %209 = vector.load %arg2[%c1632, %c0_97] : memref<2632x128xf32, #tpu.memory_space<vmem>>, vector<64x1xf32>
    %210 = vector.broadcast %209 : vector<64x1xf32> to vector<64x14xf32>
    %211 = arith.mulf %208, %210 : vector<64x14xf32>
    %c1696 = arith.constant 1696 : index
    %c0_98 = arith.constant 0 : index
    %212 = vector.load %arg2[%c1696, %c0_98] : memref<2632x128xf32, #tpu.memory_space<vmem>>, vector<64x1xf32>
    %213 = vector.broadcast %212 : vector<64x1xf32> to vector<64x14xf32>
    %214 = arith.addf %211, %213 : vector<64x14xf32>
    %cst_99 = arith.constant 0.000000e+00 : f32
    %215 = vector.broadcast %cst_99 : f32 to vector<64x14xf32>
    %216 = arith.maximumf %214, %215 : vector<64x14xf32>
    %cst_100 = arith.constant dense<0.000000e+00> : vector<64x18xf32>
    %217 = tpu.matmul %216, %155, %cst_100 {dimension_numbers = #tpu.dot_dimension_numbers<[1], [0], [0], [1], [0, 0, 1, 1], [], []>} : vector<64x14xf32>, vector<14x18xf32>, vector<64x18xf32> -> vector<64x18xf32>
    %c1760 = arith.constant 1760 : index
    %c0_101 = arith.constant 0 : index
    %218 = vector.load %arg2[%c1760, %c0_101] : memref<2632x128xf32, #tpu.memory_space<vmem>>, vector<64x64xf32>
    %219 = vector.extract_strided_slice %217 {offsets = [0, 0], sizes = [64, 14], strides = [1, 1]} : vector<64x18xf32> to vector<64x14xf32>
    %cst_102 = arith.constant dense<0.000000e+00> : vector<64x14xf32>
    %220 = tpu.matmul %218, %219, %cst_102 {dimension_numbers = #tpu.dot_dimension_numbers<[1], [0], [0], [1], [0, 0, 1, 1], [], []>} : vector<64x64xf32>, vector<64x14xf32>, vector<64x14xf32> -> vector<64x14xf32>
    %c1824 = arith.constant 1824 : index
    %c0_103 = arith.constant 0 : index
    %221 = vector.load %arg2[%c1824, %c0_103] : memref<2632x128xf32, #tpu.memory_space<vmem>>, vector<64x64xf32>
    %222 = vector.extract_strided_slice %217 {offsets = [0, 2], sizes = [64, 14], strides = [1, 1]} : vector<64x18xf32> to vector<64x14xf32>
    %cst_104 = arith.constant dense<0.000000e+00> : vector<64x14xf32>
    %223 = tpu.matmul %221, %222, %cst_104 {dimension_numbers = #tpu.dot_dimension_numbers<[1], [0], [0], [1], [0, 0, 1, 1], [], []>} : vector<64x64xf32>, vector<64x14xf32>, vector<64x14xf32> -> vector<64x14xf32>
    %224 = arith.addf %220, %223 : vector<64x14xf32>
    %c1888 = arith.constant 1888 : index
    %c0_105 = arith.constant 0 : index
    %225 = vector.load %arg2[%c1888, %c0_105] : memref<2632x128xf32, #tpu.memory_space<vmem>>, vector<64x64xf32>
    %226 = vector.extract_strided_slice %217 {offsets = [0, 4], sizes = [64, 14], strides = [1, 1]} : vector<64x18xf32> to vector<64x14xf32>
    %cst_106 = arith.constant dense<0.000000e+00> : vector<64x14xf32>
    %227 = tpu.matmul %225, %226, %cst_106 {dimension_numbers = #tpu.dot_dimension_numbers<[1], [0], [0], [1], [0, 0, 1, 1], [], []>} : vector<64x64xf32>, vector<64x14xf32>, vector<64x14xf32> -> vector<64x14xf32>
    %228 = arith.addf %224, %227 : vector<64x14xf32>
    %c1952 = arith.constant 1952 : index
    %c0_107 = arith.constant 0 : index
    %229 = vector.load %arg2[%c1952, %c0_107] : memref<2632x128xf32, #tpu.memory_space<vmem>>, vector<64x1xf32>
    %230 = vector.broadcast %229 : vector<64x1xf32> to vector<64x14xf32>
    %231 = arith.mulf %228, %230 : vector<64x14xf32>
    %c2016 = arith.constant 2016 : index
    %c0_108 = arith.constant 0 : index
    %232 = vector.load %arg2[%c2016, %c0_108] : memref<2632x128xf32, #tpu.memory_space<vmem>>, vector<64x1xf32>
    %233 = vector.broadcast %232 : vector<64x1xf32> to vector<64x14xf32>
    %234 = arith.addf %231, %233 : vector<64x14xf32>
    %cst_109 = arith.constant 0.000000e+00 : f32
    %235 = vector.broadcast %cst_109 : f32 to vector<64x14xf32>
    %236 = arith.maximumf %234, %235 : vector<64x14xf32>
    %237 = arith.addf %196, %236 : vector<64x14xf32>
    %c2080 = arith.constant 2080 : index
    %c0_110 = arith.constant 0 : index
    %238 = vector.load %arg2[%c2080, %c0_110] : memref<2632x128xf32, #tpu.memory_space<vmem>>, vector<14x36xf32>
    %cst_111 = arith.constant dense<0.000000e+00> : vector<64x36xf32>
    %239 = tpu.matmul %237, %238, %cst_111 {dimension_numbers = #tpu.dot_dimension_numbers<[1], [0], [0], [1], [0, 0, 1, 1], [], []>} : vector<64x14xf32>, vector<14x36xf32>, vector<64x36xf32> -> vector<64x36xf32>
    %c2096 = arith.constant 2096 : index
    %c0_112 = arith.constant 0 : index
    %240 = vector.load %arg2[%c2096, %c0_112] : memref<2632x128xf32, #tpu.memory_space<vmem>>, vector<32x64xf32>
    %241 = vector.extract_strided_slice %239 {offsets = [0, 0], sizes = [64, 30], strides = [1, 1]} : vector<64x36xf32> to vector<64x30xf32>
    %cst_113 = arith.constant dense<0.000000e+00> : vector<32x30xf32>
    %242 = tpu.matmul %240, %241, %cst_113 {dimension_numbers = #tpu.dot_dimension_numbers<[1], [0], [0], [1], [0, 0, 1, 1], [], []>} : vector<32x64xf32>, vector<64x30xf32>, vector<32x30xf32> -> vector<32x30xf32>
    %c2128 = arith.constant 2128 : index
    %c0_114 = arith.constant 0 : index
    %243 = vector.load %arg2[%c2128, %c0_114] : memref<2632x128xf32, #tpu.memory_space<vmem>>, vector<32x64xf32>
    %244 = vector.extract_strided_slice %239 {offsets = [0, 2], sizes = [64, 30], strides = [1, 1]} : vector<64x36xf32> to vector<64x30xf32>
    %cst_115 = arith.constant dense<0.000000e+00> : vector<32x30xf32>
    %245 = tpu.matmul %243, %244, %cst_115 {dimension_numbers = #tpu.dot_dimension_numbers<[1], [0], [0], [1], [0, 0, 1, 1], [], []>} : vector<32x64xf32>, vector<64x30xf32>, vector<32x30xf32> -> vector<32x30xf32>
    %246 = arith.addf %242, %245 : vector<32x30xf32>
    %c2160 = arith.constant 2160 : index
    %c0_116 = arith.constant 0 : index
    %247 = vector.load %arg2[%c2160, %c0_116] : memref<2632x128xf32, #tpu.memory_space<vmem>>, vector<32x64xf32>
    %248 = vector.extract_strided_slice %239 {offsets = [0, 4], sizes = [64, 30], strides = [1, 1]} : vector<64x36xf32> to vector<64x30xf32>
    %cst_117 = arith.constant dense<0.000000e+00> : vector<32x30xf32>
    %249 = tpu.matmul %247, %248, %cst_117 {dimension_numbers = #tpu.dot_dimension_numbers<[1], [0], [0], [1], [0, 0, 1, 1], [], []>} : vector<32x64xf32>, vector<64x30xf32>, vector<32x30xf32> -> vector<32x30xf32>
    %250 = arith.addf %246, %249 : vector<32x30xf32>
    %c2192 = arith.constant 2192 : index
    %c0_118 = arith.constant 0 : index
    %251 = vector.load %arg2[%c2192, %c0_118] : memref<2632x128xf32, #tpu.memory_space<vmem>>, vector<32x64xf32>
    %252 = vector.extract_strided_slice %239 {offsets = [0, 6], sizes = [64, 30], strides = [1, 1]} : vector<64x36xf32> to vector<64x30xf32>
    %cst_119 = arith.constant dense<0.000000e+00> : vector<32x30xf32>
    %253 = tpu.matmul %251, %252, %cst_119 {dimension_numbers = #tpu.dot_dimension_numbers<[1], [0], [0], [1], [0, 0, 1, 1], [], []>} : vector<32x64xf32>, vector<64x30xf32>, vector<32x30xf32> -> vector<32x30xf32>
    %254 = arith.addf %250, %253 : vector<32x30xf32>
    %c2224 = arith.constant 2224 : index
    %c0_120 = arith.constant 0 : index
    %255 = vector.load %arg2[%c2224, %c0_120] : memref<2632x128xf32, #tpu.memory_space<vmem>>, vector<30x2xf32>
    %c2256 = arith.constant 2256 : index
    %c0_121 = arith.constant 0 : index
    %256 = vector.load %arg2[%c2256, %c0_121] : memref<2632x128xf32, #tpu.memory_space<vmem>>, vector<2x30xf32>
    %cst_122 = arith.constant dense<0.000000e+00> : vector<32x2xf32>
    %257 = tpu.matmul %254, %255, %cst_122 {dimension_numbers = #tpu.dot_dimension_numbers<[1], [0], [0], [1], [0, 0, 1, 1], [], []>} : vector<32x30xf32>, vector<30x2xf32>, vector<32x2xf32> -> vector<32x2xf32>
    %258 = arith.mulf %254, %254 : vector<32x30xf32>
    %cst_123 = arith.constant dense<0.000000e+00> : vector<32x2xf32>
    %259 = tpu.matmul %258, %255, %cst_123 {dimension_numbers = #tpu.dot_dimension_numbers<[1], [0], [0], [1], [0, 0, 1, 1], [], []>} : vector<32x30xf32>, vector<30x2xf32>, vector<32x2xf32> -> vector<32x2xf32>
    %cst_124 = arith.constant 0.0666666701 : f32
    %260 = vector.broadcast %cst_124 : f32 to vector<32x2xf32>
    %261 = arith.mulf %257, %260 : vector<32x2xf32>
    %cst_125 = arith.constant 0.0666666701 : f32
    %262 = vector.broadcast %cst_125 : f32 to vector<32x2xf32>
    %263 = arith.mulf %259, %262 : vector<32x2xf32>
    %264 = arith.mulf %261, %261 : vector<32x2xf32>
    %265 = arith.subf %263, %264 : vector<32x2xf32>
    %cst_126 = arith.constant 0.000000e+00 : f32
    %266 = vector.broadcast %cst_126 : f32 to vector<32x2xf32>
    %267 = arith.maximumf %265, %266 : vector<32x2xf32>
    %cst_127 = arith.constant 9.99999974E-6 : f32
    %268 = vector.broadcast %cst_127 : f32 to vector<32x2xf32>
    %269 = arith.addf %267, %268 : vector<32x2xf32>
    %270 = math.rsqrt %269 : vector<32x2xf32>
    %cst_128 = arith.constant 0.000000e+00 : f32
    %271 = vector.broadcast %cst_128 : f32 to vector<32x2xf32>
    %272 = arith.subf %271, %261 : vector<32x2xf32>
    %273 = arith.mulf %272, %270 : vector<32x2xf32>
    %cst_129 = arith.constant dense<0.000000e+00> : vector<32x30xf32>
    %274 = tpu.matmul %270, %256, %cst_129 {dimension_numbers = #tpu.dot_dimension_numbers<[1], [0], [0], [1], [0, 0, 1, 1], [], []>} : vector<32x2xf32>, vector<2x30xf32>, vector<32x30xf32> -> vector<32x30xf32>
    %cst_130 = arith.constant dense<0.000000e+00> : vector<32x30xf32>
    %275 = tpu.matmul %273, %256, %cst_130 {dimension_numbers = #tpu.dot_dimension_numbers<[1], [0], [0], [1], [0, 0, 1, 1], [], []>} : vector<32x2xf32>, vector<2x30xf32>, vector<32x30xf32> -> vector<32x30xf32>
    %276 = arith.mulf %254, %274 : vector<32x30xf32>
    %277 = arith.addf %276, %275 : vector<32x30xf32>
    %cst_131 = arith.constant 0.000000e+00 : f32
    %278 = vector.broadcast %cst_131 : f32 to vector<32x30xf32>
    %279 = arith.maximumf %277, %278 : vector<32x30xf32>
    %c2264 = arith.constant 2264 : index
    %c0_132 = arith.constant 0 : index
    %280 = vector.load %arg2[%c2264, %c0_132] : memref<2632x128xf32, #tpu.memory_space<vmem>>, vector<30x68xf32>
    %cst_133 = arith.constant dense<0.000000e+00> : vector<32x68xf32>
    %281 = tpu.matmul %279, %280, %cst_133 {dimension_numbers = #tpu.dot_dimension_numbers<[1], [0], [0], [1], [0, 0, 1, 1], [], []>} : vector<32x30xf32>, vector<30x68xf32>, vector<32x68xf32> -> vector<32x68xf32>
    %c2296 = arith.constant 2296 : index
    %c0_134 = arith.constant 0 : index
    %282 = vector.load %arg2[%c2296, %c0_134] : memref<2632x128xf32, #tpu.memory_space<vmem>>, vector<16x32xf32>
    %283 = vector.extract_strided_slice %281 {offsets = [0, 0], sizes = [32, 62], strides = [1, 1]} : vector<32x68xf32> to vector<32x62xf32>
    %cst_135 = arith.constant dense<0.000000e+00> : vector<16x62xf32>
    %284 = tpu.matmul %282, %283, %cst_135 {dimension_numbers = #tpu.dot_dimension_numbers<[1], [0], [0], [1], [0, 0, 1, 1], [], []>} : vector<16x32xf32>, vector<32x62xf32>, vector<16x62xf32> -> vector<16x62xf32>
    %c2312 = arith.constant 2312 : index
    %c0_136 = arith.constant 0 : index
    %285 = vector.load %arg2[%c2312, %c0_136] : memref<2632x128xf32, #tpu.memory_space<vmem>>, vector<16x32xf32>
    %286 = vector.extract_strided_slice %281 {offsets = [0, 2], sizes = [32, 62], strides = [1, 1]} : vector<32x68xf32> to vector<32x62xf32>
    %cst_137 = arith.constant dense<0.000000e+00> : vector<16x62xf32>
    %287 = tpu.matmul %285, %286, %cst_137 {dimension_numbers = #tpu.dot_dimension_numbers<[1], [0], [0], [1], [0, 0, 1, 1], [], []>} : vector<16x32xf32>, vector<32x62xf32>, vector<16x62xf32> -> vector<16x62xf32>
    %288 = arith.addf %284, %287 : vector<16x62xf32>
    %c2328 = arith.constant 2328 : index
    %c0_138 = arith.constant 0 : index
    %289 = vector.load %arg2[%c2328, %c0_138] : memref<2632x128xf32, #tpu.memory_space<vmem>>, vector<16x32xf32>
    %290 = vector.extract_strided_slice %281 {offsets = [0, 4], sizes = [32, 62], strides = [1, 1]} : vector<32x68xf32> to vector<32x62xf32>
    %cst_139 = arith.constant dense<0.000000e+00> : vector<16x62xf32>
    %291 = tpu.matmul %289, %290, %cst_139 {dimension_numbers = #tpu.dot_dimension_numbers<[1], [0], [0], [1], [0, 0, 1, 1], [], []>} : vector<16x32xf32>, vector<32x62xf32>, vector<16x62xf32> -> vector<16x62xf32>
    %292 = arith.addf %288, %291 : vector<16x62xf32>
    %c2344 = arith.constant 2344 : index
    %c0_140 = arith.constant 0 : index
    %293 = vector.load %arg2[%c2344, %c0_140] : memref<2632x128xf32, #tpu.memory_space<vmem>>, vector<16x32xf32>
    %294 = vector.extract_strided_slice %281 {offsets = [0, 6], sizes = [32, 62], strides = [1, 1]} : vector<32x68xf32> to vector<32x62xf32>
    %cst_141 = arith.constant dense<0.000000e+00> : vector<16x62xf32>
    %295 = tpu.matmul %293, %294, %cst_141 {dimension_numbers = #tpu.dot_dimension_numbers<[1], [0], [0], [1], [0, 0, 1, 1], [], []>} : vector<16x32xf32>, vector<32x62xf32>, vector<16x62xf32> -> vector<16x62xf32>
    %296 = arith.addf %292, %295 : vector<16x62xf32>
    %c2360 = arith.constant 2360 : index
    %c0_142 = arith.constant 0 : index
    %297 = vector.load %arg2[%c2360, %c0_142] : memref<2632x128xf32, #tpu.memory_space<vmem>>, vector<62x2xf32>
    %c2424 = arith.constant 2424 : index
    %c0_143 = arith.constant 0 : index
    %298 = vector.load %arg2[%c2424, %c0_143] : memref<2632x128xf32, #tpu.memory_space<vmem>>, vector<2x62xf32>
    %cst_144 = arith.constant dense<0.000000e+00> : vector<16x2xf32>
    %299 = tpu.matmul %296, %297, %cst_144 {dimension_numbers = #tpu.dot_dimension_numbers<[1], [0], [0], [1], [0, 0, 1, 1], [], []>} : vector<16x62xf32>, vector<62x2xf32>, vector<16x2xf32> -> vector<16x2xf32>
    %300 = arith.mulf %296, %296 : vector<16x62xf32>
    %cst_145 = arith.constant dense<0.000000e+00> : vector<16x2xf32>
    %301 = tpu.matmul %300, %297, %cst_145 {dimension_numbers = #tpu.dot_dimension_numbers<[1], [0], [0], [1], [0, 0, 1, 1], [], []>} : vector<16x62xf32>, vector<62x2xf32>, vector<16x2xf32> -> vector<16x2xf32>
    %cst_146 = arith.constant 0.0322580636 : f32
    %302 = vector.broadcast %cst_146 : f32 to vector<16x2xf32>
    %303 = arith.mulf %299, %302 : vector<16x2xf32>
    %cst_147 = arith.constant 0.0322580636 : f32
    %304 = vector.broadcast %cst_147 : f32 to vector<16x2xf32>
    %305 = arith.mulf %301, %304 : vector<16x2xf32>
    %306 = arith.mulf %303, %303 : vector<16x2xf32>
    %307 = arith.subf %305, %306 : vector<16x2xf32>
    %cst_148 = arith.constant 0.000000e+00 : f32
    %308 = vector.broadcast %cst_148 : f32 to vector<16x2xf32>
    %309 = arith.maximumf %307, %308 : vector<16x2xf32>
    %cst_149 = arith.constant 9.99999974E-6 : f32
    %310 = vector.broadcast %cst_149 : f32 to vector<16x2xf32>
    %311 = arith.addf %309, %310 : vector<16x2xf32>
    %312 = math.rsqrt %311 : vector<16x2xf32>
    %cst_150 = arith.constant 0.000000e+00 : f32
    %313 = vector.broadcast %cst_150 : f32 to vector<16x2xf32>
    %314 = arith.subf %313, %303 : vector<16x2xf32>
    %315 = arith.mulf %314, %312 : vector<16x2xf32>
    %cst_151 = arith.constant dense<0.000000e+00> : vector<16x62xf32>
    %316 = tpu.matmul %312, %298, %cst_151 {dimension_numbers = #tpu.dot_dimension_numbers<[1], [0], [0], [1], [0, 0, 1, 1], [], []>} : vector<16x2xf32>, vector<2x62xf32>, vector<16x62xf32> -> vector<16x62xf32>
    %cst_152 = arith.constant dense<0.000000e+00> : vector<16x62xf32>
    %317 = tpu.matmul %315, %298, %cst_152 {dimension_numbers = #tpu.dot_dimension_numbers<[1], [0], [0], [1], [0, 0, 1, 1], [], []>} : vector<16x2xf32>, vector<2x62xf32>, vector<16x62xf32> -> vector<16x62xf32>
    %318 = arith.mulf %296, %316 : vector<16x62xf32>
    %319 = arith.addf %318, %317 : vector<16x62xf32>
    %cst_153 = arith.constant 0.000000e+00 : f32
    %320 = vector.broadcast %cst_153 : f32 to vector<16x62xf32>
    %321 = arith.maximumf %319, %320 : vector<16x62xf32>
    %c2432 = arith.constant 2432 : index
    %c0_154 = arith.constant 0 : index
    %322 = vector.load %arg2[%c2432, %c0_154] : memref<2632x128xf32, #tpu.memory_space<vmem>>, vector<62x78xf32>
    %cst_155 = arith.constant dense<0.000000e+00> : vector<16x78xf32>
    %323 = tpu.matmul %321, %322, %cst_155 {dimension_numbers = #tpu.dot_dimension_numbers<[1], [0], [0], [1], [0, 0, 1, 1], [], []>} : vector<16x62xf32>, vector<62x78xf32>, vector<16x78xf32> -> vector<16x78xf32>
    %c2496 = arith.constant 2496 : index
    %c0_156 = arith.constant 0 : index
    %324 = vector.load %arg2[%c2496, %c0_156] : memref<2632x128xf32, #tpu.memory_space<vmem>>, vector<1x16xf32>
    %325 = vector.extract_strided_slice %323 {offsets = [0, 0], sizes = [16, 64], strides = [1, 1]} : vector<16x78xf32> to vector<16x64xf32>
    %cst_157 = arith.constant dense<0.000000e+00> : vector<1x64xf32>
    %326 = tpu.matmul %324, %325, %cst_157 {dimension_numbers = #tpu.dot_dimension_numbers<[1], [0], [0], [1], [0, 0, 1, 1], [], []>} : vector<1x16xf32>, vector<16x64xf32>, vector<1x64xf32> -> vector<1x64xf32>
    %c2504 = arith.constant 2504 : index
    %c0_158 = arith.constant 0 : index
    %327 = vector.load %arg2[%c2504, %c0_158] : memref<2632x128xf32, #tpu.memory_space<vmem>>, vector<1x16xf32>
    %328 = vector.extract_strided_slice %323 {offsets = [0, 2], sizes = [16, 64], strides = [1, 1]} : vector<16x78xf32> to vector<16x64xf32>
    %cst_159 = arith.constant dense<0.000000e+00> : vector<1x64xf32>
    %329 = tpu.matmul %327, %328, %cst_159 {dimension_numbers = #tpu.dot_dimension_numbers<[1], [0], [0], [1], [0, 0, 1, 1], [], []>} : vector<1x16xf32>, vector<16x64xf32>, vector<1x64xf32> -> vector<1x64xf32>
    %330 = arith.addf %326, %329 : vector<1x64xf32>
    %c2512 = arith.constant 2512 : index
    %c0_160 = arith.constant 0 : index
    %331 = vector.load %arg2[%c2512, %c0_160] : memref<2632x128xf32, #tpu.memory_space<vmem>>, vector<1x16xf32>
    %332 = vector.extract_strided_slice %323 {offsets = [0, 4], sizes = [16, 64], strides = [1, 1]} : vector<16x78xf32> to vector<16x64xf32>
    %cst_161 = arith.constant dense<0.000000e+00> : vector<1x64xf32>
    %333 = tpu.matmul %331, %332, %cst_161 {dimension_numbers = #tpu.dot_dimension_numbers<[1], [0], [0], [1], [0, 0, 1, 1], [], []>} : vector<1x16xf32>, vector<16x64xf32>, vector<1x64xf32> -> vector<1x64xf32>
    %334 = arith.addf %330, %333 : vector<1x64xf32>
    %c2520 = arith.constant 2520 : index
    %c0_162 = arith.constant 0 : index
    %335 = vector.load %arg2[%c2520, %c0_162] : memref<2632x128xf32, #tpu.memory_space<vmem>>, vector<1x16xf32>
    %336 = vector.extract_strided_slice %323 {offsets = [0, 6], sizes = [16, 64], strides = [1, 1]} : vector<16x78xf32> to vector<16x64xf32>
    %cst_163 = arith.constant dense<0.000000e+00> : vector<1x64xf32>
    %337 = tpu.matmul %335, %336, %cst_163 {dimension_numbers = #tpu.dot_dimension_numbers<[1], [0], [0], [1], [0, 0, 1, 1], [], []>} : vector<1x16xf32>, vector<16x64xf32>, vector<1x64xf32> -> vector<1x64xf32>
    %338 = arith.addf %334, %337 : vector<1x64xf32>
    %c2528 = arith.constant 2528 : index
    %c0_164 = arith.constant 0 : index
    %339 = vector.load %arg2[%c2528, %c0_164] : memref<2632x128xf32, #tpu.memory_space<vmem>>, vector<1x16xf32>
    %340 = vector.extract_strided_slice %323 {offsets = [0, 8], sizes = [16, 64], strides = [1, 1]} : vector<16x78xf32> to vector<16x64xf32>
    %cst_165 = arith.constant dense<0.000000e+00> : vector<1x64xf32>
    %341 = tpu.matmul %339, %340, %cst_165 {dimension_numbers = #tpu.dot_dimension_numbers<[1], [0], [0], [1], [0, 0, 1, 1], [], []>} : vector<1x16xf32>, vector<16x64xf32>, vector<1x64xf32> -> vector<1x64xf32>
    %342 = arith.addf %338, %341 : vector<1x64xf32>
    %c2536 = arith.constant 2536 : index
    %c0_166 = arith.constant 0 : index
    %343 = vector.load %arg2[%c2536, %c0_166] : memref<2632x128xf32, #tpu.memory_space<vmem>>, vector<1x16xf32>
    %344 = vector.extract_strided_slice %323 {offsets = [0, 10], sizes = [16, 64], strides = [1, 1]} : vector<16x78xf32> to vector<16x64xf32>
    %cst_167 = arith.constant dense<0.000000e+00> : vector<1x64xf32>
    %345 = tpu.matmul %343, %344, %cst_167 {dimension_numbers = #tpu.dot_dimension_numbers<[1], [0], [0], [1], [0, 0, 1, 1], [], []>} : vector<1x16xf32>, vector<16x64xf32>, vector<1x64xf32> -> vector<1x64xf32>
    %346 = arith.addf %342, %345 : vector<1x64xf32>
    %c2544 = arith.constant 2544 : index
    %c0_168 = arith.constant 0 : index
    %347 = vector.load %arg2[%c2544, %c0_168] : memref<2632x128xf32, #tpu.memory_space<vmem>>, vector<1x16xf32>
    %348 = vector.extract_strided_slice %323 {offsets = [0, 12], sizes = [16, 64], strides = [1, 1]} : vector<16x78xf32> to vector<16x64xf32>
    %cst_169 = arith.constant dense<0.000000e+00> : vector<1x64xf32>
    %349 = tpu.matmul %347, %348, %cst_169 {dimension_numbers = #tpu.dot_dimension_numbers<[1], [0], [0], [1], [0, 0, 1, 1], [], []>} : vector<1x16xf32>, vector<16x64xf32>, vector<1x64xf32> -> vector<1x64xf32>
    %350 = arith.addf %346, %349 : vector<1x64xf32>
    %c2552 = arith.constant 2552 : index
    %c0_170 = arith.constant 0 : index
    %351 = vector.load %arg2[%c2552, %c0_170] : memref<2632x128xf32, #tpu.memory_space<vmem>>, vector<1x16xf32>
    %352 = vector.extract_strided_slice %323 {offsets = [0, 14], sizes = [16, 64], strides = [1, 1]} : vector<16x78xf32> to vector<16x64xf32>
    %cst_171 = arith.constant dense<0.000000e+00> : vector<1x64xf32>
    %353 = tpu.matmul %351, %352, %cst_171 {dimension_numbers = #tpu.dot_dimension_numbers<[1], [0], [0], [1], [0, 0, 1, 1], [], []>} : vector<1x16xf32>, vector<16x64xf32>, vector<1x64xf32> -> vector<1x64xf32>
    %354 = arith.addf %350, %353 : vector<1x64xf32>
    %c2624 = arith.constant 2624 : index
    %c0_172 = arith.constant 0 : index
    %355 = vector.load %arg2[%c2624, %c0_172] : memref<2632x128xf32, #tpu.memory_space<vmem>>, vector<1x1xf32>
    %356 = vector.broadcast %355 : vector<1x1xf32> to vector<1x64xf32>
    %357 = arith.addf %354, %356 : vector<1x64xf32>
    %c2560 = arith.constant 2560 : index
    %c0_173 = arith.constant 0 : index
    %358 = vector.load %arg2[%c2560, %c0_173] : memref<2632x128xf32, #tpu.memory_space<vmem>>, vector<64x64xf32>
    %cst_174 = arith.constant dense<0.000000e+00> : vector<1x64xf32>
    %359 = tpu.matmul %357, %358, %cst_174 {dimension_numbers = #tpu.dot_dimension_numbers<[1], [0], [0], [1], [0, 0, 1, 1], [], []>} : vector<1x64xf32>, vector<64x64xf32>, vector<1x64xf32> -> vector<1x64xf32>
    %360 = math.tanh %359 : vector<1x64xf32>
    %361 = vector.extract_strided_slice %360 {offsets = [0, 0], sizes = [1, 32], strides = [1, 1]} : vector<1x64xf32> to vector<1x32xf32>
    %c0_175 = arith.constant 0 : index
    %c0_176 = arith.constant 0 : index
    %c0_177 = arith.constant 0 : index
    %362 = vector.load %arg3[%c0_175, %c0_176, %c0_177] : memref<2x1x32xf32, #tpu.memory_space<vmem>>, vector<1x1x32xf32>
    %363 = vector.shape_cast %362 : vector<1x1x32xf32> to vector<1x32xf32>
    %364 = vector.shape_cast %361 : vector<1x32xf32> to vector<1x1x32xf32>
    tpu.vector_store %arg3[%c0_175, %c0_176, %c0_177], %364 {strides = array<i32>} : memref<2x1x32xf32, #tpu.memory_space<vmem>>, vector<1x1x32xf32>,
    %365 = vector.extract_strided_slice %360 {offsets = [0, 32], sizes = [1, 32], strides = [1, 1]} : vector<1x64xf32> to vector<1x32xf32>
    %c1 = arith.constant 1 : index
    %c0_178 = arith.constant 0 : index
    %c0_179 = arith.constant 0 : index
    %366 = vector.load %arg3[%c1, %c0_178, %c0_179] : memref<2x1x32xf32, #tpu.memory_space<vmem>>, vector<1x1x32xf32>
    %367 = vector.shape_cast %366 : vector<1x1x32xf32> to vector<1x32xf32>
    %368 = vector.shape_cast %365 : vector<1x32xf32> to vector<1x1x32xf32>
    tpu.vector_store %arg3[%c1, %c0_178, %c0_179], %368 {strides = array<i32>} : memref<2x1x32xf32, #tpu.memory_space<vmem>>, vector<1x1x32xf32>,
    return
  }
}

</mosaic_0001>

<bundles_post_ra>
// kernel: _lambda_.1
= control target key start
LH: loop header
LB: loop body
LE: loop exit
PB: predicated region body
PF: predicated region fallthrough
CT: control target
= control target key end

     0   :  { %8 = vsyncpa [#allocation3], 0  ;;  %s11595_s0 = inlined_call_operand.vmem [shape: f32[1,64], index: 0, kind: input, shape index: {}]   ;;  %s11596_s1 = inlined_call_operand.vmem [shape: f32[1,64], index: 1, kind: input, shape index: {}]   ;;  %s11597_s2 = inlined_call_operand.hbm [shape: f32[2632,128], index: 2, kind: input, shape index: {}]   ;;  %s11598_s3 = inlined_call_operand.hbm [shape: f32[2,1,32], index: 3, kind: output, shape index: {}]  }
   0x1   :  { %9 = vsyncpa [#allocation4], 0  ;;  %s10675_s12 = smov [#allocation2]  }
   0x2   :  { %s19_s13 = sshll.u32 %s10675_s12, 4  ;;  %s20_s13 = int_to_ptr.vmem [resolvable:$true] %s19_s13 }
   0x3   :  { %s10639_s14 = scalar_lea.vmem %s20_s13, 42112  ;;  %p10644_p1 = scmp.lt.s32.totalorder %s20_s13, %s20_s13 }
   0x4   :  { %p10640_p0 = scmp.ne.s32.totalorder %s20_s13, %s10639_s14  ;;  %p10645_p2 = scmp.lt.s32.totalorder %s10639_s14, %s10639_s14 }
   0x6   :  { %p10646_p3 = por %p10645_p2, %p10644_p1 }
   0x8   :  { %p10647_p4 = pnand %p10646_p3, %p10640_p0 }
   0xa   :  { %10650 = shalt.err (!%p10647_p4)
}
   0xb   :  { %s10676_s15 = smov 128   ;;  %s10677_s16 = smov 8  }
   0xc   :  { %25 = dma.hbm_to_vmem [thread:$0]  %s11597_s2, 42112, %s20_s13, [#allocation3], %s10676_s15, %s10676_s15, %s10677_s16  }
   0xd   :  { %10671 = dma.done.wait [#allocation3], 42112  }
   0xe   :  { %10672 = vsyncadd [#allocation3], 4294925184  ;;  %v10678_v0 = vmov 0.0   ;;  %vm10679_vm0 = vmmov 0   ;;  %v10680_v1 = vmov 0   ;;  %v39_v2 = vld [vmem:[#allocation2 + $0x38] sm:$0xff]  ;;  %v126_v30 = vlaneseq }
   0xf   :  { %9501 = vmatprep.subr.mxu0 %v10678_v0  ;;  %9517 = vmatprep.mubr.msk.f32.mxu0 %vm10679_vm0, %v10678_v0  ;;  %v38_v3 = vld [vmem:[#allocation2 + $0x30] sm:$0xff]  ;;  %v37_v4 = vld [vmem:[#allocation2 + $0x28] sm:$0xff]  ;;  %v156_v6 = vld [vmem:[#allocation2 + $0x60] sm:$0xff]  ;;  %vm40_vm1 = vcmask 523264   ;;  %vm315_vm2 = vcmask 1045504   ;;  %s10683_s22 = smov 122  }
  0x10   :  { %10585 = vset.pattern.permute.xlu0 %v10680_v1  ;;  %10586 = vset.pattern.permute.xlu1 %v10680_v1  ;;  %v132_v5 = vld [vmem:[#allocation2 + $0x50] sm:$0xff]  ;;  %v36_v7 = vld [vmem:[#allocation2 + $0x20] sm:$0xff]  ;;  %v133_v8 = vld [vmem:[#allocation2 + $0x58] sm:$0xff]  ;;  %v127_v32 = vshrl.u32 %v126_v30, 7  ;;  %s10684_s23 = smov 120   ;;  %s10685_s24 = smov 118  }
  0x11   :  { %9502 = vmatpush3.msra.mxu0 %v39_v2  ;;  %136 = vperm.xlu0 %10585, %v132_v5   ;;  %v35_v9 = vld [vmem:[#allocation2 + $0x18] sm:$0xff]  ;;  %v157_v10 = vld [vmem:[#allocation2 + $0x68] sm:$0xff]  ;;  %v34_v11 = vld [vmem:[#allocation2 + $0x10] sm:$0xff]  ;;  %s10686_s25 = smov 116   ;;  %s10687_s26 = smov 114   ;;  %vm308_vm3 = vcmask 441344  }
  0x12   :  { %9503 = vmatprep.subr.mxu0 %v10678_v0  ;;  %160 = vperm.xlu1 %10586, %v156_v6   ;;  %v29_v12 = vld [vmem:[%s11595_s0] sm:$0x1]  ;;  %v180_v14 = vld [vmem:[#allocation2 + $0x70] sm:$0xff]  ;;  %v33_v15 = vld [vmem:[#allocation2 + $0x8] sm:$0xff]  ;;  %v128_v35 = vsub.s32 0, %v127_v32  ;;  %s10681_s0 = smov 126  }
  0x13   :  { %9504 = vmatpush3.msra.mxu0 %v38_v3  ;;  %v30_v13 = vld [vmem:[%s11596_s1] sm:$0x1]  ;;  %v181_v16 = vld [vmem:[#allocation2 + $0x78] sm:$0xff]  ;;  %v205_v20 = vld [vmem:[#allocation2 + $0x88] sm:$0xff]  ;;  %s10682_s1 = smov 124   ;;  %vm502_vm4 = vcmask 1041408  }
  0x14   :  { %9505 = vmatprep.subr.mxu0 %v10678_v0  ;;  %v32_v17 = vld [vmem:[#allocation2] sm:$0xff]  ;;  %v31_v18 = vmul.f32 %v30_v13, %v29_v12  ;;  %v228_v21 = vld [vmem:[#allocation2 + $0x90] sm:$0xff]  ;;  %v229_v22 = vld [vmem:[#allocation2 + $0x98] sm:$0xff]  ;;  %vm495_vm5 = vcmask 15360   ;;  %vm852_vm6 = vcmask 130048   ;;  %vm1178_vm7 = vcmask 1043456  }
  0x15   :  { %9506 = vmatpush3.msra.mxu0 %v37_v4  ;;  %141 = vperm.xlu0 %10585, %v133_v8   ;;  %v204_v19 = vld [vmem:[#allocation2 + $0x80] sm:$0xff]  ;;  %v253_v24 = vld [vmem:[#allocation2 + $0xa8] sm:$0xff]  ;;  %v276_v25 = vld [vmem:[#allocation2 + $0xb0] sm:$0xff]  ;;  %vm1165_vm8 = vcmask 228352   ;;  %vm1825_vm9 = vcmask 261120   ;;  %vm2248_vm10 = vcmask 113664  }
  0x16   :  { %9507 = vmatprep.subr.mxu0 %v10678_v0  ;;  %165 = vperm.xlu1 %10586, %v157_v10   ;;  %v252_v23 = vld [vmem:[#allocation2 + $0xa0] sm:$0xff]  ;;  %v277_v26 = vld [vmem:[#allocation2 + $0xb8] sm:$0xff]  ;;  %v115_v28 = vld [vmem:[#allocation2 + $0x48] sm:$0xff]  ;;  %vm6423_vm11 = vcmask 244736   ;;  %vm7359_vm12 = vcmask 506880   ;;  %vm8539_vm13 = vcmask 253952  }
  0x17   :  { %9508 = vmatpush3.msra.mxu0 %v36_v7  ;;  %v114_v27 = vld [vmem:[#allocation2 + $0x40] sm:$0xff]  ;;  %v10736_v43 = vld [vmem:[#allocation2 + $0xf0] sm:$0x3f]  ;;  %v10740_v44 = vld [vmem:[#allocation2 + $0xe8] sm:$0xff]  ;;  %s10688_s27 = smov 96   ;;  %s10689_s28 = smov [#allocation5]  }
  0x18   :  { %9509 = vmatprep.subr.mxu0 %v10678_v0  ;;  %9520 = vmatprep.subr.msk.mxu1 %vm315_vm2, %v10736_v43  ;;  %v10749_v49 = vld [vmem:[#allocation2 + $0xe0] sm:$0xff]  ;;  %v10757_v52 = vld [vmem:[#allocation2 + $0xd8] sm:$0xff]  ;;  %v10762_v53 = vld [vmem:[#allocation2 + $0xd0] sm:$0xff]  ;;  %s8552_s29 = sshll.u32 %s10689_s28, 4  ;;  %s8553_s29 = int_to_ptr.vmem [resolvable:$true] %s8552_s29 }
  0x19   :  { %9510 = vmatpush3.msra.mxu0 %v35_v9  ;;  %184 = vperm.xlu0 %10585, %v180_v14   ;;  %v10769_v58 = vld [vmem:[#allocation2 + $0xc8] sm:$0xff]  ;;  %v10777_v61 = vld [vmem:[#allocation2 + $0xc0] sm:$0xff]  ;;  %s10651_s30 = scalar_lea.vmem %s8553_s29, 32  ;;  %p10656_p6 = scmp.lt.s32.totalorder %s8553_s29, %s8553_s29 }
  0x1a   :  { %9511 = vmatprep.subr.mxu0 %v10678_v0  ;;  %189 = vperm.xlu1 %10586, %v181_v16   ;;  %p10652_p5 = scmp.ne.s32.totalorder %s8553_s29, %s10651_s30  ;;  %p10657_p7 = scmp.lt.s32.totalorder %s10651_s30, %s10651_s30 }
  0x1b   :  { %9512 = vmatpush3.msra.mxu0 %v34_v11  ;;  %9521 = vmatpush3.msk.msra.mxu1 %vm315_vm2, %v10736_v43 }
  0x1c   :  { %9513 = vmatprep.subr.mxu0 %v10678_v0  ;;  %9522 = vmatprep.subr.mxu1 %v10740_v44  ;;  %p10658_p8 = por %p10657_p7, %p10656_p6 }
  0x1d   :  { %9514 = vmatpush3.msra.mxu0 %v33_v15  ;;  %208 = vperm.xlu0 %10585, %v204_v19  }
  0x1e   :  { %9515 = vmatprep.subr.mxu0 %v10678_v0  ;;  %213 = vperm.xlu1 %10586, %v205_v20   ;;  %p10659_p9 = pnand %p10658_p8, %p10652_p5 }
  0x1f   :  { %9516 = vmatpush3.msra.mxu0 %v32_v17  ;;  %9523 = vmatpush3.msra.mxu1 %v10740_v44 }
  0x20   :  { %9518 = vmatmul.mubr.msk.f32.vlgmr.msra.gmra.mxu0 %vm40_vm1, %v31_v18  ;;  %9524 = vmatprep.subr.mxu1 %v10749_v49 }
  0x21   :  { %232 = vperm.xlu0 %10585, %v228_v21   ;;  %9525 = vmatpush3.msra.mxu1 %v10749_v49 }
  0x22   :  { %237 = vperm.xlu1 %10586, %v229_v22   ;;  %9526 = vmatprep.subr.mxu1 %v10757_v52 }
  0x23   :  { %9527 = vmatpush3.msra.mxu1 %v10757_v52 }
  0x24   :  { %9528 = vmatprep.subr.mxu1 %v10762_v53 }
  0x25   :  { %256 = vperm.xlu0 %10585, %v252_v23   ;;  %9529 = vmatpush3.msra.mxu1 %v10762_v53 }
  0x26   :  { %261 = vperm.xlu1 %10586, %v253_v24   ;;  %9530 = vmatprep.subr.mxu1 %v10769_v58 }
  0x27   :  { %9531 = vmatpush3.msra.mxu1 %v10769_v58 }
  0x28   :  { %9532 = vmatprep.subr.mxu1 %v10777_v61 }
  0x29   :  { %280 = vperm.xlu0 %10585, %v276_v25   ;;  %9533 = vmatpush3.msra.mxu1 %v10777_v61 }
  0x2a   :  { %285 = vperm.xlu1 %10586, %v277_v26   ;;  %9537 = vmatprep.subr.msk.mxu1 %vm315_vm2, %v10736_v43 }
  0x2d   :  { %118 = vperm.xlu0 %10585, %v114_v27  }
  0x2e   :  { %123 = vperm.xlu1 %10586, %v115_v28  }
  0x8c   :  { %v137_v29 = vpop.permute.xlu0 %136 }
  0x8d   :  { %v161_v31 = vpop.permute.xlu1 %160 }
  0x90   :  { %v142_v33 = vpop.permute.xlu0 %141 }
  0x91   :  { %v166_v34 = vpop.permute.xlu1 %165 }
  0x94   :  { %v185_v37 = vpop.permute.xlu0 %184 }
  0x95   :  { %v190_v39 = vpop.permute.xlu1 %189 }
  0x98   :  { %v209_v47 = vpop.permute.xlu0 %208 }
  0x99   :  { %v214_v48 = vpop.permute.xlu1 %213 }
  0x9c   :  { %v233_v54 = vpop.permute.xlu0 %232 }
  0x9d   :  { %v238_v55 = vpop.permute.xlu1 %237 }
  0xa0   :  { %v257_v62 = vpop.permute.xlu0 %256 }
  0xa1   :  { %v262_v63 = vpop.permute.xlu1 %261 }
  0xa4   :  { %v281_v3 = vpop.permute.xlu0 %280 }
  0xa5   :  { %v286_v4 = vpop.permute.xlu1 %285 }
  0xa8   :  { %v119_v7 = vpop.permute.xlu0 %118 }
  0xa9   :  { %v124_v8 = vpop.permute.xlu1 %123 }
  0xe0   :  { %v110_v36 = vpop.f32.mrf.mxu0 }
  0xe1   :  { %v10732_v38 = vrot.slane %v110_v36, %v128_v35 }
  0xe2   :  { %v9519_v40 = vpop.f32.mrf.mxu0 }
  0xe3   :  { %v145_v41 = vmul.f32 %v142_v33, %v10732_v38  ;;  %v144_v42 = vmul.f32 %v137_v29, %v10732_v38  ;;  %v169_v45 = vmul.f32 %v166_v34, %v10732_v38  ;;  %v168_v46 = vmul.f32 %v161_v31, %v10732_v38 }
  0xe4   :  { %v193_v50 = vmul.f32 %v190_v39, %v10732_v38  ;;  %v192_v51 = vmul.f32 %v185_v37, %v10732_v38  ;;  %v217_v56 = vmul.f32 %v214_v48, %v10732_v38  ;;  %v216_v57 = vmul.f32 %v209_v47, %v10732_v38 }
  0xe5   :  { %150 = vrot.lane.b32.xlu1 %v145_v41, %s10681_s0  ;;  %148 = vrot.lane.b32.xlu0 %v144_v42, %s10681_s0  ;;  %v241_v59 = vmul.f32 %v238_v55, %v10732_v38  ;;  %v240_v60 = vmul.f32 %v233_v54, %v10732_v38  ;;  %v265_v1 = vmul.f32 %v262_v63, %v10732_v38  ;;  %v307_v41 = vld [vmem:[#allocation2 + $0xf8] sm:$0x3]  ;;  %v765_v42 = vld [vmem:[#allocation2 + $0x1c8] sm:$0x3f]  ;;  %v674_v63 = vld [vmem:[#allocation2 + $0x190] sm:$0x3f] }
  0xe6   :  { %v264_v2 = vmul.f32 %v257_v62, %v10732_v38  ;;  %v289_v5 = vmul.f32 %v286_v4, %v10732_v38  ;;  %v288_v6 = vmul.f32 %v281_v3, %v10732_v38  ;;  %v131_v15 = vmul.f32 %v10732_v38, %v124_v8  ;;  %9554 = vmatprep.subr.msk.mxu0 %vm502_vm4, %v307_v41  ;;  %v673_v3 = vld [vmem:[#allocation2 + $0x188] sm:$0xff]  ;;  %v764_v4 = vld [vmem:[#allocation2 + $0x1c0] sm:$0xff]  ;;  %v762_v8 = vld [vmem:[#allocation2 + $0x1b0] sm:$0xff] }
  0xe7   :  { %v130_v16 = vmul.f32 %v10732_v38, %v119_v7  ;;  %9555 = vmatpush3.msk.msra.mxu0 %vm502_vm4, %v307_v41  ;;  %v671_v7 = vld [vmem:[#allocation2 + $0x178] sm:$0xff] }
  0xe8   :  { %9559 = vmatprep.subr.msk.mxu0 %vm502_vm4, %v307_v41 }
  0xe9   :  { %174 = vrot.lane.b32.xlu1 %v169_v45, %s10682_s1  ;;  %172 = vrot.lane.b32.xlu0 %v168_v46, %s10682_s1 }
  0xed   :  { %198 = vrot.lane.b32.xlu1 %v193_v50, %s10683_s22  ;;  %196 = vrot.lane.b32.xlu0 %v192_v51, %s10683_s22 }
  0xf1   :  { %222 = vrot.lane.b32.xlu1 %v217_v56, %s10684_s23  ;;  %220 = vrot.lane.b32.xlu0 %v216_v57, %s10684_s23 }
  0xf5   :  { %246 = vrot.lane.b32.xlu1 %v241_v59, %s10685_s24  ;;  %244 = vrot.lane.b32.xlu0 %v240_v60, %s10685_s24 }
  0xf9   :  { %270 = vrot.lane.b32.xlu1 %v265_v1, %s10686_s25  ;;  %268 = vrot.lane.b32.xlu0 %v264_v2, %s10686_s25 }
  0xfd   :  { %294 = vrot.lane.b32.xlu1 %v289_v5, %s10687_s26  ;;  %292 = vrot.lane.b32.xlu0 %v288_v6, %s10687_s26  ;;  %v672_v5 = vld [vmem:[#allocation2 + $0x180] sm:$0xff]  ;;  %v763_v6 = vld [vmem:[#allocation2 + $0x1b8] sm:$0xff] }
 0x157   :  { %v151_v9 = vpop.permute.xlu1 %150  ;;  %v149_v10 = vpop.permute.xlu0 %148 }
 0x158   :  { %v155_v19 = vadd.f32 %v151_v9, %v131_v15  ;;  %v154_v20 = vadd.f32 %v149_v10, %v130_v16  ;;  %v670_v9 = vld [vmem:[#allocation2 + $0x170] sm:$0xff]  ;;  %v761_v10 = vld [vmem:[#allocation2 + $0x1a8] sm:$0xff] }
 0x15b   :  { %v175_v11 = vpop.permute.xlu1 %174  ;;  %v173_v12 = vpop.permute.xlu0 %172 }
 0x15c   :  { %v179_v21 = vadd.f32 %v175_v11, %v155_v19  ;;  %v178_v22 = vadd.f32 %v173_v12, %v154_v20  ;;  %v669_v11 = vld [vmem:[#allocation2 + $0x168] sm:$0xff]  ;;  %v760_v12 = vld [vmem:[#allocation2 + $0x1a0] sm:$0xff] }
 0x15f   :  { %v199_v13 = vpop.permute.xlu1 %198  ;;  %v197_v14 = vpop.permute.xlu0 %196 }
 0x160   :  { %v203_v25 = vadd.f32 %v199_v13, %v179_v21  ;;  %v202_v26 = vadd.f32 %v197_v14, %v178_v22  ;;  %v668_v13 = vld [vmem:[#allocation2 + $0x160] sm:$0xff]  ;;  %v759_v14 = vld [vmem:[#allocation2 + $0x198] sm:$0xff] }
 0x163   :  { %v223_v17 = vpop.permute.xlu1 %222  ;;  %v221_v18 = vpop.permute.xlu0 %220 }
 0x164   :  { %v227_v27 = vadd.f32 %v223_v17, %v203_v25  ;;  %v226_v28 = vadd.f32 %v221_v18, %v202_v26  ;;  %v848_v25 = vld [vmem:[#allocation2 + $0x120] sm:$0xff] }
 0x167   :  { %v247_v23 = vpop.permute.xlu1 %246  ;;  %v245_v24 = vpop.permute.xlu0 %244 }
 0x168   :  { %v251_v31 = vadd.f32 %v247_v23, %v227_v27  ;;  %v250_v32 = vadd.f32 %v245_v24, %v226_v28 }
 0x16b   :  { %v271_v29 = vpop.permute.xlu1 %270  ;;  %v269_v30 = vpop.permute.xlu0 %268 }
 0x16c   :  { %v275_v33 = vadd.f32 %v271_v29, %v251_v31  ;;  %v274_v34 = vadd.f32 %v269_v30, %v250_v32  ;;  %v849_v30 = vld [vmem:[#allocation2 + $0x128] sm:$0xff]  ;;  %v850_v31 = vld [vmem:[#allocation2 + $0x130] sm:$0xff]  ;;  %v851_v32 = vld [vmem:[#allocation2 + $0x138] sm:$0xff] }
 0x16f   :  { %v295_v35 = vpop.permute.xlu1 %294  ;;  %v293_v36 = vpop.permute.xlu0 %292 }
 0x170   :  { %v10796_v37 = vadd.f32 %v295_v35, %v275_v33  ;;  %v10798_v38 = vadd.f32 %v293_v36, %v274_v34  ;;  %v844_v33 = vld [vmem:[#allocation2 + $0x100] sm:$0xff]  ;;  %v845_v34 = vld [vmem:[#allocation2 + $0x108] sm:$0xff]  ;;  %v846_v35 = vld [vmem:[#allocation2 + $0x110] sm:$0xff] }
 0x171   :  { %v847_v36 = vld [vmem:[#allocation2 + $0x118] sm:$0xff] }
 0x172   :  { %v394_v39 = vmul.f32 %v10798_v38, %v10798_v38  ;;  %9534 = vmatprep.mubr.msk.f32.mxu1 %vm308_vm3, %v10798_v38  ;;  %v395_v40 = vmul.f32 %v10796_v37, %v10796_v37 }
 0x173   :  { %9535 = vmatmul.mubr.msk.f32.vlgmr.msra.gmra.mxu1 %vm308_vm3, %v10796_v37 }
 0x174   :  { %9538 = vmatpush3.msk.msra.mxu1 %vm315_vm2, %v10736_v43  ;;  %9551 = vmatprep.mubr.msk.f32.mxu1 %vm308_vm3, %v394_v39 }
 0x175   :  { %9539 = vmatprep.subr.mxu1 %v10740_v44 }
 0x176   :  { %9540 = vmatpush3.msra.mxu1 %v10740_v44 }
 0x177   :  { %9541 = vmatprep.subr.mxu1 %v10749_v49 }
 0x178   :  { %9542 = vmatpush3.msra.mxu1 %v10749_v49 }
 0x179   :  { %9543 = vmatprep.subr.mxu1 %v10757_v52 }
 0x17a   :  { %9544 = vmatpush3.msra.mxu1 %v10757_v52 }
 0x17b   :  { %9545 = vmatprep.subr.mxu1 %v10762_v53 }
 0x17c   :  { %9546 = vmatpush3.msra.mxu1 %v10762_v53 }
 0x17d   :  { %9547 = vmatprep.subr.mxu1 %v10769_v58 }
 0x17e   :  { %9548 = vmatpush3.msra.mxu1 %v10769_v58 }
 0x17f   :  { %9549 = vmatprep.subr.mxu1 %v10777_v61 }
 0x180   :  { %9550 = vmatpush3.msra.mxu1 %v10777_v61 }
 0x181   :  { %9552 = vmatmul.mubr.msk.f32.vlgmr.msra.gmra.mxu1 %vm308_vm3, %v395_v40  ;;  %9581 = vmatprep.subr.msk.mxu1 %vm315_vm2, %v765_v42 }
 0x182   :  { %9582 = vmatpush3.msk.msra.mxu1 %vm315_vm2, %v765_v42  ;;  %v1049_v42 = vld [vmem:[#allocation2 + $0x150] sm:$0xff] }
 0x183   :  { %9583 = vmatprep.subr.mxu1 %v764_v4 }
 0x184   :  { %9584 = vmatpush3.msra.mxu1 %v764_v4 }
 0x185   :  { %9585 = vmatprep.subr.mxu1 %v763_v6 }
 0x186   :  { %9586 = vmatpush3.msra.mxu1 %v763_v6 }
 0x187   :  { %9587 = vmatprep.subr.mxu1 %v762_v8 }
 0x188   :  { %9588 = vmatpush3.msra.mxu1 %v762_v8  ;;  %v1164_v8 = vld [vmem:[#allocation2 + $0x1f0] sm:$0x3] }
 0x189   :  { %9589 = vmatprep.subr.mxu1 %v761_v10 }
 0x18a   :  { %9590 = vmatpush3.msra.mxu1 %v761_v10 }
 0x18b   :  { %9591 = vmatprep.subr.mxu1 %v760_v12 }
 0x18c   :  { %9592 = vmatpush3.msra.mxu1 %v760_v12 }
 0x18d   :  { %9593 = vmatprep.subr.mxu1 %v759_v14 }
 0x18e   :  { %9594 = vmatpush3.msra.mxu1 %v759_v14 }
 0x233   :  { %v9536_v43 = vpop.f32.mrf.mxu1 }
 0x234   :  { %v478_v45 = vmul.f32 0.037037037, %v9536_v43  ;;  %v1050_v43 = vld [vmem:[#allocation2 + $0x158] sm:$0xff] }
 0x235   :  { %v385_v44 = vpop.f32.mrf.mxu1 }
 0x236   :  { %v477_v46 = vmul.f32 0.037037037, %v385_v44  ;;  %v482_v48 = vmul.f32 %v478_v45, %v478_v45  ;;  %v492_v1 = vsub.f32 0.0, %v478_v45  ;;  %v1162_v44 = vld [vmem:[#allocation2 + $0x1e0] sm:$0xff]  ;;  %v1161_v45 = vld [vmem:[#allocation2 + $0x1d8] sm:$0xff] }
 0x238   :  { %v481_v51 = vmul.f32 %v477_v46, %v477_v46  ;;  %v491_v59 = vsub.f32 0.0, %v477_v46  ;;  %v1160_v46 = vld [vmem:[#allocation2 + $0x1d0] sm:$0xff] }
 0x241   :  { %v9553_v47 = vpop.f32.mrf.mxu1 }
 0x242   :  { %v480_v49 = vmul.f32 0.037037037, %v9553_v47 }
 0x243   :  { %v468_v50 = vpop.f32.mrf.mxu1 }
 0x244   :  { %v484_v52 = vsub.f32 %v480_v49, %v482_v48  ;;  %v479_v53 = vmul.f32 0.037037037, %v468_v50 }
 0x246   :  { %v486_v54 = vmax.f32 %v484_v52, 0.0  ;;  %v483_v55 = vsub.f32 %v479_v53, %v481_v51 }
 0x248   :  { %v485_v56 = vmax.f32 %v483_v55, 0.0  ;;  %v488_v57 = vadd.f32 1e-05, %v486_v54 }
 0x24a   :  { %v487_v58 = vadd.f32 1e-05, %v485_v56 }
 0x24c   :  { %10587 = vrsqrt.f32 %v487_v58 }
 0x24d   :  { %10589 = vrsqrt.f32 %v488_v57 }
 0x259   :  { %v10588_v60 = vpop.eup %10587 }
 0x25a   :  { %v10590_v61 = vpop.eup %10589  ;;  %9556 = vmatprep.mubr.msk.f32.mxu0 %vm495_vm5, %v10588_v60  ;;  %v493_v62 = vmul.f32 %v10588_v60, %v491_v59 }
 0x25b   :  { %9557 = vmatmul.mubr.msk.f32.vlgmr.msra.gmra.mxu0 %vm495_vm5, %v10590_v61  ;;  %v494_v2 = vmul.f32 %v10590_v61, %v492_v1 }
 0x25c   :  { %9561 = vmatprep.mubr.msk.f32.mxu0 %vm495_vm5, %v493_v62  ;;  %9560 = vmatpush3.msk.msra.mxu0 %vm502_vm4, %v307_v41  ;;  %v1048_v41 = vld [vmem:[#allocation2 + $0x148] sm:$0xff] }
 0x25d   :  { %9564 = vmatprep.subr.msk.mxu0 %vm315_vm2, %v674_v63 }
 0x25f   :  { %9562 = vmatmul.mubr.msk.f32.vlgmr.msra.gmra.mxu0 %vm495_vm5, %v494_v2 }
 0x260   :  { %9565 = vmatpush3.msk.msra.mxu0 %vm315_vm2, %v674_v63 }
 0x261   :  { %9566 = vmatprep.subr.mxu0 %v673_v3 }
 0x262   :  { %9567 = vmatpush3.msra.mxu0 %v673_v3 }
 0x263   :  { %9568 = vmatprep.subr.mxu0 %v672_v5 }
 0x264   :  { %9569 = vmatpush3.msra.mxu0 %v672_v5 }
 0x265   :  { %9570 = vmatprep.subr.mxu0 %v671_v7 }
 0x266   :  { %9571 = vmatpush3.msra.mxu0 %v671_v7 }
 0x267   :  { %9572 = vmatprep.subr.mxu0 %v670_v9 }
 0x268   :  { %9573 = vmatpush3.msra.mxu0 %v670_v9 }
 0x269   :  { %9574 = vmatprep.subr.mxu0 %v669_v11 }
 0x26a   :  { %9575 = vmatpush3.msra.mxu0 %v669_v11 }
 0x26b   :  { %9576 = vmatprep.subr.mxu0 %v668_v13 }
 0x26c   :  { %9577 = vmatpush3.msra.mxu0 %v668_v13 }
 0x31b   :  { %v9558_v15 = vpop.f32.mrf.mxu0 }
 0x31c   :  { %v663_v17 = vmul.f32 %v9558_v15, %v10796_v37  ;;  %v1047_v37 = vld [vmem:[#allocation2 + $0x140] sm:$0xff] }
 0x31d   :  { %v572_v16 = vpop.f32.mrf.mxu0 }
 0x31e   :  { %v662_v19 = vmul.f32 %v572_v16, %v10798_v38  ;;  %v1163_v38 = vld [vmem:[#allocation2 + $0x1e8] sm:$0xf] }
 0x31f   :  { %v9563_v18 = vpop.f32.mrf.mxu0  ;;  %9628 = vmatprep.subr.msk.mxu1 %vm1178_vm7, %v1163_v38 }
 0x320   :  { %v665_v20 = vadd.f32 %v9563_v18, %v663_v17 }
 0x321   :  { %v653_v21 = vpop.f32.mrf.mxu0 }
 0x322   :  { %v664_v22 = vadd.f32 %v662_v19, %v653_v21  ;;  %v667_v24 = vmax.f32 %v665_v20, 0.0 }
 0x324   :  { %v666_v23 = vmax.f32 %v664_v22, 0.0 }
 0x326   :  { %9578 = vmatprep.mubr.msk.f32.mxu0 %vm308_vm3, %v666_v23  ;;  %9595 = vmatprep.mubr.msk.f32.mxu1 %vm308_vm3, %v666_v23 }
 0x327   :  { %9579 = vmatmul.mubr.msk.f32.vlgmr.msra.gmra.mxu0 %vm308_vm3, %v667_v24  ;;  %9596 = vmatmul.mubr.msk.f32.vlgmr.msra.gmra.mxu1 %vm308_vm3, %v667_v24 }
 0x328   :  { %9602 = vmatprep.mubr.msk.f32.mxu0 %vm852_vm6, %v848_v25  ;;  %9629 = vmatpush3.msk.msra.mxu1 %vm1178_vm7, %v1163_v38 }
 0x329   :  { %9630 = vmatprep.subr.mxu1 %v1162_v44 }
 0x32a   :  { %9631 = vmatpush3.msra.mxu1 %v1162_v44 }
 0x32b   :  { %9632 = vmatprep.subr.mxu1 %v1161_v45 }
 0x32c   :  { %9633 = vmatpush3.msra.mxu1 %v1161_v45 }
 0x32d   :  { %9634 = vmatprep.subr.mxu1 %v1160_v46 }
 0x32e   :  { %9635 = vmatpush3.msra.mxu1 %v1160_v46 }
 0x32f   :  { %9656 = vmatprep.subr.msk.mxu1 %vm502_vm4, %v1164_v8 }
 0x3e7   :  { %v9580_v26 = vpop.f32.mrf.mxu0  ;;  %v9597_v27 = vpop.f32.mrf.mxu1 }
 0x3e8   :  { %9598 = vmatprep.subr.mxu0 %v9597_v27  ;;  %1055 = vrot.lane.b32.xlu0 %v9580_v26, %s10681_s0 }
 0x3e9   :  { %v750_v28 = vpop.f32.mrf.mxu0  ;;  %v835_v29 = vpop.f32.mrf.mxu1  ;;  %9599 = vmatpush3.msra.mxu0 %v9597_v27 }
 0x3ea   :  { %9600 = vmatprep.subr.mxu0 %v835_v29  ;;  %1053 = vrot.lane.b32.xlu1 %v750_v28, %s10681_s0 }
 0x3eb   :  { %9601 = vmatpush3.msra.mxu0 %v835_v29 }
 0x3ec   :  { %9608 = vmatprep.subr.mxu0 %v9580_v26  ;;  %9603 = vmatmul.mubr.msk.f32.vlgmr.msra.gmra.mxu0 %vm852_vm6, %v849_v30 }
 0x3ed   :  { %9609 = vmatpush3.msra.mxu0 %v9580_v26  ;;  %9605 = vmatprep.mubr.msk.f32.mxu0 %vm852_vm6, %v850_v31 }
 0x3ee   :  { %9610 = vmatprep.subr.mxu0 %v750_v28 }
 0x3ef   :  { %9611 = vmatpush3.msra.mxu0 %v750_v28 }
 0x3f0   :  { %9606 = vmatmul.mubr.msk.f32.gmra.mxu0 %vm852_vm6, %v851_v32 }
 0x3f1   :  { %9612 = vmatprep.mubr.msk.f32.mxu0 %vm852_vm6, %v844_v33 }
 0x3f4   :  { %9613 = vmatmul.mubr.msk.f32.vlgmr.msra.gmra.mxu0 %vm852_vm6, %v845_v34 }
 0x3f5   :  { %9615 = vmatprep.mubr.msk.f32.mxu0 %vm852_vm6, %v846_v35 }
 0x3f8   :  { %9616 = vmatmul.mubr.msk.f32.gmra.mxu0 %vm852_vm6, %v847_v36 }
 0x3f9   :  { %9622 = vmatprep.mubr.msk.f32.mxu0 %vm852_vm6, %v1047_v37 }
 0x45a   :  { %v1056_v39 = vpop.permute.xlu0 %1055 }
 0x45b   :  { %9618 = vmatprep.subr.mxu0 %v1056_v39 }
 0x45c   :  { %v1054_v40 = vpop.permute.xlu1 %1053  ;;  %9619 = vmatpush3.msra.mxu0 %v1056_v39 }
 0x45d   :  { %9620 = vmatprep.subr.mxu0 %v1054_v40 }
 0x45e   :  { %9621 = vmatpush3.msra.mxu0 %v1054_v40 }
 0x45f   :  { %9623 = vmatmul.mubr.msk.f32.vlgmr.msra.gmra.mxu0 %vm852_vm6, %v1048_v41  ;;  %9642 = vmatprep.subr.msk.mxu0 %vm1178_vm7, %v1163_v38 }
 0x460   :  { %9625 = vmatprep.mubr.msk.f32.mxu0 %vm852_vm6, %v1049_v42  ;;  %9643 = vmatpush3.msk.msra.mxu0 %vm1178_vm7, %v1163_v38 }
 0x461   :  { %9644 = vmatprep.subr.mxu0 %v1162_v44 }
 0x462   :  { %9645 = vmatpush3.msra.mxu0 %v1162_v44 }
 0x463   :  { %9626 = vmatmul.mubr.msk.f32.gmra.mxu0 %vm852_vm6, %v1050_v43  ;;  %9646 = vmatprep.subr.mxu0 %v1161_v45 }
 0x464   :  { %9647 = vmatpush3.msra.mxu0 %v1161_v45 }
 0x465   :  { %9648 = vmatprep.subr.mxu0 %v1160_v46 }
 0x466   :  { %9649 = vmatpush3.msra.mxu0 %v1160_v46 }
 0x467   :  { %9664 = vmatprep.subr.msk.mxu0 %vm502_vm4, %v1164_v8 }
 0x4ac   :  { %v9604_v47 = vpop.f32.mrf.mxu0 }
 0x4ae   :  { %v931_v48 = vpop.f32.mrf.mxu0 }
 0x4b0   :  { %v9607_v49 = vpop.f32.mrf.mxu0 }
 0x4b2   :  { %v941_v50 = vpop.f32.mrf.mxu0 }
 0x4b4   :  { %v9614_v51 = vpop.f32.mrf.mxu0 }
 0x4b5   :  { %v1034_v55 = vadd.f32 %v9614_v51, %v9604_v47 }
 0x4b6   :  { %v1028_v52 = vpop.f32.mrf.mxu0 }
 0x4b7   :  { %v1029_v57 = vadd.f32 %v1028_v52, %v931_v48 }
 0x4b8   :  { %v9617_v53 = vpop.f32.mrf.mxu0 }
 0x4b9   :  { %v1044_v61 = vadd.f32 %v9617_v53, %v9607_v49  ;;  %v1616_v53 = vld [vmem:[#allocation2 + $0x2d0] sm:$0xf] }
 0x4ba   :  { %v1038_v54 = vpop.f32.mrf.mxu0 }
 0x4bb   :  { %v1039_v63 = vadd.f32 %v1038_v54, %v941_v50  ;;  %v1720_v54 = vld [vmem:[#allocation2 + $0x2f0] sm:$0xf] }
 0x51f   :  { %v9624_v56 = vpop.f32.mrf.mxu0 }
 0x520   :  { %v10860_v58 = vadd.f32 %v9624_v56, %v1034_v55  ;;  %v1615_v55 = vld [vmem:[#allocation2 + $0x2c8] sm:$0xff] }
 0x521   :  { %v1137_v59 = vpop.f32.mrf.mxu0  ;;  %v1719_v56 = vld [vmem:[#allocation2 + $0x2e8] sm:$0xff] }
 0x522   :  { %v10862_v60 = vadd.f32 %v1137_v59, %v1029_v57  ;;  %v1268_v2 = vmul.f32 %v10860_v58, %v10860_v58  ;;  %v1614_v57 = vld [vmem:[#allocation2 + $0x2c0] sm:$0xff] }
 0x523   :  { %v9627_v62 = vpop.f32.mrf.mxu0  ;;  %v1718_v59 = vld [vmem:[#allocation2 + $0x2e0] sm:$0xff] }
 0x524   :  { %v1267_v1 = vmul.f32 %v10862_v60, %v10862_v60  ;;  %9636 = vmatprep.mubr.msk.f32.mxu1 %vm1165_vm8, %v10862_v60  ;;  %v10870_v3 = vadd.f32 %v9627_v62, %v1044_v61  ;;  %v1613_v61 = vld [vmem:[#allocation2 + $0x2b8] sm:$0xff] }
 0x525   :  { %v1147_v4 = vpop.f32.mrf.mxu0  ;;  %9637 = vmatmul.mubr.msk.f32.vlgmr.msra.gmra.mxu1 %vm1165_vm8, %v10860_v58  ;;  %v1717_v62 = vld [vmem:[#allocation2 + $0x2d8] sm:$0xff] }
 0x526   :  { %v10874_v5 = vadd.f32 %v1147_v4, %v1039_v63  ;;  %9650 = vmatprep.mubr.msk.f32.mxu0 %vm1165_vm8, %v1267_v1  ;;  %v1270_v7 = vmul.f32 %v10870_v3, %v10870_v3  ;;  %9657 = vmatpush3.msk.msra.mxu1 %vm502_vm4, %v1164_v8 }
 0x527   :  { %9651 = vmatmul.mubr.msk.f32.vlgmr.msra.gmra.mxu0 %vm1165_vm8, %v1268_v2  ;;  %9672 = vmatprep.subr.msk.mxu1 %vm1178_vm7, %v1616_v53 }
 0x528   :  { %v1269_v6 = vmul.f32 %v10874_v5, %v10874_v5  ;;  %9639 = vmatprep.mubr.msk.f32.mxu1 %vm1165_vm8, %v10874_v5  ;;  %9665 = vmatpush3.msk.msra.mxu0 %vm502_vm4, %v1164_v8 }
 0x529   :  { %9640 = vmatmul.mubr.msk.f32.gmra.mxu1 %vm1165_vm8, %v10870_v3  ;;  %9686 = vmatprep.subr.msk.mxu0 %vm1178_vm7, %v1720_v54 }
 0x52a   :  { %9653 = vmatprep.mubr.msk.f32.mxu0 %vm1165_vm8, %v1269_v6 }
 0x52b   :  { %9654 = vmatmul.mubr.msk.f32.gmra.mxu0 %vm1165_vm8, %v1270_v7 }
 0x5e5   :  { %v9638_v9 = vpop.f32.mrf.mxu1 }
 0x5e6   :  { %v1369_v10 = vmul.f32 0.071428575, %v9638_v9 }
 0x5e7   :  { %v1248_v11 = vpop.f32.mrf.mxu1  ;;  %v9652_v12 = vpop.f32.mrf.mxu0 }
 0x5e8   :  { %v1377_v13 = vmul.f32 %v1369_v10, %v1369_v10  ;;  %v1368_v14 = vmul.f32 0.071428575, %v1248_v11  ;;  %v1373_v15 = vmul.f32 0.071428575, %v9652_v12  ;;  %v1397_v44 = vsub.f32 0.0, %v1369_v10 }
 0x5e9   :  { %v9641_v16 = vpop.f32.mrf.mxu1  ;;  %v1349_v17 = vpop.f32.mrf.mxu0 }
 0x5ea   :  { %v1376_v18 = vmul.f32 %v1368_v14, %v1368_v14  ;;  %v1381_v19 = vsub.f32 %v1373_v15, %v1377_v13  ;;  %v1371_v20 = vmul.f32 0.071428575, %v9641_v16  ;;  %v1372_v21 = vmul.f32 0.071428575, %v1349_v17 }
 0x5eb   :  { %v1258_v22 = vpop.f32.mrf.mxu1  ;;  %v9655_v23 = vpop.f32.mrf.mxu0  ;;  %v1396_v42 = vsub.f32 0.0, %v1368_v14 }
 0x5ec   :  { %v1385_v24 = vmax.f32 %v1381_v19, 0.0  ;;  %v1379_v25 = vmul.f32 %v1371_v20, %v1371_v20  ;;  %v1370_v26 = vmul.f32 0.071428575, %v1258_v22  ;;  %v1380_v27 = vsub.f32 %v1372_v21, %v1376_v18 }
 0x5ed   :  { %v1375_v28 = vmul.f32 0.071428575, %v9655_v23  ;;  %v1359_v29 = vpop.f32.mrf.mxu0  ;;  %v1399_v50 = vsub.f32 0.0, %v1371_v20 }
 0x5ee   :  { %v1389_v30 = vadd.f32 1e-05, %v1385_v24  ;;  %v1378_v31 = vmul.f32 %v1370_v26, %v1370_v26  ;;  %v1374_v32 = vmul.f32 0.071428575, %v1359_v29  ;;  %v1384_v33 = vmax.f32 %v1380_v27, 0.0  ;;  %v1810_v29 = vld [vmem:[#allocation2 + $0x200] sm:$0xff] }
 0x5ef   :  { %v1383_v34 = vsub.f32 %v1375_v28, %v1379_v25  ;;  %v1398_v47 = vsub.f32 0.0, %v1370_v26  ;;  %v1818_v28 = vld [vmem:[#allocation2 + $0x240] sm:$0xff] }
 0x5f0   :  { %v1382_v35 = vsub.f32 %v1374_v32, %v1378_v31  ;;  %v1388_v36 = vadd.f32 1e-05, %v1384_v33  ;;  %10591 = vrsqrt.f32 %v1389_v30  ;;  %v1819_v30 = vld [vmem:[#allocation2 + $0x248] sm:$0xff]  ;;  %v1820_v32 = vld [vmem:[#allocation2 + $0x250] sm:$0xff] }
 0x5f1   :  { %v1387_v37 = vmax.f32 %v1383_v34, 0.0  ;;  %v1811_v31 = vld [vmem:[#allocation2 + $0x208] sm:$0xff]  ;;  %v1812_v33 = vld [vmem:[#allocation2 + $0x210] sm:$0xff]  ;;  %v1821_v34 = vld [vmem:[#allocation2 + $0x258] sm:$0xff] }
 0x5f2   :  { %v1386_v38 = vmax.f32 %v1382_v35, 0.0  ;;  %10593 = vrsqrt.f32 %v1388_v36  ;;  %v1813_v35 = vld [vmem:[#allocation2 + $0x218] sm:$0xff]  ;;  %v1822_v36 = vld [vmem:[#allocation2 + $0x260] sm:$0xff] }
 0x5f3   :  { %v1391_v39 = vadd.f32 1e-05, %v1387_v37  ;;  %v1814_v37 = vld [vmem:[#allocation2 + $0x220] sm:$0xff] }
 0x5f4   :  { %v1390_v40 = vadd.f32 1e-05, %v1386_v38  ;;  %v1823_v38 = vld [vmem:[#allocation2 + $0x268] sm:$0xff] }
 0x5f5   :  { %10595 = vrsqrt.f32 %v1391_v39  ;;  %v1815_v39 = vld [vmem:[#allocation2 + $0x228] sm:$0xff] }
 0x5f6   :  { %10597 = vrsqrt.f32 %v1390_v40  ;;  %v1824_v40 = vld [vmem:[#allocation2 + $0x270] sm:$0xff] }
 0x5fd   :  { %v10592_v41 = vpop.eup %10591 }
 0x5fe   :  { %v1401_v48 = vmul.f32 %v10592_v41, %v1397_v44 }
 0x5ff   :  { %v10594_v43 = vpop.eup %10593 }
 0x600   :  { %9658 = vmatprep.mubr.msk.f32.mxu1 %vm495_vm5, %v10594_v43  ;;  %v1400_v45 = vmul.f32 %v10594_v43, %v1396_v42  ;;  %v2084_v42 = vld [vmem:[#allocation2 + $0x278] sm:$0xff]  ;;  %v2246_v43 = vld [vmem:[#allocation2 + $0x300] sm:$0x3f] }
 0x601   :  { %9659 = vmatmul.mubr.msk.f32.vlgmr.msra.gmra.mxu1 %vm495_vm5, %v10592_v41  ;;  %v1816_v41 = vld [vmem:[#allocation2 + $0x230] sm:$0xff] }
 0x602   :  { %v10596_v46 = vpop.eup %10595  ;;  %9666 = vmatprep.mubr.msk.f32.mxu0 %vm495_vm5, %v1400_v45  ;;  %9673 = vmatpush3.msk.msra.mxu1 %vm1178_vm7, %v1616_v53  ;;  %v2090_v53 = vld [vmem:[#allocation2 + $0x2a8] sm:$0xff] }
 0x603   :  { %v10598_v49 = vpop.eup %10597  ;;  %9667 = vmatmul.mubr.msk.f32.vlgmr.msra.gmra.mxu0 %vm495_vm5, %v1401_v48  ;;  %v1403_v52 = vmul.f32 %v10596_v46, %v1399_v50  ;;  %9674 = vmatprep.subr.mxu1 %v1615_v55  ;;  %v2085_v48 = vld [vmem:[#allocation2 + $0x280] sm:$0xff]  ;;  %v2087_v50 = vld [vmem:[#allocation2 + $0x290] sm:$0xff] }
 0x604   :  { %9661 = vmatprep.mubr.msk.f32.mxu1 %vm495_vm5, %v10598_v49  ;;  %v1402_v51 = vmul.f32 %v10598_v49, %v1398_v47  ;;  %9687 = vmatpush3.msk.msra.mxu0 %vm1178_vm7, %v1720_v54  ;;  %v2086_v49 = vld [vmem:[#allocation2 + $0x288] sm:$0xff]  ;;  %v2091_v54 = vld [vmem:[#allocation2 + $0x2b0] sm:$0xff] }
 0x605   :  { %9662 = vmatmul.mubr.msk.f32.gmra.mxu1 %vm495_vm5, %v10596_v46  ;;  %9688 = vmatprep.subr.mxu0 %v1719_v56 }
 0x606   :  { %9669 = vmatprep.mubr.msk.f32.mxu0 %vm495_vm5, %v1402_v51  ;;  %9675 = vmatpush3.msra.mxu1 %v1615_v55  ;;  %v2088_v51 = vld [vmem:[#allocation2 + $0x298] sm:$0xff] }
 0x607   :  { %9670 = vmatmul.mubr.msk.f32.gmra.mxu0 %vm495_vm5, %v1403_v52  ;;  %9676 = vmatprep.subr.mxu1 %v1614_v57  ;;  %v2089_v52 = vld [vmem:[#allocation2 + $0x2a0] sm:$0xff]  ;;  %v2245_v55 = vld [vmem:[#allocation2 + $0x2f8] sm:$0xff] }
 0x608   :  { %9689 = vmatpush3.msra.mxu0 %v1719_v56  ;;  %9677 = vmatpush3.msra.mxu1 %v1614_v57 }
 0x609   :  { %9690 = vmatprep.subr.mxu0 %v1718_v59  ;;  %9678 = vmatprep.subr.mxu1 %v1613_v61 }
 0x60a   :  { %9691 = vmatpush3.msra.mxu0 %v1718_v59  ;;  %9679 = vmatpush3.msra.mxu1 %v1613_v61 }
 0x60b   :  { %9692 = vmatprep.subr.mxu0 %v1717_v62 }
 0x60c   :  { %9693 = vmatpush3.msra.mxu0 %v1717_v62 }
 0x6c1   :  { %v9660_v63 = vpop.f32.mrf.mxu1 }
 0x6c2   :  { %v1602_v1 = vmul.f32 %v9660_v63, %v10860_v58 }
 0x6c3   :  { %v1485_v2 = vpop.f32.mrf.mxu1  ;;  %v9668_v4 = vpop.f32.mrf.mxu0 }
 0x6c4   :  { %v1601_v6 = vmul.f32 %v1485_v2, %v10862_v60  ;;  %v1606_v7 = vadd.f32 %v9668_v4, %v1602_v1 }
 0x6c5   :  { %v9663_v8 = vpop.f32.mrf.mxu1  ;;  %v1582_v9 = vpop.f32.mrf.mxu0 }
 0x6c6   :  { %v1604_v10 = vmul.f32 %v9663_v8, %v10870_v3  ;;  %v1605_v11 = vadd.f32 %v1601_v6, %v1582_v9  ;;  %v1610_v16 = vmax.f32 %v1606_v7, 0.0  ;;  %v1817_v3 = vld [vmem:[#allocation2 + $0x238] sm:$0xff] }
 0x6c7   :  { %v1495_v12 = vpop.f32.mrf.mxu1  ;;  %v9671_v13 = vpop.f32.mrf.mxu0 }
 0x6c8   :  { %v1609_v14 = vmax.f32 %v1605_v11, 0.0  ;;  %v1603_v15 = vmul.f32 %v1495_v12, %v10874_v5  ;;  %v1608_v17 = vadd.f32 %v9671_v13, %v1604_v10  ;;  %v1809_v5 = vld [vmem:[#allocation2 + $0x1f8] sm:$0xff] }
 0x6c9   :  { %v1592_v18 = vpop.f32.mrf.mxu0 }
 0x6ca   :  { %v1607_v19 = vadd.f32 %v1603_v15, %v1592_v18  ;;  %9680 = vmatprep.mubr.msk.f32.mxu1 %vm1165_vm8, %v1609_v14  ;;  %9694 = vmatprep.mubr.msk.f32.mxu0 %vm1165_vm8, %v1609_v14  ;;  %v1612_v60 = vmax.f32 %v1608_v17, 0.0 }
 0x6cb   :  { %9681 = vmatmul.mubr.msk.f32.vlgmr.msra.gmra.mxu1 %vm1165_vm8, %v1610_v16  ;;  %9695 = vmatmul.mubr.msk.f32.vlgmr.msra.gmra.mxu0 %vm1165_vm8, %v1610_v16 }
 0x6cc   :  { %v1611_v58 = vmax.f32 %v1607_v19, 0.0 }
 0x6ce   :  { %9683 = vmatprep.mubr.msk.f32.mxu1 %vm1165_vm8, %v1611_v58  ;;  %9697 = vmatprep.mubr.msk.f32.mxu0 %vm1165_vm8, %v1611_v58 }
 0x6cf   :  { %9684 = vmatmul.mubr.msk.f32.gmra.mxu1 %vm1165_vm8, %v1612_v60  ;;  %9698 = vmatmul.mubr.msk.f32.gmra.mxu0 %vm1165_vm8, %v1612_v60 }
 0x6d0   :  { %9708 = vmatprep.mubr.msk.f32.mxu1 %vm1825_vm9, %v1817_v3  ;;  %9728 = vmatprep.mubr.msk.f32.mxu0 %vm1825_vm9, %v1809_v5 }
 0x78b   :  { %v9682_v20 = vpop.f32.mrf.mxu1  ;;  %v9696_v21 = vpop.f32.mrf.mxu0 }
 0x78d   :  { %v1698_v22 = vpop.f32.mrf.mxu1  ;;  %v1790_v23 = vpop.f32.mrf.mxu0 }
 0x78f   :  { %v9685_v24 = vpop.f32.mrf.mxu1  ;;  %v9699_v25 = vpop.f32.mrf.mxu0 }
 0x790   :  { %9700 = vmatprep.subr.mxu1 %v9699_v25  ;;  %2102 = vrot.lane.b32.xlu0 %v9685_v24, %s10681_s0 }
 0x791   :  { %9720 = vmatprep.subr.mxu0 %v9685_v24  ;;  %v1708_v26 = vpop.f32.mrf.mxu1  ;;  %v1800_v27 = vpop.f32.mrf.mxu0  ;;  %9701 = vmatpush3.msra.mxu1 %v9699_v25 }
 0x792   :  { %9721 = vmatpush3.msra.mxu0 %v9685_v24  ;;  %9702 = vmatprep.subr.mxu1 %v1800_v27 }
 0x793   :  { %2100 = vrot.lane.b32.xlu1 %v1708_v26, %s10681_s0  ;;  %9722 = vmatprep.subr.mxu0 %v1708_v26 }
 0x794   :  { %9703 = vmatpush3.msra.mxu1 %v1800_v27  ;;  %9723 = vmatpush3.msra.mxu0 %v1708_v26 }
 0x795   :  { %9704 = vmatprep.subr.mxu1 %v9696_v21  ;;  %2098 = vrot.lane.b32.xlu0 %v9682_v20, %s10681_s0 }
 0x796   :  { %9724 = vmatprep.subr.mxu0 %v9682_v20  ;;  %9705 = vmatpush3.msra.mxu1 %v9696_v21 }
 0x797   :  { %9725 = vmatpush3.msra.mxu0 %v9682_v20  ;;  %9706 = vmatprep.subr.mxu1 %v1790_v23 }
 0x798   :  { %2096 = vrot.lane.b32.xlu1 %v1698_v22, %s10681_s0  ;;  %9726 = vmatprep.subr.mxu0 %v1698_v22 }
 0x799   :  { %9707 = vmatpush3.msra.mxu1 %v1790_v23  ;;  %9727 = vmatpush3.msra.mxu0 %v1698_v22 }
 0x79a   :  { %9709 = vmatmul.mubr.msk.f32.vlgmr.msra.gmra.mxu1 %vm1825_vm9, %v1818_v28  ;;  %9729 = vmatmul.mubr.msk.f32.vlgmr.msra.gmra.mxu0 %vm1825_vm9, %v1810_v29 }
 0x79b   :  { %9711 = vmatprep.mubr.msk.f32.mxu1 %vm1825_vm9, %v1819_v30  ;;  %9731 = vmatprep.mubr.msk.f32.mxu0 %vm1825_vm9, %v1811_v31 }
 0x79c   :  { %9760 = vmatprep.subr.msk.mxu0 %vm315_vm2, %v2246_v43 }
 0x79d   :  { %9761 = vmatpush3.msk.msra.mxu0 %vm315_vm2, %v2246_v43 }
 0x79e   :  { %9712 = vmatmul.mubr.msk.f32.gmra.mxu1 %vm1825_vm9, %v1820_v32  ;;  %9732 = vmatmul.mubr.msk.f32.gmra.mxu0 %vm1825_vm9, %v1812_v33 }
 0x79f   :  { %9714 = vmatprep.mubr.msk.f32.mxu1 %vm1825_vm9, %v1821_v34  ;;  %9734 = vmatprep.mubr.msk.f32.mxu0 %vm1825_vm9, %v1813_v35 }
 0x7a0   :  { %9762 = vmatprep.subr.mxu0 %v2245_v55 }
 0x7a1   :  { %9763 = vmatpush3.msra.mxu0 %v2245_v55 }
 0x7a2   :  { %9715 = vmatmul.mubr.msk.f32.gmra.mxu1 %vm1825_vm9, %v1822_v36  ;;  %9735 = vmatmul.mubr.msk.f32.gmra.mxu0 %vm1825_vm9, %v1814_v37 }
 0x7a3   :  { %9717 = vmatprep.mubr.msk.f32.mxu1 %vm1825_vm9, %v1823_v38  ;;  %9737 = vmatprep.mubr.msk.f32.mxu0 %vm1825_vm9, %v1815_v39 }
 0x7a6   :  { %9718 = vmatmul.mubr.msk.f32.gmra.mxu1 %vm1825_vm9, %v1824_v40  ;;  %9738 = vmatmul.mubr.msk.f32.gmra.mxu0 %vm1825_vm9, %v1816_v41  ;;  %v2247_v41 = vld [vmem:[#allocation2 + $0x308] sm:$0x3] }
 0x7a7   :  { %9748 = vmatprep.mubr.msk.f32.mxu1 %vm1825_vm9, %v2084_v42  ;;  %9792 = vmatprep.subr.msk.mxu0 %vm502_vm4, %v2247_v41 }
 0x802   :  { %v2103_v44 = vpop.permute.xlu0 %2102 }
 0x803   :  { %9740 = vmatprep.subr.mxu1 %v2103_v44 }
 0x804   :  { %9741 = vmatpush3.msra.mxu1 %v2103_v44 }
 0x805   :  { %v2101_v45 = vpop.permute.xlu1 %2100 }
 0x806   :  { %9742 = vmatprep.subr.mxu1 %v2101_v45 }
 0x807   :  { %v2099_v46 = vpop.permute.xlu0 %2098  ;;  %9743 = vmatpush3.msra.mxu1 %v2101_v45 }
 0x808   :  { %9744 = vmatprep.subr.mxu1 %v2099_v46 }
 0x809   :  { %9745 = vmatpush3.msra.mxu1 %v2099_v46 }
 0x80a   :  { %v2097_v47 = vpop.permute.xlu1 %2096 }
 0x80b   :  { %9746 = vmatprep.subr.mxu1 %v2097_v47 }
 0x80c   :  { %9747 = vmatpush3.msra.mxu1 %v2097_v47 }
 0x80d   :  { %9749 = vmatmul.mubr.msk.f32.vlgmr.msra.gmra.mxu1 %vm1825_vm9, %v2085_v48  ;;  %9776 = vmatprep.subr.msk.mxu1 %vm315_vm2, %v2246_v43 }
 0x80e   :  { %9751 = vmatprep.mubr.msk.f32.mxu1 %vm1825_vm9, %v2086_v49  ;;  %9777 = vmatpush3.msk.msra.mxu1 %vm315_vm2, %v2246_v43 }
 0x80f   :  { %9778 = vmatprep.subr.mxu1 %v2245_v55 }
 0x810   :  { %9779 = vmatpush3.msra.mxu1 %v2245_v55 }
 0x811   :  { %9752 = vmatmul.mubr.msk.f32.gmra.mxu1 %vm1825_vm9, %v2087_v50  ;;  %9806 = vmatprep.subr.msk.mxu1 %vm502_vm4, %v2247_v41 }
 0x812   :  { %9754 = vmatprep.mubr.msk.f32.mxu1 %vm1825_vm9, %v2088_v51 }
 0x815   :  { %9755 = vmatmul.mubr.msk.f32.gmra.mxu1 %vm1825_vm9, %v2089_v52 }
 0x816   :  { %9757 = vmatprep.mubr.msk.f32.mxu1 %vm1825_vm9, %v2090_v53 }
 0x819   :  { %9758 = vmatmul.mubr.msk.f32.gmra.mxu1 %vm1825_vm9, %v2091_v54 }
 0x85a   :  { %v9710_v56 = vpop.f32.mrf.mxu1  ;;  %v9730_v62 = vpop.f32.mrf.mxu0 }
 0x85b   :  { %v2051_v10 = vadd.f32 %v9730_v62, %v9710_v56 }
 0x85c   :  { %v1916_v57 = vpop.f32.mrf.mxu1  ;;  %v2045_v1 = vpop.f32.mrf.mxu0 }
 0x85d   :  { %v2046_v12 = vadd.f32 %v2045_v1, %v1916_v57 }
 0x85e   :  { %v9713_v59 = vpop.f32.mrf.mxu1  ;;  %v9733_v4 = vpop.f32.mrf.mxu0 }
 0x85f   :  { %v2061_v17 = vadd.f32 %v9733_v4, %v9713_v59 }
 0x860   :  { %v1926_v61 = vpop.f32.mrf.mxu1  ;;  %v2055_v7 = vpop.f32.mrf.mxu0 }
 0x861   :  { %v2056_v19 = vadd.f32 %v2055_v7, %v1926_v61 }
 0x862   :  { %v9716_v63 = vpop.f32.mrf.mxu1  ;;  %v9736_v9 = vpop.f32.mrf.mxu0 }
 0x863   :  { %v2071_v22 = vadd.f32 %v9736_v9, %v9716_v63 }
 0x864   :  { %v1936_v2 = vpop.f32.mrf.mxu1  ;;  %v2065_v13 = vpop.f32.mrf.mxu0 }
 0x865   :  { %v2066_v24 = vadd.f32 %v2065_v13, %v1936_v2 }
 0x866   :  { %v9719_v6 = vpop.f32.mrf.mxu1  ;;  %v9739_v3 = vpop.f32.mrf.mxu0 }
 0x867   :  { %v2081_v31 = vadd.f32 %v9739_v3, %v9719_v6 }
 0x868   :  { %v1946_v8 = vpop.f32.mrf.mxu1  ;;  %v2075_v26 = vpop.f32.mrf.mxu0 }
 0x869   :  { %v2076_v33 = vadd.f32 %v2075_v26, %v1946_v8 }
 0x8cd   :  { %v9750_v11 = vpop.f32.mrf.mxu1 }
 0x8ce   :  { %v10948_v14 = vadd.f32 %v9750_v11, %v2051_v10 }
 0x8cf   :  { %v2198_v15 = vpop.f32.mrf.mxu1 }
 0x8d0   :  { %v10950_v16 = vadd.f32 %v2198_v15, %v2046_v12  ;;  %v2382_v60 = vmul.f32 %v10948_v14, %v10948_v14 }
 0x8d1   :  { %v9753_v18 = vpop.f32.mrf.mxu1 }
 0x8d2   :  { %v2381_v58 = vmul.f32 %v10950_v16, %v10950_v16  ;;  %9764 = vmatprep.mubr.msk.f32.mxu0 %vm2248_vm10, %v10950_v16  ;;  %v10958_v5 = vadd.f32 %v9753_v18, %v2061_v17 }
 0x8d3   :  { %v2208_v20 = vpop.f32.mrf.mxu1  ;;  %9765 = vmatmul.mubr.msk.f32.vlgmr.msra.gmra.mxu0 %vm2248_vm10, %v10948_v14 }
 0x8d4   :  { %v10962_v21 = vadd.f32 %v2208_v20, %v2056_v19  ;;  %9780 = vmatprep.mubr.msk.f32.mxu1 %vm2248_vm10, %v2381_v58  ;;  %v2384_v27 = vmul.f32 %v10958_v5, %v10958_v5  ;;  %9793 = vmatpush3.msk.msra.mxu0 %vm502_vm4, %v2247_v41 }
 0x8d5   :  { %v9756_v23 = vpop.f32.mrf.mxu1  ;;  %9781 = vmatmul.mubr.msk.f32.vlgmr.msra.gmra.mxu1 %vm2248_vm10, %v2382_v60 }
 0x8d6   :  { %v2383_v25 = vmul.f32 %v10962_v21, %v10962_v21  ;;  %9767 = vmatprep.mubr.msk.f32.mxu0 %vm2248_vm10, %v10962_v21  ;;  %v10972_v28 = vadd.f32 %v9756_v23, %v2071_v22  ;;  %9807 = vmatpush3.msk.msra.mxu1 %vm502_vm4, %v2247_v41 }
 0x8d7   :  { %v2218_v29 = vpop.f32.mrf.mxu1  ;;  %9768 = vmatmul.mubr.msk.f32.gmra.mxu0 %vm2248_vm10, %v10958_v5 }
 0x8d8   :  { %v10976_v30 = vadd.f32 %v2218_v29, %v2066_v24  ;;  %9783 = vmatprep.mubr.msk.f32.mxu1 %vm2248_vm10, %v2383_v25  ;;  %v2386_v35 = vmul.f32 %v10972_v28, %v10972_v28 }
 0x8d9   :  { %v9759_v32 = vpop.f32.mrf.mxu1  ;;  %9784 = vmatmul.mubr.msk.f32.gmra.mxu1 %vm2248_vm10, %v2384_v27 }
 0x8da   :  { %v2385_v34 = vmul.f32 %v10976_v30, %v10976_v30  ;;  %9770 = vmatprep.mubr.msk.f32.mxu0 %vm2248_vm10, %v10976_v30  ;;  %v10986_v36 = vadd.f32 %v9759_v32, %v2081_v31 }
 0x8db   :  { %v2228_v37 = vpop.f32.mrf.mxu1  ;;  %9771 = vmatmul.mubr.msk.f32.gmra.mxu0 %vm2248_vm10, %v10972_v28 }
 0x8dc   :  { %v10990_v38 = vadd.f32 %v2228_v37, %v2076_v33  ;;  %9786 = vmatprep.mubr.msk.f32.mxu1 %vm2248_vm10, %v2385_v34  ;;  %v2388_v40 = vmul.f32 %v10986_v36, %v10986_v36 }
 0x8dd   :  { %9787 = vmatmul.mubr.msk.f32.gmra.mxu1 %vm2248_vm10, %v2386_v35 }
 0x8de   :  { %v2387_v39 = vmul.f32 %v10990_v38, %v10990_v38  ;;  %9773 = vmatprep.mubr.msk.f32.mxu0 %vm2248_vm10, %v10990_v38 }
 0x8df   :  { %9774 = vmatmul.mubr.msk.f32.gmra.mxu0 %vm2248_vm10, %v10986_v36 }
 0x8e0   :  { %9789 = vmatprep.mubr.msk.f32.mxu1 %vm2248_vm10, %v2387_v39 }
 0x8e1   :  { %9790 = vmatmul.mubr.msk.f32.gmra.mxu1 %vm2248_vm10, %v2388_v40 }
 0x993   :  { %v9766_v42 = vpop.f32.mrf.mxu0 }
 0x994   :  { %v11008_v43 = vmul.f32 0.14285715, %v9766_v42 }
 0x995   :  { %v2342_v44 = vpop.f32.mrf.mxu0  ;;  %v9782_v45 = vpop.f32.mrf.mxu1 }
 0x996   :  { %v2535_v46 = vmul.f32 %v11008_v43, %v11008_v43  ;;  %v11012_v47 = vmul.f32 0.14285715, %v2342_v44  ;;  %v2527_v48 = vmul.f32 0.14285715, %v9782_v45 }
 0x997   :  { %v9769_v49 = vpop.f32.mrf.mxu0  ;;  %v2479_v50 = vpop.f32.mrf.mxu1 }
 0x998   :  { %v2534_v51 = vmul.f32 %v11012_v47, %v11012_v47  ;;  %v2543_v52 = vsub.f32 %v2527_v48, %v2535_v46  ;;  %v11016_v53 = vmul.f32 0.14285715, %v9769_v49  ;;  %v2526_v54 = vmul.f32 0.14285715, %v2479_v50 }
 0x999   :  { %v2352_v55 = vpop.f32.mrf.mxu0  ;;  %v9785_v56 = vpop.f32.mrf.mxu1 }
 0x99a   :  { %v2551_v57 = vmax.f32 %v2543_v52, 0.0  ;;  %v2537_v59 = vmul.f32 %v11016_v53, %v11016_v53  ;;  %v11020_v61 = vmul.f32 0.14285715, %v2352_v55  ;;  %v2542_v62 = vsub.f32 %v2526_v54, %v2534_v51 }
 0x99b   :  { %v2529_v63 = vmul.f32 0.14285715, %v9785_v56  ;;  %v9772_v1 = vpop.f32.mrf.mxu0  ;;  %v2489_v2 = vpop.f32.mrf.mxu1  ;;  %v2574_v55 = vsub.f32 0.0, %v11012_v47 }
 0x99c   :  { %v2559_v4 = vadd.f32 1e-05, %v2551_v57  ;;  %v2536_v6 = vmul.f32 %v11020_v61, %v11020_v61  ;;  %v11024_v7 = vmul.f32 0.14285715, %v9772_v1  ;;  %v2550_v8 = vmax.f32 %v2542_v62, 0.0 }
 0x99d   :  { %v2545_v9 = vsub.f32 %v2529_v63, %v2537_v59  ;;  %v2528_v10 = vmul.f32 0.14285715, %v2489_v2  ;;  %v2362_v11 = vpop.f32.mrf.mxu0  ;;  %v9788_v12 = vpop.f32.mrf.mxu1  ;;  %v2575_v57 = vsub.f32 0.0, %v11008_v43  ;;  %v2576_v1 = vsub.f32 0.0, %v11020_v61 }
 0x99e   :  { %v2539_v13 = vmul.f32 %v11024_v7, %v11024_v7  ;;  %v11028_v15 = vmul.f32 0.14285715, %v2362_v11  ;;  %v2558_v17 = vadd.f32 1e-05, %v2550_v8  ;;  %v2531_v58 = vmul.f32 0.14285715, %v9788_v12 }
 0x99f   :  { %v2553_v18 = vmax.f32 %v2545_v9, 0.0  ;;  %v2544_v19 = vsub.f32 %v2528_v10, %v2536_v6  ;;  %v9775_v60 = vpop.f32.mrf.mxu0  ;;  %v2499_v3 = vpop.f32.mrf.mxu1  ;;  %10599 = vrsqrt.f32 %v2559_v4  ;;  %v2577_v4 = vsub.f32 0.0, %v11016_v53 }
 0x9a0   :  { %v2538_v20 = vmul.f32 %v11028_v15, %v11028_v15  ;;  %v11032_v22 = vmul.f32 0.14285715, %v9775_v60  ;;  %v2530_v23 = vmul.f32 0.14285715, %v2499_v3  ;;  %10601 = vrsqrt.f32 %v2558_v17 }
 0x9a1   :  { %v2561_v24 = vadd.f32 1e-05, %v2553_v18  ;;  %v2552_v25 = vmax.f32 %v2544_v19, 0.0  ;;  %v2547_v26 = vsub.f32 %v2531_v58, %v2539_v13  ;;  %v2372_v27 = vpop.f32.mrf.mxu0  ;;  %v9791_v29 = vpop.f32.mrf.mxu1  ;;  %v2578_v6 = vsub.f32 0.0, %v11028_v15  ;;  %v11059_v18 = vld [vmem:[#allocation2 + $0x318] sm:$0x3f] }
 0x9a2   :  { %v2541_v31 = vmul.f32 %v11032_v22, %v11032_v22  ;;  %v2546_v32 = vsub.f32 %v2530_v23, %v2538_v20  ;;  %v2524_v33 = vmul.f32 0.14285715, %v2372_v27  ;;  %v2533_v37 = vmul.f32 0.14285715, %v9791_v29  ;;  %9820 = vmatprep.subr.msk.mxu0 %vm315_vm2, %v11059_v18  ;;  %v11065_v19 = vld [vmem:[#allocation2 + $0x310] sm:$0xff] }
 0x9a3   :  { %v2560_v34 = vadd.f32 1e-05, %v2552_v25  ;;  %v2555_v35 = vmax.f32 %v2547_v26, 0.0  ;;  %v2509_v39 = vpop.f32.mrf.mxu1  ;;  %10603 = vrsqrt.f32 %v2561_v24  ;;  %v2579_v61 = vsub.f32 0.0, %v11024_v7 }
 0x9a4   :  { %v2554_v40 = vmax.f32 %v2546_v32, 0.0  ;;  %v2540_v41 = vmul.f32 %v2524_v33, %v2524_v33  ;;  %v2532_v42 = vmul.f32 0.14285715, %v2509_v39  ;;  %v2549_v45 = vsub.f32 %v2533_v37, %v2541_v31 }
 0x9a5   :  { %10605 = vrsqrt.f32 %v2560_v34  ;;  %v2563_v44 = vadd.f32 1e-05, %v2555_v35  ;;  %v2580_v11 = vsub.f32 0.0, %v2524_v33  ;;  %v2581_v15 = vsub.f32 0.0, %v11032_v22 }
 0x9a6   :  { %v2562_v46 = vadd.f32 1e-05, %v2554_v40  ;;  %v2548_v48 = vsub.f32 %v2532_v42, %v2540_v41  ;;  %v2557_v49 = vmax.f32 %v2549_v45, 0.0 }
 0x9a7   :  { %10607 = vrsqrt.f32 %v2563_v44 }
 0x9a8   :  { %10609 = vrsqrt.f32 %v2562_v46  ;;  %v2556_v50 = vmax.f32 %v2548_v48, 0.0  ;;  %v2565_v51 = vadd.f32 1e-05, %v2557_v49 }
 0x9aa   :  { %v2564_v52 = vadd.f32 1e-05, %v2556_v50  ;;  %10611 = vrsqrt.f32 %v2565_v51 }
 0x9ac   :  { %10613 = vrsqrt.f32 %v2564_v52  ;;  %v10600_v54 = vpop.eup %10599 }
 0x9ad   :  { %v10602_v56 = vpop.eup %10601  ;;  %v2583_v62 = vmul.f32 %v10600_v54, %v2575_v57 }
 0x9ae   :  { %9794 = vmatprep.mubr.msk.f32.mxu0 %vm495_vm5, %v10602_v56  ;;  %v2582_v59 = vmul.f32 %v10602_v56, %v2574_v55 }
 0x9af   :  { %9795 = vmatmul.mubr.msk.f32.vlgmr.msra.gmra.mxu0 %vm495_vm5, %v10600_v54 }
 0x9b0   :  { %v10604_v63 = vpop.eup %10603  ;;  %9808 = vmatprep.mubr.msk.f32.mxu1 %vm495_vm5, %v2582_v59  ;;  %9821 = vmatpush3.msk.msra.mxu0 %vm315_vm2, %v11059_v18 }
 0x9b1   :  { %9809 = vmatmul.mubr.msk.f32.vlgmr.msra.gmra.mxu1 %vm495_vm5, %v2583_v62  ;;  %v2585_v8 = vmul.f32 %v10604_v63, %v2577_v4  ;;  %9822 = vmatprep.subr.mxu0 %v11065_v19 }
 0x9b2   :  { %v10606_v2 = vpop.eup %10605  ;;  %9823 = vmatpush3.msra.mxu0 %v11065_v19 }
 0x9b3   :  { %9797 = vmatprep.mubr.msk.f32.mxu0 %vm495_vm5, %v10606_v2  ;;  %v2584_v47 = vmul.f32 %v10606_v2, %v2576_v1 }
 0x9b4   :  { %v10608_v43 = vpop.eup %10607  ;;  %9798 = vmatmul.mubr.msk.f32.gmra.mxu0 %vm495_vm5, %v10604_v63 }
 0x9b5   :  { %v10610_v9 = vpop.eup %10609  ;;  %9811 = vmatprep.mubr.msk.f32.mxu1 %vm495_vm5, %v2584_v47  ;;  %v2587_v12 = vmul.f32 %v10608_v43, %v2579_v61  ;;  %v3012_v61 = vld [vmem:[#allocation2 + $0x338] sm:$0xff] }
 0x9b6   :  { %9812 = vmatmul.mubr.msk.f32.gmra.mxu1 %vm495_vm5, %v2585_v8  ;;  %9800 = vmatprep.mubr.msk.f32.mxu0 %vm495_vm5, %v10610_v9  ;;  %v2586_v53 = vmul.f32 %v10610_v9, %v2578_v6  ;;  %v3009_v6 = vld [vmem:[#allocation2 + $0x320] sm:$0xff]  ;;  %v3010_v8 = vld [vmem:[#allocation2 + $0x328] sm:$0xff]  ;;  %v3011_v9 = vld [vmem:[#allocation2 + $0x330] sm:$0xff] }
 0x9b7   :  { %v10612_v10 = vpop.eup %10611 }
 0x9b8   :  { %9801 = vmatmul.mubr.msk.f32.gmra.mxu0 %vm495_vm5, %v10608_v43  ;;  %9814 = vmatprep.mubr.msk.f32.mxu1 %vm495_vm5, %v2586_v53  ;;  %v2589_v17 = vmul.f32 %v10612_v10, %v2581_v15  ;;  %v3017_v43 = vld [vmem:[#allocation2 + $0x360] sm:$0xff]  ;;  %v3485_v15 = vld [vmem:[#allocation2 + $0x3e8] sm:$0xff] }
 0x9b9   :  { %v10614_v13 = vpop.eup %10613  ;;  %v3013_v53 = vld [vmem:[#allocation2 + $0x340] sm:$0xff] }
 0x9ba   :  { %9815 = vmatmul.mubr.msk.f32.gmra.mxu1 %vm495_vm5, %v2587_v12  ;;  %9803 = vmatprep.mubr.msk.f32.mxu0 %vm495_vm5, %v10614_v13  ;;  %v2588_v7 = vmul.f32 %v10614_v13, %v2580_v11  ;;  %v3015_v11 = vld [vmem:[#allocation2 + $0x350] sm:$0xff]  ;;  %v3016_v12 = vld [vmem:[#allocation2 + $0x358] sm:$0xff]  ;;  %v3484_v13 = vld [vmem:[#allocation2 + $0x3e0] sm:$0xff] }
 0x9bc   :  { %9804 = vmatmul.mubr.msk.f32.gmra.mxu0 %vm495_vm5, %v10612_v10  ;;  %9817 = vmatprep.mubr.msk.f32.mxu1 %vm495_vm5, %v2588_v7  ;;  %v3014_v10 = vld [vmem:[#allocation2 + $0x348] sm:$0xff]  ;;  %v3540_v7 = vld [vmem:[#allocation2 + $0x420] sm:$0xff] }
 0x9be   :  { %9818 = vmatmul.mubr.msk.f32.gmra.mxu1 %vm495_vm5, %v2589_v17  ;;  %v3541_v17 = vld [vmem:[#allocation2 + $0x428] sm:$0xff] }
 0x9bf   :  { %9852 = vmatprep.mubr.msk.f32.mxu1 %vm40_vm1, %v3017_v43  ;;  %v3024_v43 = vld [vmem:[#allocation2 + $0x398] sm:$0xff] }
 0xa6f   :  { %v9796_v58 = vpop.f32.mrf.mxu0 }
 0xa70   :  { %v2852_v60 = vmul.f32 %v9796_v58, %v10948_v14  ;;  %v3486_v58 = vld [vmem:[#allocation2 + $0x3f0] sm:$0xff] }
 0xa71   :  { %v2683_v3 = vpop.f32.mrf.mxu0  ;;  %v9810_v20 = vpop.f32.mrf.mxu1 }
 0xa72   :  { %v2851_v22 = vmul.f32 %v2683_v3, %v10950_v16  ;;  %v11071_v23 = vadd.f32 %v9810_v20, %v2852_v60  ;;  %v3487_v60 = vld [vmem:[#allocation2 + $0x3f8] sm:$0xff]  ;;  %v3542_v3 = vld [vmem:[#allocation2 + $0x430] sm:$0xff] }
 0xa73   :  { %v2812_v25 = vpop.f32.mrf.mxu1  ;;  %v3543_v20 = vld [vmem:[#allocation2 + $0x438] sm:$0xff] }
 0xa74   :  { %v9799_v24 = vpop.f32.mrf.mxu0  ;;  %v11074_v27 = vadd.f32 %v2851_v22, %v2812_v25  ;;  %v2868_v14 = vmax.f32 %v11071_v23, 0.0  ;;  %v3488_v22 = vld [vmem:[#allocation2 + $0x400] sm:$0xff] }
 0xa75   :  { %v2854_v26 = vmul.f32 %v9799_v24, %v10958_v5  ;;  %v3489_v24 = vld [vmem:[#allocation2 + $0x408] sm:$0xff]  ;;  %v3544_v25 = vld [vmem:[#allocation2 + $0x440] sm:$0xff] }
 0xa76   :  { %v2693_v29 = vpop.f32.mrf.mxu0  ;;  %v9813_v31 = vpop.f32.mrf.mxu1  ;;  %v2867_v32 = vmax.f32 %v11074_v27, 0.0 }
 0xa77   :  { %v2853_v33 = vmul.f32 %v2693_v29, %v10962_v21  ;;  %v11079_v34 = vadd.f32 %v9813_v31, %v2854_v26  ;;  %v3545_v26 = vld [vmem:[#allocation2 + $0x448] sm:$0xff]  ;;  %v3490_v29 = vld [vmem:[#allocation2 + $0x410] sm:$0xff]  ;;  %v3491_v31 = vld [vmem:[#allocation2 + $0x418] sm:$0xff] }
 0xa78   :  { %v9802_v35 = vpop.f32.mrf.mxu0  ;;  %v2822_v16 = vpop.f32.mrf.mxu1  ;;  %9824 = vmatprep.mubr.msk.f32.mxu0 %vm2248_vm10, %v2867_v32 }
 0xa79   :  { %v2856_v37 = vmul.f32 %v9802_v35, %v10972_v28  ;;  %v11082_v39 = vadd.f32 %v2853_v33, %v2822_v16  ;;  %9825 = vmatmul.mubr.msk.f32.vlgmr.msra.gmra.mxu0 %vm2248_vm10, %v2868_v14  ;;  %v2870_v42 = vmax.f32 %v11079_v34, 0.0  ;;  %v3546_v33 = vld [vmem:[#allocation2 + $0x450] sm:$0xff]  ;;  %v3547_v35 = vld [vmem:[#allocation2 + $0x458] sm:$0xff] }
 0xa7a   :  { %v2703_v5 = vpop.f32.mrf.mxu0  ;;  %v9816_v40 = vpop.f32.mrf.mxu1 }
 0xa7b   :  { %v2869_v21 = vmax.f32 %v11082_v39, 0.0  ;;  %v2855_v41 = vmul.f32 %v2703_v5, %v10976_v30  ;;  %v11093_v44 = vadd.f32 %v9816_v40, %v2856_v37 }
 0xa7c   :  { %v9805_v28 = vpop.f32.mrf.mxu0  ;;  %v2832_v45 = vpop.f32.mrf.mxu1 }
 0xa7d   :  { %v2858_v46 = vmul.f32 %v9805_v28, %v10986_v36  ;;  %v11096_v48 = vadd.f32 %v2855_v41, %v2832_v45  ;;  %9827 = vmatprep.mubr.msk.f32.mxu0 %vm2248_vm10, %v2869_v21  ;;  %v2872_v52 = vmax.f32 %v11093_v44, 0.0 }
 0xa7e   :  { %v2713_v49 = vpop.f32.mrf.mxu0  ;;  %v9819_v50 = vpop.f32.mrf.mxu1  ;;  %9828 = vmatmul.mubr.msk.f32.gmra.mxu0 %vm2248_vm10, %v2870_v42 }
 0xa7f   :  { %v2871_v30 = vmax.f32 %v11096_v48, 0.0  ;;  %v2857_v51 = vmul.f32 %v2713_v49, %v10990_v38  ;;  %v11107_v54 = vadd.f32 %v9819_v50, %v2858_v46  ;;  %v3018_v49 = vld [vmem:[#allocation2 + $0x368] sm:$0xff]  ;;  %v3019_v50 = vld [vmem:[#allocation2 + $0x370] sm:$0xff] }
 0xa80   :  { %v2842_v36 = vpop.f32.mrf.mxu1 }
 0xa81   :  { %v11109_v55 = vadd.f32 %v2857_v51, %v2842_v36  ;;  %9830 = vmatprep.mubr.msk.f32.mxu0 %vm2248_vm10, %v2871_v30  ;;  %v2874_v57 = vmax.f32 %v11107_v54, 0.0  ;;  %v4473_v54 = vld [vmem:[#allocation2 + $0x5e0] sm:$0xff] }
 0xa82   :  { %9831 = vmatmul.mubr.msk.f32.gmra.mxu0 %vm2248_vm10, %v2872_v52 }
 0xa83   :  { %v2873_v56 = vmax.f32 %v11109_v55, 0.0 }
 0xa85   :  { %9833 = vmatprep.mubr.msk.f32.mxu0 %vm2248_vm10, %v2873_v56 }
 0xa86   :  { %9834 = vmatmul.mubr.msk.f32.gmra.mxu0 %vm2248_vm10, %v2874_v57 }
 0xa87   :  { %9880 = vmatprep.mubr.msk.f32.mxu0 %vm40_vm1, %v3009_v6  ;;  %v3315_v6 = vld [vmem:[#allocation2 + $0x3a0] sm:$0xff] }
 0xb39   :  { %v9826_v38 = vpop.f32.mrf.mxu0 }
 0xb3b   :  { %v2970_v59 = vpop.f32.mrf.mxu0 }
 0xb3e   :  { %v9829_v62 = vpop.f32.mrf.mxu0 }
 0xb40   :  { %v2980_v63 = vpop.f32.mrf.mxu0 }
 0xb42   :  { %v9832_v1 = vpop.f32.mrf.mxu0 }
 0xb44   :  { %v2990_v2 = vpop.f32.mrf.mxu0 }
 0xb46   :  { %v9835_v4 = vpop.f32.mrf.mxu0 }
 0xb47   :  { %3047 = vrot.lane.b32.xlu0 %v9835_v4, %s10681_s0  ;;  %9864 = vmatprep.subr.mxu0 %v9835_v4 }
 0xb48   :  { %v3000_v47 = vpop.f32.mrf.mxu0  ;;  %9865 = vmatpush3.msra.mxu0 %v9835_v4 }
 0xb49   :  { %3045 = vrot.lane.b32.xlu1 %v3000_v47, %s10681_s0  ;;  %9866 = vmatprep.subr.mxu0 %v3000_v47 }
 0xb4a   :  { %9867 = vmatpush3.msra.mxu0 %v3000_v47 }
 0xb4b   :  { %3043 = vrot.lane.b32.xlu0 %v9832_v1, %s10681_s0  ;;  %9868 = vmatprep.subr.mxu0 %v9832_v1 }
 0xb4c   :  { %9869 = vmatpush3.msra.mxu0 %v9832_v1 }
 0xb4d   :  { %3041 = vrot.lane.b32.xlu1 %v2990_v2, %s10681_s0  ;;  %9870 = vmatprep.subr.mxu0 %v2990_v2 }
 0xb4e   :  { %9871 = vmatpush3.msra.mxu0 %v2990_v2 }
 0xb4f   :  { %3039 = vrot.lane.b32.xlu0 %v9829_v62, %s10681_s0  ;;  %9872 = vmatprep.subr.mxu0 %v9829_v62 }
 0xb50   :  { %9873 = vmatpush3.msra.mxu0 %v9829_v62 }
 0xb51   :  { %3037 = vrot.lane.b32.xlu1 %v2980_v63, %s10681_s0  ;;  %9874 = vmatprep.subr.mxu0 %v2980_v63 }
 0xb52   :  { %9875 = vmatpush3.msra.mxu0 %v2980_v63 }
 0xb53   :  { %3035 = vrot.lane.b32.xlu0 %v9826_v38, %s10681_s0  ;;  %9876 = vmatprep.subr.mxu0 %v9826_v38 }
 0xb54   :  { %9877 = vmatpush3.msra.mxu0 %v9826_v38 }
 0xb55   :  { %3033 = vrot.lane.b32.xlu1 %v2970_v59, %s10681_s0  ;;  %9878 = vmatprep.subr.mxu0 %v2970_v59 }
 0xb56   :  { %9879 = vmatpush3.msra.mxu0 %v2970_v59 }
 0xb57   :  { %3337 = vrot.lane.b32.xlu0 %v9835_v4, %s10682_s1  ;;  %9881 = vmatmul.mubr.msk.f32.vlgmr.msra.gmra.mxu0 %vm40_vm1, %v3010_v8 }
 0xb58   :  { %9883 = vmatprep.mubr.msk.f32.mxu0 %vm40_vm1, %v3011_v9  ;;  %9920 = vmatprep.subr.msk.mxu0 %vm315_vm2, %v11059_v18 }
 0xb59   :  { %3335 = vrot.lane.b32.xlu1 %v3000_v47, %s10682_s1  ;;  %9921 = vmatpush3.msk.msra.mxu0 %vm315_vm2, %v11059_v18 }
 0xb5a   :  { %9922 = vmatprep.subr.mxu0 %v11065_v19 }
 0xb5b   :  { %3333 = vrot.lane.b32.xlu0 %v9832_v1, %s10682_s1  ;;  %9884 = vmatmul.mubr.msk.f32.gmra.mxu0 %vm40_vm1, %v3012_v61  ;;  %v3022_v1 = vld [vmem:[#allocation2 + $0x388] sm:$0xff] }
 0xb5c   :  { %9886 = vmatprep.mubr.msk.f32.mxu0 %vm40_vm1, %v3013_v53  ;;  %9923 = vmatpush3.msra.mxu0 %v11065_v19  ;;  %v3316_v61 = vld [vmem:[#allocation2 + $0x3a8] sm:$0xff]  ;;  %v3317_v53 = vld [vmem:[#allocation2 + $0x3b0] sm:$0xff] }
 0xb5d   :  { %3331 = vrot.lane.b32.xlu1 %v2990_v2, %s10682_s1  ;;  %v3023_v2 = vld [vmem:[#allocation2 + $0x390] sm:$0xff] }
 0xb5f   :  { %3329 = vrot.lane.b32.xlu0 %v9829_v62, %s10682_s1  ;;  %9887 = vmatmul.mubr.msk.f32.gmra.mxu0 %vm40_vm1, %v3014_v10  ;;  %v3318_v10 = vld [vmem:[#allocation2 + $0x3b8] sm:$0xff] }
 0xb60   :  { %9889 = vmatprep.mubr.msk.f32.mxu0 %vm40_vm1, %v3015_v11  ;;  %v3319_v11 = vld [vmem:[#allocation2 + $0x3c0] sm:$0xff] }
 0xb61   :  { %3327 = vrot.lane.b32.xlu1 %v2980_v63, %s10682_s1 }
 0xb63   :  { %3325 = vrot.lane.b32.xlu0 %v9826_v38, %s10682_s1  ;;  %9890 = vmatmul.mubr.msk.f32.gmra.mxu0 %vm40_vm1, %v3016_v12  ;;  %v3020_v38 = vld [vmem:[#allocation2 + $0x378] sm:$0xff]  ;;  %v3320_v12 = vld [vmem:[#allocation2 + $0x3c8] sm:$0xff] }
 0xb65   :  { %3323 = vrot.lane.b32.xlu1 %v2970_v59, %s10682_s1  ;;  %v3021_v59 = vld [vmem:[#allocation2 + $0x380] sm:$0xff] }
 0xb67   :  { %3494 = vperm.xlu0 %10585, %v3484_v13   ;;  %v3321_v13 = vld [vmem:[#allocation2 + $0x3d0] sm:$0xff] }
 0xb69   :  { %3499 = vperm.xlu1 %10586, %v3485_v15   ;;  %v3322_v15 = vld [vmem:[#allocation2 + $0x3d8] sm:$0xff] }
 0xb6b   :  { %3550 = vperm.xlu0 %10585, %v3540_v7  }
 0xb6d   :  { %3555 = vperm.xlu1 %10586, %v3541_v17  }
 0xb6f   :  { %3504 = vperm.xlu0 %10585, %v3486_v58  }
 0xb71   :  { %3509 = vperm.xlu1 %10586, %v3487_v60  }
 0xb73   :  { %3560 = vperm.xlu0 %10585, %v3542_v3  }
 0xb75   :  { %3565 = vperm.xlu1 %10586, %v3543_v20  }
 0xb77   :  { %3514 = vperm.xlu0 %10585, %v3488_v22  }
 0xb79   :  { %3519 = vperm.xlu1 %10586, %v3489_v24  }
 0xb7b   :  { %3570 = vperm.xlu0 %10585, %v3544_v25  }
 0xb7d   :  { %3575 = vperm.xlu1 %10586, %v3545_v26  }
 0xb7f   :  { %3524 = vperm.xlu0 %10585, %v3490_v29  }
 0xb81   :  { %3529 = vperm.xlu1 %10586, %v3491_v31  }
 0xb83   :  { %3580 = vperm.xlu0 %10585, %v3546_v33  }
 0xb85   :  { %3585 = vperm.xlu1 %10586, %v3547_v35  }
 0xbb9   :  { %v3048_v16 = vpop.permute.xlu0 %3047 }
 0xbba   :  { %9836 = vmatprep.subr.mxu1 %v3048_v16 }
 0xbbb   :  { %9837 = vmatpush3.msra.mxu1 %v3048_v16  ;;  %v3046_v37 = vpop.permute.xlu1 %3045 }
 0xbbc   :  { %9838 = vmatprep.subr.mxu1 %v3046_v37 }
 0xbbd   :  { %v3044_v5 = vpop.permute.xlu0 %3043  ;;  %9839 = vmatpush3.msra.mxu1 %v3046_v37 }
 0xbbe   :  { %9840 = vmatprep.subr.mxu1 %v3044_v5 }
 0xbbf   :  { %9841 = vmatpush3.msra.mxu1 %v3044_v5  ;;  %v3042_v40 = vpop.permute.xlu1 %3041 }
 0xbc0   :  { %9842 = vmatprep.subr.mxu1 %v3042_v40 }
 0xbc1   :  { %v3040_v41 = vpop.permute.xlu0 %3039  ;;  %9843 = vmatpush3.msra.mxu1 %v3042_v40 }
 0xbc2   :  { %9844 = vmatprep.subr.mxu1 %v3040_v41 }
 0xbc3   :  { %9845 = vmatpush3.msra.mxu1 %v3040_v41  ;;  %v3038_v28 = vpop.permute.xlu1 %3037 }
 0xbc4   :  { %9846 = vmatprep.subr.mxu1 %v3038_v28 }
 0xbc5   :  { %v3036_v45 = vpop.permute.xlu0 %3035  ;;  %9847 = vmatpush3.msra.mxu1 %v3038_v28 }
 0xbc6   :  { %9848 = vmatprep.subr.mxu1 %v3036_v45 }
 0xbc7   :  { %9849 = vmatpush3.msra.mxu1 %v3036_v45  ;;  %v3034_v46 = vpop.permute.xlu1 %3033 }
 0xbc8   :  { %9850 = vmatprep.subr.mxu1 %v3034_v46 }
 0xbc9   :  { %v3338_v51 = vpop.permute.xlu0 %3337  ;;  %9851 = vmatpush3.msra.mxu1 %v3034_v46 }
 0xbca   :  { %9853 = vmatmul.mubr.msk.f32.vlgmr.msra.gmra.mxu1 %vm40_vm1, %v3018_v49  ;;  %9892 = vmatprep.subr.mxu1 %v3338_v51 }
 0xbcb   :  { %9893 = vmatpush3.msra.mxu1 %v3338_v51  ;;  %v3336_v36 = vpop.permute.xlu1 %3335  ;;  %9855 = vmatprep.mubr.msk.f32.mxu1 %vm40_vm1, %v3019_v50 }
 0xbcc   :  { %9894 = vmatprep.subr.mxu1 %v3336_v36 }
 0xbcd   :  { %v3334_v62 = vpop.permute.xlu0 %3333  ;;  %9895 = vmatpush3.msra.mxu1 %v3336_v36 }
 0xbce   :  { %9856 = vmatmul.mubr.msk.f32.gmra.mxu1 %vm40_vm1, %v3020_v38  ;;  %9896 = vmatprep.subr.mxu1 %v3334_v62 }
 0xbcf   :  { %9897 = vmatpush3.msra.mxu1 %v3334_v62  ;;  %v3332_v63 = vpop.permute.xlu1 %3331  ;;  %9858 = vmatprep.mubr.msk.f32.mxu1 %vm40_vm1, %v3021_v59 }
 0xbd0   :  { %9898 = vmatprep.subr.mxu1 %v3332_v63 }
 0xbd1   :  { %v3330_v4 = vpop.permute.xlu0 %3329  ;;  %9899 = vmatpush3.msra.mxu1 %v3332_v63 }
 0xbd2   :  { %9859 = vmatmul.mubr.msk.f32.gmra.mxu1 %vm40_vm1, %v3022_v1  ;;  %9900 = vmatprep.subr.mxu1 %v3330_v4 }
 0xbd3   :  { %9901 = vmatpush3.msra.mxu1 %v3330_v4  ;;  %v3328_v47 = vpop.permute.xlu1 %3327  ;;  %9861 = vmatprep.mubr.msk.f32.mxu1 %vm40_vm1, %v3023_v2 }
 0xbd4   :  { %9902 = vmatprep.subr.mxu1 %v3328_v47 }
 0xbd5   :  { %v3326_v8 = vpop.permute.xlu0 %3325  ;;  %9903 = vmatpush3.msra.mxu1 %v3328_v47 }
 0xbd6   :  { %9862 = vmatmul.mubr.msk.f32.gmra.mxu1 %vm40_vm1, %v3024_v43  ;;  %9904 = vmatprep.subr.mxu1 %v3326_v8 }
 0xbd7   :  { %9905 = vmatpush3.msra.mxu1 %v3326_v8  ;;  %v3324_v9 = vpop.permute.xlu1 %3323  ;;  %9908 = vmatprep.mubr.msk.f32.mxu1 %vm40_vm1, %v3315_v6 }
 0xbd8   :  { %9906 = vmatprep.subr.mxu1 %v3324_v9 }
 0xbd9   :  { %9907 = vmatpush3.msra.mxu1 %v3324_v9 }
 0xbda   :  { %9909 = vmatmul.mubr.msk.f32.vlgmr.msra.gmra.mxu1 %vm40_vm1, %v3316_v61 }
 0xbdb   :  { %9911 = vmatprep.mubr.msk.f32.mxu1 %vm40_vm1, %v3317_v53 }
 0xbde   :  { %9912 = vmatmul.mubr.msk.f32.gmra.mxu1 %vm40_vm1, %v3318_v10 }
 0xbdf   :  { %9914 = vmatprep.mubr.msk.f32.mxu1 %vm40_vm1, %v3319_v11 }
 0xbe2   :  { %9915 = vmatmul.mubr.msk.f32.gmra.mxu1 %vm40_vm1, %v3320_v12  ;;  %v3495_v7 = vpop.permute.xlu0 %3494 }
 0xbe3   :  { %9917 = vmatprep.mubr.msk.f32.mxu1 %vm40_vm1, %v3321_v13 }
 0xbe4   :  { %v3500_v17 = vpop.permute.xlu1 %3499 }
 0xbe6   :  { %9918 = vmatmul.mubr.msk.f32.gmra.mxu1 %vm40_vm1, %v3322_v15  ;;  %v3551_v58 = vpop.permute.xlu0 %3550 }
 0xbe8   :  { %v3556_v60 = vpop.permute.xlu1 %3555 }
 0xbea   :  { %v3505_v25 = vpop.permute.xlu0 %3504 }
 0xbec   :  { %v3510_v26 = vpop.permute.xlu1 %3509 }
 0xbee   :  { %v3561_v16 = vpop.permute.xlu0 %3560 }
 0xbf0   :  { %v3566_v37 = vpop.permute.xlu1 %3565 }
 0xbf2   :  { %v3515_v46 = vpop.permute.xlu0 %3514 }
 0xbf4   :  { %v3520_v49 = vpop.permute.xlu1 %3519 }
 0xbf6   :  { %v3571_v47 = vpop.permute.xlu0 %3570 }
 0xbf8   :  { %v3576_v43 = vpop.permute.xlu1 %3575 }
 0xc17   :  { %v9882_v3 = vpop.f32.mrf.mxu0 }
 0xc19   :  { %v3276_v24 = vpop.f32.mrf.mxu0 }
 0xc1b   :  { %v9885_v33 = vpop.f32.mrf.mxu0 }
 0xc1d   :  { %v3286_v40 = vpop.f32.mrf.mxu0 }
 0xc1f   :  { %v9888_v45 = vpop.f32.mrf.mxu0 }
 0xc21   :  { %v3296_v59 = vpop.f32.mrf.mxu0 }
 0xc23   :  { %v9891_v53 = vpop.f32.mrf.mxu0 }
 0xc8a   :  { %v9854_v20 = vpop.f32.mrf.mxu1 }
 0xc8b   :  { %v3282_v50 = vadd.f32 %v9882_v3, %v9854_v20 }
 0xc8c   :  { %v3147_v22 = vpop.f32.mrf.mxu1 }
 0xc8d   :  { %v3277_v36 = vadd.f32 %v3276_v24, %v3147_v22 }
 0xc8e   :  { %v9857_v29 = vpop.f32.mrf.mxu1 }
 0xc8f   :  { %v3292_v63 = vadd.f32 %v9885_v33, %v9857_v29  ;;  %v3306_v33 = vpop.f32.mrf.mxu0 }
 0xc90   :  { %v3157_v31 = vpop.f32.mrf.mxu1 }
 0xc91   :  { %v3287_v6 = vadd.f32 %v3286_v40, %v3157_v31 }
 0xc92   :  { %v9860_v35 = vpop.f32.mrf.mxu1 }
 0xc93   :  { %v3302_v11 = vadd.f32 %v9888_v45, %v9860_v35  ;;  %v3525_v35 = vpop.permute.xlu0 %3524 }
 0xc94   :  { %v3167_v5 = vpop.f32.mrf.mxu1 }
 0xc95   :  { %v3297_v20 = vadd.f32 %v3296_v59, %v3167_v5 }
 0xc96   :  { %v9863_v41 = vpop.f32.mrf.mxu1 }
 0xc97   :  { %v3312_v31 = vadd.f32 %v9891_v53, %v9863_v41 }
 0xc98   :  { %v3177_v28 = vpop.f32.mrf.mxu1 }
 0xc9a   :  { %v9910_v51 = vpop.f32.mrf.mxu1 }
 0xc9b   :  { %v3477_v38 = vadd.f32 %v9910_v51, %v3282_v50 }
 0xc9c   :  { %v3437_v62 = vpop.f32.mrf.mxu1 }
 0xc9d   :  { %v3533_v1 = vmul.f32 %v3500_v17, %v3477_v38  ;;  %v3476_v2 = vadd.f32 %v3437_v62, %v3277_v36  ;;  %v3530_v36 = vpop.permute.xlu1 %3529 }
 0xc9e   :  { %v9913_v4 = vpop.f32.mrf.mxu1 }
 0xc9f   :  { %v3532_v8 = vmul.f32 %v3495_v7, %v3476_v2  ;;  %v3479_v9 = vadd.f32 %v9913_v4, %v3292_v63  ;;  %v3589_v61 = vadd.f32 %v3556_v60, %v3533_v1  ;;  %v3581_v2 = vpop.permute.xlu0 %3580 }
 0xca0   :  { %v3447_v10 = vpop.f32.mrf.mxu1 }
 0xca1   :  { %v3588_v12 = vadd.f32 %v3551_v58, %v3532_v8  ;;  %v3535_v13 = vmul.f32 %v3510_v26, %v3479_v9  ;;  %v3478_v15 = vadd.f32 %v3447_v10, %v3287_v6  ;;  %v3597_v17 = vmax.f32 %v3589_v61, 0.0 }
 0xca2   :  { %v9916_v3 = vpop.f32.mrf.mxu1  ;;  %v3307_v26 = vadd.f32 %v3306_v33, %v3177_v28  ;;  %v4208_v33 = vld [vmem:[#allocation2 + $0x520] sm:$0xff] }
 0xca3   :  { %v3596_v22 = vmax.f32 %v3588_v12, 0.0  ;;  %v3534_v24 = vmul.f32 %v3505_v25, %v3478_v15  ;;  %v3481_v29 = vadd.f32 %v9916_v3, %v3302_v11  ;;  %v3591_v50 = vadd.f32 %v3566_v37, %v3535_v13  ;;  %v3741_v13 = vld [vmem:[#allocation2 + $0x4a0] sm:$0xff]  ;;  %v3734_v3 = vld [vmem:[#allocation2 + $0x468] sm:$0xff] }
 0xca4   :  { %v3457_v51 = vpop.f32.mrf.mxu1  ;;  %v3733_v15 = vld [vmem:[#allocation2 + $0x460] sm:$0xff]  ;;  %9952 = vmatprep.mubr.msk.f32.mxu1 %vm40_vm1, %v3741_v13 }
 0xca5   :  { %v3590_v7 = vadd.f32 %v3561_v16, %v3534_v24  ;;  %v3537_v40 = vmul.f32 %v3520_v49, %v3481_v29  ;;  %v3480_v60 = vadd.f32 %v3457_v51, %v3297_v20  ;;  %9924 = vmatprep.mubr.msk.f32.mxu0 %vm2248_vm10, %v3596_v22  ;;  %v3599_v38 = vmax.f32 %v3591_v50, 0.0  ;;  %v3586_v16 = vpop.permute.xlu1 %3585  ;;  %v3735_v20 = vld [vmem:[#allocation2 + $0x470] sm:$0xff]  ;;  %v3736_v22 = vld [vmem:[#allocation2 + $0x478] sm:$0xff]  ;;  %v3737_v24 = vld [vmem:[#allocation2 + $0x480] sm:$0xff] }
 0xca6   :  { %v9919_v58 = vpop.f32.mrf.mxu1  ;;  %9925 = vmatmul.mubr.msk.f32.vlgmr.msra.gmra.mxu0 %vm2248_vm10, %v3597_v17  ;;  %v3738_v29 = vld [vmem:[#allocation2 + $0x488] sm:$0xff]  ;;  %v3739_v17 = vld [vmem:[#allocation2 + $0x490] sm:$0xff]  ;;  %v4264_v50 = vld [vmem:[#allocation2 + $0x560] sm:$0xff] }
 0xca7   :  { %v3598_v5 = vmax.f32 %v3590_v7, 0.0  ;;  %v3536_v45 = vmul.f32 %v3515_v46, %v3480_v60  ;;  %v3483_v25 = vadd.f32 %v9919_v58, %v3312_v31  ;;  %v3593_v59 = vadd.f32 %v3576_v43, %v3537_v40  ;;  %v4265_v51 = vld [vmem:[#allocation2 + $0x568] sm:$0xff]  ;;  %v4211_v31 = vld [vmem:[#allocation2 + $0x538] sm:$0xff]  ;;  %v4266_v7 = vld [vmem:[#allocation2 + $0x570] sm:$0xff] }
 0xca8   :  { %v3467_v62 = vpop.f32.mrf.mxu1  ;;  %v4267_v40 = vld [vmem:[#allocation2 + $0x578] sm:$0xff]  ;;  %v4212_v60 = vld [vmem:[#allocation2 + $0x540] sm:$0xff] }
 0xca9   :  { %v3592_v37 = vadd.f32 %v3571_v47, %v3536_v45  ;;  %v3539_v63 = vmul.f32 %v3530_v36, %v3483_v25  ;;  %v3482_v1 = vadd.f32 %v3467_v62, %v3307_v26  ;;  %9927 = vmatprep.mubr.msk.f32.mxu0 %vm2248_vm10, %v3598_v5  ;;  %v3601_v4 = vmax.f32 %v3593_v59, 0.0  ;;  %v4210_v36 = vld [vmem:[#allocation2 + $0x530] sm:$0xff]  ;;  %v4268_v58 = vld [vmem:[#allocation2 + $0x580] sm:$0xff]  ;;  %v4269_v26 = vld [vmem:[#allocation2 + $0x588] sm:$0xff] }
 0xcaa   :  { %9928 = vmatmul.mubr.msk.f32.gmra.mxu0 %vm2248_vm10, %v3599_v38  ;;  %v4214_v5 = vld [vmem:[#allocation2 + $0x550] sm:$0xff]  ;;  %v4215_v45 = vld [vmem:[#allocation2 + $0x558] sm:$0xff] }
 0xcab   :  { %v3600_v41 = vmax.f32 %v3592_v37, 0.0  ;;  %v3538_v49 = vmul.f32 %v3525_v35, %v3482_v1  ;;  %v3595_v6 = vadd.f32 %v3586_v16, %v3539_v63  ;;  %v4213_v35 = vld [vmem:[#allocation2 + $0x548] sm:$0xff]  ;;  %v4270_v25 = vld [vmem:[#allocation2 + $0x590] sm:$0xff]  ;;  %v4271_v38 = vld [vmem:[#allocation2 + $0x598] sm:$0xff] }
 0xcad   :  { %v3594_v28 = vadd.f32 %v3581_v2, %v3538_v49  ;;  %9930 = vmatprep.mubr.msk.f32.mxu0 %vm2248_vm10, %v3600_v41  ;;  %v3603_v43 = vmax.f32 %v3595_v6, 0.0  ;;  %v3742_v2 = vld [vmem:[#allocation2 + $0x4a8] sm:$0xff] }
 0xcae   :  { %9931 = vmatmul.mubr.msk.f32.gmra.mxu0 %vm2248_vm10, %v3601_v4  ;;  %v3743_v4 = vld [vmem:[#allocation2 + $0x4b0] sm:$0xff] }
 0xcaf   :  { %v3602_v46 = vmax.f32 %v3594_v28, 0.0 }
 0xcb1   :  { %9933 = vmatprep.mubr.msk.f32.mxu0 %vm2248_vm10, %v3602_v46  ;;  %v3744_v46 = vld [vmem:[#allocation2 + $0x4b8] sm:$0xff] }
 0xcb2   :  { %9934 = vmatmul.mubr.msk.f32.gmra.mxu0 %vm2248_vm10, %v3603_v43  ;;  %v3745_v43 = vld [vmem:[#allocation2 + $0x4c0] sm:$0xff] }
 0xcb3   :  { %9980 = vmatprep.mubr.msk.f32.mxu0 %vm40_vm1, %v3733_v15 }
 0xd66   :  { %v9926_v47 = vpop.f32.mrf.mxu0 }
 0xd68   :  { %v3694_v8 = vpop.f32.mrf.mxu0 }
 0xd6a   :  { %v9929_v9 = vpop.f32.mrf.mxu0 }
 0xd6c   :  { %v3704_v61 = vpop.f32.mrf.mxu0 }
 0xd6e   :  { %v9932_v53 = vpop.f32.mrf.mxu0 }
 0xd70   :  { %v3714_v10 = vpop.f32.mrf.mxu0 }
 0xd72   :  { %v9935_v11 = vpop.f32.mrf.mxu0 }
 0xd73   :  { %3771 = vrot.lane.b32.xlu0 %v9935_v11, %s10681_s0  ;;  %9964 = vmatprep.subr.mxu0 %v9935_v11 }
 0xd74   :  { %v3724_v12 = vpop.f32.mrf.mxu0  ;;  %9965 = vmatpush3.msra.mxu0 %v9935_v11 }
 0xd75   :  { %3769 = vrot.lane.b32.xlu1 %v3724_v12, %s10681_s0  ;;  %9966 = vmatprep.subr.mxu0 %v3724_v12 }
 0xd76   :  { %9967 = vmatpush3.msra.mxu0 %v3724_v12 }
 0xd77   :  { %3767 = vrot.lane.b32.xlu0 %v9932_v53, %s10681_s0  ;;  %9968 = vmatprep.subr.mxu0 %v9932_v53 }
 0xd78   :  { %9969 = vmatpush3.msra.mxu0 %v9932_v53 }
 0xd79   :  { %3765 = vrot.lane.b32.xlu1 %v3714_v10, %s10681_s0  ;;  %9970 = vmatprep.subr.mxu0 %v3714_v10 }
 0xd7a   :  { %9971 = vmatpush3.msra.mxu0 %v3714_v10 }
 0xd7b   :  { %3763 = vrot.lane.b32.xlu0 %v9929_v9, %s10681_s0  ;;  %9972 = vmatprep.subr.mxu0 %v9929_v9 }
 0xd7c   :  { %9973 = vmatpush3.msra.mxu0 %v9929_v9 }
 0xd7d   :  { %3761 = vrot.lane.b32.xlu1 %v3704_v61, %s10681_s0  ;;  %9974 = vmatprep.subr.mxu0 %v3704_v61 }
 0xd7e   :  { %9975 = vmatpush3.msra.mxu0 %v3704_v61 }
 0xd7f   :  { %3759 = vrot.lane.b32.xlu0 %v9926_v47, %s10681_s0  ;;  %9976 = vmatprep.subr.mxu0 %v9926_v47 }
 0xd80   :  { %9977 = vmatpush3.msra.mxu0 %v9926_v47 }
 0xd81   :  { %3757 = vrot.lane.b32.xlu1 %v3694_v8, %s10681_s0  ;;  %9978 = vmatprep.subr.mxu0 %v3694_v8 }
 0xd82   :  { %9979 = vmatpush3.msra.mxu0 %v3694_v8 }
 0xd83   :  { %4061 = vrot.lane.b32.xlu0 %v9935_v11, %s10682_s1  ;;  %9981 = vmatmul.mubr.msk.f32.vlgmr.msra.gmra.mxu0 %vm40_vm1, %v3734_v3  ;;  %v3748_v11 = vld [vmem:[#allocation2 + $0x4d8] sm:$0xff]  ;;  %v4040_v3 = vld [vmem:[#allocation2 + $0x4e8] sm:$0xff] }
 0xd84   :  { %9983 = vmatprep.mubr.msk.f32.mxu0 %vm40_vm1, %v3735_v20  ;;  %10020 = vmatprep.subr.msk.mxu0 %vm315_vm2, %v11059_v18  ;;  %v4041_v20 = vld [vmem:[#allocation2 + $0x4f0] sm:$0xff] }
 0xd85   :  { %4059 = vrot.lane.b32.xlu1 %v3724_v12, %s10682_s1  ;;  %10021 = vmatpush3.msk.msra.mxu0 %vm315_vm2, %v11059_v18  ;;  %v3740_v18 = vld [vmem:[#allocation2 + $0x498] sm:$0xff]  ;;  %v4039_v12 = vld [vmem:[#allocation2 + $0x4e0] sm:$0xff] }
 0xd86   :  { %10022 = vmatprep.subr.mxu0 %v11065_v19 }
 0xd87   :  { %4057 = vrot.lane.b32.xlu0 %v9932_v53, %s10682_s1  ;;  %9984 = vmatmul.mubr.msk.f32.gmra.mxu0 %vm40_vm1, %v3736_v22  ;;  %v4042_v22 = vld [vmem:[#allocation2 + $0x4f8] sm:$0xff] }
 0xd88   :  { %9986 = vmatprep.mubr.msk.f32.mxu0 %vm40_vm1, %v3737_v24  ;;  %10023 = vmatpush3.msra.mxu0 %v11065_v19  ;;  %v4209_v19 = vld [vmem:[#allocation2 + $0x528] sm:$0xff]  ;;  %v4043_v24 = vld [vmem:[#allocation2 + $0x500] sm:$0xff] }
 0xd89   :  { %4055 = vrot.lane.b32.xlu1 %v3714_v10, %s10682_s1 }
 0xd8b   :  { %4053 = vrot.lane.b32.xlu0 %v9929_v9, %s10682_s1  ;;  %9987 = vmatmul.mubr.msk.f32.gmra.mxu0 %vm40_vm1, %v3738_v29  ;;  %v3746_v9 = vld [vmem:[#allocation2 + $0x4c8] sm:$0xff] }
 0xd8c   :  { %9989 = vmatprep.mubr.msk.f32.mxu0 %vm40_vm1, %v3739_v17  ;;  %v4044_v29 = vld [vmem:[#allocation2 + $0x508] sm:$0xff]  ;;  %v4045_v17 = vld [vmem:[#allocation2 + $0x510] sm:$0xff] }
 0xd8d   :  { %4051 = vrot.lane.b32.xlu1 %v3704_v61, %s10682_s1  ;;  %v3747_v61 = vld [vmem:[#allocation2 + $0x4d0] sm:$0xff] }
 0xd8f   :  { %4049 = vrot.lane.b32.xlu0 %v9926_v47, %s10682_s1  ;;  %9990 = vmatmul.mubr.msk.f32.gmra.mxu0 %vm40_vm1, %v3740_v18  ;;  %v4046_v18 = vld [vmem:[#allocation2 + $0x518] sm:$0xff] }
 0xd91   :  { %4047 = vrot.lane.b32.xlu1 %v3694_v8, %s10682_s1 }
 0xd93   :  { %4218 = vperm.xlu0 %10585, %v4208_v33  }
 0xd95   :  { %4223 = vperm.xlu1 %10586, %v4209_v19  }
 0xd97   :  { %4274 = vperm.xlu0 %10585, %v4264_v50  }
 0xd99   :  { %4279 = vperm.xlu1 %10586, %v4265_v51  }
 0xd9b   :  { %4228 = vperm.xlu0 %10585, %v4210_v36  }
 0xd9d   :  { %4233 = vperm.xlu1 %10586, %v4211_v31  }
 0xd9f   :  { %4284 = vperm.xlu0 %10585, %v4266_v7  }
 0xda1   :  { %4289 = vperm.xlu1 %10586, %v4267_v40  }
 0xda3   :  { %4238 = vperm.xlu0 %10585, %v4212_v60  }
 0xda5   :  { %4243 = vperm.xlu1 %10586, %v4213_v35  }
 0xda7   :  { %4294 = vperm.xlu0 %10585, %v4268_v58  }
 0xda9   :  { %4299 = vperm.xlu1 %10586, %v4269_v26  }
 0xdab   :  { %4248 = vperm.xlu0 %10585, %v4214_v5  }
 0xdad   :  { %4253 = vperm.xlu1 %10586, %v4215_v45  }
 0xdaf   :  { %4304 = vperm.xlu0 %10585, %v4270_v25  }
 0xdb1   :  { %4309 = vperm.xlu1 %10586, %v4271_v38  }
 0xde5   :  { %v3772_v59 = vpop.permute.xlu0 %3771 }
 0xde6   :  { %9936 = vmatprep.subr.mxu1 %v3772_v59 }
 0xde7   :  { %9937 = vmatpush3.msra.mxu1 %v3772_v59  ;;  %v3770_v62 = vpop.permute.xlu1 %3769 }
 0xde8   :  { %9938 = vmatprep.subr.mxu1 %v3770_v62 }
 0xde9   :  { %v3768_v37 = vpop.permute.xlu0 %3767  ;;  %9939 = vmatpush3.msra.mxu1 %v3770_v62 }
 0xdea   :  { %9940 = vmatprep.subr.mxu1 %v3768_v37 }
 0xdeb   :  { %9941 = vmatpush3.msra.mxu1 %v3768_v37  ;;  %v3766_v63 = vpop.permute.xlu1 %3765 }
 0xdec   :  { %9942 = vmatprep.subr.mxu1 %v3766_v63 }
 0xded   :  { %v3764_v1 = vpop.permute.xlu0 %3763  ;;  %9943 = vmatpush3.msra.mxu1 %v3766_v63 }
 0xdee   :  { %9944 = vmatprep.subr.mxu1 %v3764_v1 }
 0xdef   :  { %9945 = vmatpush3.msra.mxu1 %v3764_v1  ;;  %v3762_v16 = vpop.permute.xlu1 %3761 }
 0xdf0   :  { %9946 = vmatprep.subr.mxu1 %v3762_v16 }
 0xdf1   :  { %v3760_v41 = vpop.permute.xlu0 %3759  ;;  %9947 = vmatpush3.msra.mxu1 %v3762_v16 }
 0xdf2   :  { %9948 = vmatprep.subr.mxu1 %v3760_v41 }
 0xdf3   :  { %9949 = vmatpush3.msra.mxu1 %v3760_v41  ;;  %v3758_v49 = vpop.permute.xlu1 %3757 }
 0xdf4   :  { %9950 = vmatprep.subr.mxu1 %v3758_v49 }
 0xdf5   :  { %v4062_v6 = vpop.permute.xlu0 %4061  ;;  %9951 = vmatpush3.msra.mxu1 %v3758_v49 }
 0xdf6   :  { %9953 = vmatmul.mubr.msk.f32.vlgmr.msra.gmra.mxu1 %vm40_vm1, %v3742_v2  ;;  %9992 = vmatprep.subr.mxu1 %v4062_v6 }
 0xdf7   :  { %9993 = vmatpush3.msra.mxu1 %v4062_v6  ;;  %v4060_v28 = vpop.permute.xlu1 %4059  ;;  %9955 = vmatprep.mubr.msk.f32.mxu1 %vm40_vm1, %v3743_v4 }
 0xdf8   :  { %9994 = vmatprep.subr.mxu1 %v4060_v28 }
 0xdf9   :  { %v4058_v47 = vpop.permute.xlu0 %4057  ;;  %9995 = vmatpush3.msra.mxu1 %v4060_v28 }
 0xdfa   :  { %9956 = vmatmul.mubr.msk.f32.gmra.mxu1 %vm40_vm1, %v3744_v46  ;;  %9996 = vmatprep.subr.mxu1 %v4058_v47 }
 0xdfb   :  { %9997 = vmatpush3.msra.mxu1 %v4058_v47  ;;  %v4056_v8 = vpop.permute.xlu1 %4055  ;;  %9958 = vmatprep.mubr.msk.f32.mxu1 %vm40_vm1, %v3745_v43 }
 0xdfc   :  { %9998 = vmatprep.subr.mxu1 %v4056_v8 }
 0xdfd   :  { %v4054_v53 = vpop.permute.xlu0 %4053  ;;  %9999 = vmatpush3.msra.mxu1 %v4056_v8 }
 0xdfe   :  { %9959 = vmatmul.mubr.msk.f32.gmra.mxu1 %vm40_vm1, %v3746_v9  ;;  %10000 = vmatprep.subr.mxu1 %v4054_v53 }
 0xdff   :  { %10001 = vmatpush3.msra.mxu1 %v4054_v53  ;;  %v4052_v10 = vpop.permute.xlu1 %4051  ;;  %9961 = vmatprep.mubr.msk.f32.mxu1 %vm40_vm1, %v3747_v61 }
 0xe00   :  { %10002 = vmatprep.subr.mxu1 %v4052_v10 }
 0xe01   :  { %v4050_v13 = vpop.permute.xlu0 %4049  ;;  %10003 = vmatpush3.msra.mxu1 %v4052_v10 }
 0xe02   :  { %9962 = vmatmul.mubr.msk.f32.gmra.mxu1 %vm40_vm1, %v3748_v11  ;;  %10004 = vmatprep.subr.mxu1 %v4050_v13 }
 0xe03   :  { %10005 = vmatpush3.msra.mxu1 %v4050_v13  ;;  %v4048_v15 = vpop.permute.xlu1 %4047  ;;  %10008 = vmatprep.mubr.msk.f32.mxu1 %vm40_vm1, %v4039_v12 }
 0xe04   :  { %10006 = vmatprep.subr.mxu1 %v4048_v15 }
 0xe05   :  { %10007 = vmatpush3.msra.mxu1 %v4048_v15 }
 0xe06   :  { %10009 = vmatmul.mubr.msk.f32.vlgmr.msra.gmra.mxu1 %vm40_vm1, %v4040_v3 }
 0xe07   :  { %10011 = vmatprep.mubr.msk.f32.mxu1 %vm40_vm1, %v4041_v20 }
 0xe0a   :  { %10012 = vmatmul.mubr.msk.f32.gmra.mxu1 %vm40_vm1, %v4042_v22 }
 0xe0b   :  { %10014 = vmatprep.mubr.msk.f32.mxu1 %vm40_vm1, %v4043_v24 }
 0xe0e   :  { %10015 = vmatmul.mubr.msk.f32.gmra.mxu1 %vm40_vm1, %v4044_v29  ;;  %v4219_v19 = vpop.permute.xlu0 %4218 }
 0xe0f   :  { %10017 = vmatprep.mubr.msk.f32.mxu1 %vm40_vm1, %v4045_v17 }
 0xe10   :  { %v4224_v33 = vpop.permute.xlu1 %4223 }
 0xe12   :  { %10018 = vmatmul.mubr.msk.f32.gmra.mxu1 %vm40_vm1, %v4046_v18  ;;  %v4275_v51 = vpop.permute.xlu0 %4274 }
 0xe13   :  { %10052 = vmatprep.mubr.msk.f32.mxu1 %vm40_vm1, %v4473_v54  ;;  %v4776_v54 = vld [vmem:[#allocation2 + $0x648] sm:$0xff] }
 0xe14   :  { %v4280_v50 = vpop.permute.xlu1 %4279 }
 0xe16   :  { %v4229_v35 = vpop.permute.xlu0 %4228 }
 0xe18   :  { %v4234_v7 = vpop.permute.xlu1 %4233 }
 0xe1a   :  { %v4285_v38 = vpop.permute.xlu0 %4284 }
 0xe1c   :  { %v4290_v45 = vpop.permute.xlu1 %4289 }
 0xe1e   :  { %v4239_v41 = vpop.permute.xlu0 %4238 }
 0xe20   :  { %v4244_v63 = vpop.permute.xlu1 %4243 }
 0xe22   :  { %v4295_v53 = vpop.permute.xlu0 %4294 }
 0xe24   :  { %v4300_v43 = vpop.permute.xlu1 %4299 }
 0xe43   :  { %v9982_v36 = vpop.f32.mrf.mxu0 }
 0xe45   :  { %v4000_v60 = vpop.f32.mrf.mxu0 }
 0xe47   :  { %v9985_v5 = vpop.f32.mrf.mxu0 }
 0xe49   :  { %v4010_v62 = vpop.f32.mrf.mxu0 }
 0xe4b   :  { %v9988_v16 = vpop.f32.mrf.mxu0 }
 0xe4d   :  { %v4020_v28 = vpop.f32.mrf.mxu0 }
 0xe4f   :  { %v9991_v15 = vpop.f32.mrf.mxu0 }
 0xeb6   :  { %v9954_v31 = vpop.f32.mrf.mxu1 }
 0xeb7   :  { %v4006_v49 = vadd.f32 %v9982_v36, %v9954_v31  ;;  %v4254_v36 = vpop.permute.xlu1 %4253 }
 0xeb8   :  { %v3871_v40 = vpop.f32.mrf.mxu1 }
 0xeb9   :  { %v4001_v4 = vadd.f32 %v4000_v60, %v3871_v40 }
 0xeba   :  { %v9957_v58 = vpop.f32.mrf.mxu1 }
 0xebb   :  { %v4016_v47 = vadd.f32 %v9985_v5, %v9957_v58  ;;  %v4030_v58 = vpop.f32.mrf.mxu0 }
 0xebc   :  { %v3881_v26 = vpop.f32.mrf.mxu1 }
 0xebd   :  { %v4011_v10 = vadd.f32 %v4010_v62, %v3881_v26 }
 0xebe   :  { %v9960_v25 = vpop.f32.mrf.mxu1 }
 0xebf   :  { %v4026_v29 = vadd.f32 %v9988_v16, %v9960_v25 }
 0xec0   :  { %v3891_v59 = vpop.f32.mrf.mxu1 }
 0xec1   :  { %v4021_v31 = vadd.f32 %v4020_v28, %v3891_v59 }
 0xec2   :  { %v9963_v37 = vpop.f32.mrf.mxu1 }
 0xec3   :  { %v4036_v26 = vadd.f32 %v9991_v15, %v9963_v37  ;;  %v4469_v15 = vld [vmem:[#allocation2 + $0x5c0] sm:$0xff] }
 0xec4   :  { %v3901_v1 = vpop.f32.mrf.mxu1 }
 0xec6   :  { %v10010_v2 = vpop.f32.mrf.mxu1 }
 0xec7   :  { %v4201_v6 = vadd.f32 %v10010_v2, %v4006_v49 }
 0xec8   :  { %v4161_v46 = vpop.f32.mrf.mxu1 }
 0xec9   :  { %v4257_v8 = vmul.f32 %v4224_v33, %v4201_v6  ;;  %v4200_v9 = vadd.f32 %v4161_v46, %v4001_v4 }
 0xeca   :  { %v10013_v61 = vpop.f32.mrf.mxu1 }
 0xecb   :  { %v4313_v11 = vadd.f32 %v4280_v50, %v4257_v8  ;;  %v4256_v12 = vmul.f32 %v4219_v19, %v4200_v9  ;;  %v4203_v13 = vadd.f32 %v10013_v61, %v4016_v47 }
 0xecc   :  { %v4171_v3 = vpop.f32.mrf.mxu1 }
 0xecd   :  { %v4312_v20 = vadd.f32 %v4275_v51, %v4256_v12  ;;  %v4259_v22 = vmul.f32 %v4234_v7, %v4203_v13  ;;  %v4202_v24 = vadd.f32 %v4171_v3, %v4011_v10  ;;  %v4321_v17 = vmax.f32 %v4313_v11, 0.0  ;;  %v4249_v7 = vpop.permute.xlu0 %4248  ;;  %v4467_v11 = vld [vmem:[#allocation2 + $0x5b0] sm:$0xff]  ;;  %v4468_v12 = vld [vmem:[#allocation2 + $0x5b8] sm:$0xff] }
 0xece   :  { %v10016_v18 = vpop.f32.mrf.mxu1  ;;  %v10629_v13 = vld [vmem:[#allocation2 + $0x318] sm:$0x3f]  ;;  %v10630_v3 = vld [vmem:[#allocation2 + $0x310] sm:$0xff] }
 0xecf   :  { %v4320_v40 = vmax.f32 %v4312_v20, 0.0  ;;  %v4315_v60 = vadd.f32 %v4290_v45, %v4259_v22  ;;  %v4258_v33 = vmul.f32 %v4229_v35, %v4202_v24  ;;  %v4205_v5 = vadd.f32 %v10016_v18, %v4026_v29  ;;  %v4470_v20 = vld [vmem:[#allocation2 + $0x5c8] sm:$0xff]  ;;  %v4471_v22 = vld [vmem:[#allocation2 + $0x5d0] sm:$0xff]  ;;  %v4472_v24 = vld [vmem:[#allocation2 + $0x5d8] sm:$0xff] }
 0xed0   :  { %v4181_v49 = vpop.f32.mrf.mxu1  ;;  %v11231_v25 = vadd.f32 %v4321_v17, %v2868_v14  ;;  %v4031_v45 = vadd.f32 %v4030_v58, %v3901_v1  ;;  %v4940_v29 = vld [vmem:[#allocation2 + $0x660] sm:$0xff]  ;;  %v4941_v17 = vld [vmem:[#allocation2 + $0x668] sm:$0xff] }
 0xed1   :  { %v11227_v19 = vadd.f32 %v4320_v40, %v2867_v32  ;;  %v4314_v50 = vadd.f32 %v4285_v38, %v4258_v33  ;;  %v4204_v51 = vadd.f32 %v4181_v49, %v4021_v31  ;;  %v4323_v62 = vmax.f32 %v4315_v60, 0.0  ;;  %v4996_v18 = vld [vmem:[#allocation2 + $0x6a0] sm:$0xff]  ;;  %v4942_v31 = vld [vmem:[#allocation2 + $0x670] sm:$0xff]  ;;  %v4943_v40 = vld [vmem:[#allocation2 + $0x678] sm:$0xff] }
 0xed2   :  { %v4261_v59 = vmul.f32 %v4244_v63, %v4205_v5  ;;  %v10019_v16 = vpop.f32.mrf.mxu1  ;;  %v4310_v63 = vpop.permute.xlu1 %4309  ;;  %v4998_v60 = vld [vmem:[#allocation2 + $0x6b0] sm:$0xff]  ;;  %v4999_v33 = vld [vmem:[#allocation2 + $0x6b8] sm:$0xff]  ;;  %v4944_v58 = vld [vmem:[#allocation2 + $0x680] sm:$0xff] }
 0xed3   :  { %v4322_v35 = vmax.f32 %v4314_v50, 0.0  ;;  %v4260_v2 = vmul.f32 %v4239_v41, %v4204_v51  ;;  %v4207_v4 = vadd.f32 %v10019_v16, %v4036_v26  ;;  %10024 = vmatprep.mubr.msk.f32.mxu0 %vm2248_vm10, %v11227_v19  ;;  %v11243_v1 = vadd.f32 %v4323_v62, %v2870_v42  ;;  %v4945_v5 = vld [vmem:[#allocation2 + $0x688] sm:$0xff]  ;;  %v5000_v49 = vld [vmem:[#allocation2 + $0x6c0] sm:$0xff]  ;;  %v4946_v50 = vld [vmem:[#allocation2 + $0x690] sm:$0xff] }
 0xed4   :  { %v4317_v27 = vadd.f32 %v4300_v43, %v4261_v59  ;;  %v4191_v32 = vpop.f32.mrf.mxu1  ;;  %10025 = vmatmul.mubr.msk.f32.vlgmr.msra.gmra.mxu0 %vm2248_vm10, %v11231_v25  ;;  %v4305_v43 = vpop.permute.xlu0 %4304  ;;  %v5001_v26 = vld [vmem:[#allocation2 + $0x6c8] sm:$0xff]  ;;  %v4947_v51 = vld [vmem:[#allocation2 + $0x698] sm:$0xff] }
 0xed5   :  { %v11239_v23 = vadd.f32 %v4322_v35, %v2869_v21  ;;  %v4316_v14 = vadd.f32 %v4295_v53, %v4260_v2  ;;  %v4263_v38 = vmul.f32 %v4254_v36, %v4207_v4  ;;  %v4206_v37 = vadd.f32 %v4191_v32, %v4031_v45  ;;  %v4997_v36 = vld [vmem:[#allocation2 + $0x6a8] sm:$0xff]  ;;  %v5003_v62 = vld [vmem:[#allocation2 + $0x6d8] sm:$0xff] }
 0xed6   :  { %v4325_v41 = vmax.f32 %v4317_v27, 0.0 }
 0xed7   :  { %v4324_v6 = vmax.f32 %v4316_v14, 0.0  ;;  %v4319_v28 = vadd.f32 %v4310_v63, %v4263_v38  ;;  %v4262_v46 = vmul.f32 %v4249_v7, %v4206_v37  ;;  %10027 = vmatprep.mubr.msk.f32.mxu0 %vm2248_vm10, %v11239_v23  ;;  %v5002_v7 = vld [vmem:[#allocation2 + $0x6d0] sm:$0xff]  ;;  %v4474_v14 = vld [vmem:[#allocation2 + $0x5e8] sm:$0xff] }
 0xed8   :  { %10028 = vmatmul.mubr.msk.f32.gmra.mxu0 %vm2248_vm10, %v11243_v1  ;;  %v11255_v34 = vadd.f32 %v4325_v41, %v2872_v52  ;;  %v4475_v38 = vld [vmem:[#allocation2 + $0x5f0] sm:$0xff]  ;;  %v4476_v41 = vld [vmem:[#allocation2 + $0x5f8] sm:$0xff] }
 0xed9   :  { %v11251_v39 = vadd.f32 %v4324_v6, %v2871_v30  ;;  %v4318_v21 = vadd.f32 %v4305_v43, %v4262_v46  ;;  %v4327_v42 = vmax.f32 %v4319_v28, 0.0  ;;  %v4477_v6 = vld [vmem:[#allocation2 + $0x600] sm:$0xff]  ;;  %v4478_v43 = vld [vmem:[#allocation2 + $0x608] sm:$0xff] }
 0xedb   :  { %v4326_v47 = vmax.f32 %v4318_v21, 0.0  ;;  %10030 = vmatprep.mubr.msk.f32.mxu0 %vm2248_vm10, %v11251_v39  ;;  %v11267_v48 = vadd.f32 %v4327_v42, %v2874_v57  ;;  %v4466_v57 = vld [vmem:[#allocation2 + $0x5a8] sm:$0xff]  ;;  %v4479_v21 = vld [vmem:[#allocation2 + $0x610] sm:$0xff] }
 0xedc   :  { %10031 = vmatmul.mubr.msk.f32.gmra.mxu0 %vm2248_vm10, %v11255_v34 }
 0xedd   :  { %v11263_v8 = vadd.f32 %v4326_v47, %v2873_v56  ;;  %v4465_v56 = vld [vmem:[#allocation2 + $0x5a0] sm:$0xff] }
 0xedf   :  { %10033 = vmatprep.mubr.msk.f32.mxu0 %vm2248_vm10, %v11263_v8 }
 0xee0   :  { %10034 = vmatmul.mubr.msk.f32.gmra.mxu0 %vm2248_vm10, %v11267_v48 }
 0xee1   :  { %10080 = vmatprep.mubr.msk.f32.mxu0 %vm40_vm1, %v4465_v56  ;;  %v4777_v56 = vld [vmem:[#allocation2 + $0x650] sm:$0xff] }
 0xf94   :  { %v10026_v44 = vpop.f32.mrf.mxu0 }
 0xf96   :  { %v4426_v30 = vpop.f32.mrf.mxu0 }
 0xf98   :  { %v10029_v52 = vpop.f32.mrf.mxu0 }
 0xf9a   :  { %v4436_v9 = vpop.f32.mrf.mxu0 }
 0xf9c   :  { %v10032_v61 = vpop.f32.mrf.mxu0 }
 0xf9e   :  { %v4446_v53 = vpop.f32.mrf.mxu0 }
 0xfa0   :  { %v10035_v10 = vpop.f32.mrf.mxu0 }
 0xfa1   :  { %4503 = vrot.lane.b32.xlu0 %v10035_v10, %s10681_s0  ;;  %10064 = vmatprep.subr.mxu0 %v10035_v10 }
 0xfa2   :  { %v4456_v55 = vpop.f32.mrf.mxu0  ;;  %10065 = vmatpush3.msra.mxu0 %v10035_v10 }
 0xfa3   :  { %4501 = vrot.lane.b32.xlu1 %v4456_v55, %s10681_s0  ;;  %10066 = vmatprep.subr.mxu0 %v4456_v55 }
 0xfa4   :  { %10067 = vmatpush3.msra.mxu0 %v4456_v55 }
 0xfa5   :  { %4499 = vrot.lane.b32.xlu0 %v10032_v61, %s10681_s0  ;;  %10068 = vmatprep.subr.mxu0 %v10032_v61 }
 0xfa6   :  { %10069 = vmatpush3.msra.mxu0 %v10032_v61 }
 0xfa7   :  { %4497 = vrot.lane.b32.xlu1 %v4446_v53, %s10681_s0  ;;  %10070 = vmatprep.subr.mxu0 %v4446_v53 }
 0xfa8   :  { %10071 = vmatpush3.msra.mxu0 %v4446_v53 }
 0xfa9   :  { %4495 = vrot.lane.b32.xlu0 %v10029_v52, %s10681_s0  ;;  %10072 = vmatprep.subr.mxu0 %v10029_v52 }
 0xfaa   :  { %10073 = vmatpush3.msra.mxu0 %v10029_v52 }
 0xfab   :  { %4493 = vrot.lane.b32.xlu1 %v4436_v9, %s10681_s0  ;;  %10074 = vmatprep.subr.mxu0 %v4436_v9 }
 0xfac   :  { %10075 = vmatpush3.msra.mxu0 %v4436_v9 }
 0xfad   :  { %4491 = vrot.lane.b32.xlu0 %v10026_v44, %s10681_s0  ;;  %10076 = vmatprep.subr.mxu0 %v10026_v44 }
 0xfae   :  { %10077 = vmatpush3.msra.mxu0 %v10026_v44 }
 0xfaf   :  { %4489 = vrot.lane.b32.xlu1 %v4426_v30, %s10681_s0  ;;  %10078 = vmatprep.subr.mxu0 %v4426_v30 }
 0xfb0   :  { %10079 = vmatpush3.msra.mxu0 %v4426_v30 }
 0xfb1   :  { %4793 = vrot.lane.b32.xlu0 %v10035_v10, %s10682_s1  ;;  %10081 = vmatmul.mubr.msk.f32.vlgmr.msra.gmra.mxu0 %vm40_vm1, %v4466_v57  ;;  %v4774_v10 = vld [vmem:[#allocation2 + $0x638] sm:$0xff] }
 0xfb2   :  { %10083 = vmatprep.mubr.msk.f32.mxu0 %vm40_vm1, %v4467_v11  ;;  %10120 = vmatprep.subr.msk.mxu0 %vm315_vm2, %v10629_v13  ;;  %v4778_v57 = vld [vmem:[#allocation2 + $0x658] sm:$0xff] }
 0xfb3   :  { %4791 = vrot.lane.b32.xlu1 %v4456_v55, %s10682_s1  ;;  %10121 = vmatpush3.msk.msra.mxu0 %vm315_vm2, %v10629_v13  ;;  %v4775_v55 = vld [vmem:[#allocation2 + $0x640] sm:$0xff] }
 0xfb4   :  { %10122 = vmatprep.subr.mxu0 %v10630_v3 }
 0xfb5   :  { %4789 = vrot.lane.b32.xlu0 %v10032_v61, %s10682_s1  ;;  %10084 = vmatmul.mubr.msk.f32.gmra.mxu0 %vm40_vm1, %v4468_v12  ;;  %v4772_v61 = vld [vmem:[#allocation2 + $0x628] sm:$0xff] }
 0xfb6   :  { %10086 = vmatprep.mubr.msk.f32.mxu0 %vm40_vm1, %v4469_v15  ;;  %10123 = vmatpush3.msra.mxu0 %v10630_v3 }
 0xfb7   :  { %4787 = vrot.lane.b32.xlu1 %v4446_v53, %s10682_s1  ;;  %v4773_v53 = vld [vmem:[#allocation2 + $0x630] sm:$0xff] }
 0xfb9   :  { %4785 = vrot.lane.b32.xlu0 %v10029_v52, %s10682_s1  ;;  %10087 = vmatmul.mubr.msk.f32.gmra.mxu0 %vm40_vm1, %v4470_v20 }
 0xfba   :  { %10089 = vmatprep.mubr.msk.f32.mxu0 %vm40_vm1, %v4471_v22 }
 0xfbb   :  { %4783 = vrot.lane.b32.xlu1 %v4436_v9, %s10682_s1 }
 0xfbd   :  { %4781 = vrot.lane.b32.xlu0 %v10026_v44, %s10682_s1  ;;  %10090 = vmatmul.mubr.msk.f32.gmra.mxu0 %vm40_vm1, %v4472_v24  ;;  %v4480_v44 = vld [vmem:[#allocation2 + $0x618] sm:$0xff] }
 0xfbf   :  { %4779 = vrot.lane.b32.xlu1 %v4426_v30, %s10682_s1  ;;  %v4771_v30 = vld [vmem:[#allocation2 + $0x620] sm:$0xff] }
 0xfc1   :  { %4950 = vperm.xlu0 %10585, %v4940_v29  }
 0xfc3   :  { %4955 = vperm.xlu1 %10586, %v4941_v17  }
 0xfc5   :  { %5006 = vperm.xlu0 %10585, %v4996_v18  }
 0xfc7   :  { %5011 = vperm.xlu1 %10586, %v4997_v36  }
 0xfc9   :  { %4960 = vperm.xlu0 %10585, %v4942_v31  }
 0xfcb   :  { %4965 = vperm.xlu1 %10586, %v4943_v40  }
 0xfcd   :  { %5016 = vperm.xlu0 %10585, %v4998_v60  }
 0xfcf   :  { %5021 = vperm.xlu1 %10586, %v4999_v33  }
 0xfd1   :  { %4970 = vperm.xlu0 %10585, %v4944_v58  }
 0xfd3   :  { %4975 = vperm.xlu1 %10586, %v4945_v5  }
 0xfd5   :  { %5026 = vperm.xlu0 %10585, %v5000_v49  }
 0xfd7   :  { %5031 = vperm.xlu1 %10586, %v5001_v26  }
 0xfd9   :  { %4980 = vperm.xlu0 %10585, %v4946_v50  }
 0xfdb   :  { %4985 = vperm.xlu1 %10586, %v4947_v51  }
 0xfdd   :  { %5036 = vperm.xlu0 %10585, %v5002_v7  }
 0xfdf   :  { %5041 = vperm.xlu1 %10586, %v5003_v62  }
0x1013   :  { %v4504_v59 = vpop.permute.xlu0 %4503 }
0x1014   :  { %10036 = vmatprep.subr.mxu1 %v4504_v59 }
0x1015   :  { %10037 = vmatpush3.msra.mxu1 %v4504_v59  ;;  %v4502_v16 = vpop.permute.xlu1 %4501 }
0x1016   :  { %10038 = vmatprep.subr.mxu1 %v4502_v16 }
0x1017   :  { %v4500_v45 = vpop.permute.xlu0 %4499  ;;  %10039 = vmatpush3.msra.mxu1 %v4502_v16 }
0x1018   :  { %10040 = vmatprep.subr.mxu1 %v4500_v45 }
0x1019   :  { %10041 = vmatpush3.msra.mxu1 %v4500_v45  ;;  %v4498_v35 = vpop.permute.xlu1 %4497 }
0x101a   :  { %10042 = vmatprep.subr.mxu1 %v4498_v35 }
0x101b   :  { %v4496_v2 = vpop.permute.xlu0 %4495  ;;  %10043 = vmatpush3.msra.mxu1 %v4498_v35 }
0x101c   :  { %10044 = vmatprep.subr.mxu1 %v4496_v2 }
0x101d   :  { %10045 = vmatpush3.msra.mxu1 %v4496_v2  ;;  %v4494_v4 = vpop.permute.xlu1 %4493 }
0x101e   :  { %10046 = vmatprep.subr.mxu1 %v4494_v4 }
0x101f   :  { %v4492_v27 = vpop.permute.xlu0 %4491  ;;  %10047 = vmatpush3.msra.mxu1 %v4494_v4 }
0x1020   :  { %10048 = vmatprep.subr.mxu1 %v4492_v27 }
0x1021   :  { %10049 = vmatpush3.msra.mxu1 %v4492_v27  ;;  %v4490_v32 = vpop.permute.xlu1 %4489 }
0x1022   :  { %10050 = vmatprep.subr.mxu1 %v4490_v32 }
0x1023   :  { %v4794_v37 = vpop.permute.xlu0 %4793  ;;  %10051 = vmatpush3.msra.mxu1 %v4490_v32 }
0x1024   :  { %10053 = vmatmul.mubr.msk.f32.vlgmr.msra.gmra.mxu1 %vm40_vm1, %v4474_v14  ;;  %10092 = vmatprep.subr.mxu1 %v4794_v37 }
0x1025   :  { %10093 = vmatpush3.msra.mxu1 %v4794_v37  ;;  %v4792_v63 = vpop.permute.xlu1 %4791  ;;  %10055 = vmatprep.mubr.msk.f32.mxu1 %vm40_vm1, %v4475_v38 }
0x1026   :  { %10094 = vmatprep.subr.mxu1 %v4792_v63 }
0x1027   :  { %v4790_v28 = vpop.permute.xlu0 %4789  ;;  %10095 = vmatpush3.msra.mxu1 %v4792_v63 }
0x1028   :  { %10056 = vmatmul.mubr.msk.f32.gmra.mxu1 %vm40_vm1, %v4476_v41  ;;  %10096 = vmatprep.subr.mxu1 %v4790_v28 }
0x1029   :  { %10097 = vmatpush3.msra.mxu1 %v4790_v28  ;;  %v4788_v46 = vpop.permute.xlu1 %4787  ;;  %10058 = vmatprep.mubr.msk.f32.mxu1 %vm40_vm1, %v4477_v6 }
0x102a   :  { %10098 = vmatprep.subr.mxu1 %v4788_v46 }
0x102b   :  { %v4786_v42 = vpop.permute.xlu0 %4785  ;;  %10099 = vmatpush3.msra.mxu1 %v4788_v46 }
0x102c   :  { %10059 = vmatmul.mubr.msk.f32.gmra.mxu1 %vm40_vm1, %v4478_v43  ;;  %10100 = vmatprep.subr.mxu1 %v4786_v42 }
0x102d   :  { %10101 = vmatpush3.msra.mxu1 %v4786_v42  ;;  %v4784_v47 = vpop.permute.xlu1 %4783  ;;  %10061 = vmatprep.mubr.msk.f32.mxu1 %vm40_vm1, %v4479_v21 }
0x102e   :  { %10102 = vmatprep.subr.mxu1 %v4784_v47 }
0x102f   :  { %v4782_v52 = vpop.permute.xlu0 %4781  ;;  %10103 = vmatpush3.msra.mxu1 %v4784_v47 }
0x1030   :  { %10062 = vmatmul.mubr.msk.f32.gmra.mxu1 %vm40_vm1, %v4480_v44  ;;  %10104 = vmatprep.subr.mxu1 %v4782_v52 }
0x1031   :  { %10105 = vmatpush3.msra.mxu1 %v4782_v52  ;;  %v4780_v9 = vpop.permute.xlu1 %4779  ;;  %10108 = vmatprep.mubr.msk.f32.mxu1 %vm40_vm1, %v4771_v30 }
0x1032   :  { %10106 = vmatprep.subr.mxu1 %v4780_v9 }
0x1033   :  { %10107 = vmatpush3.msra.mxu1 %v4780_v9 }
0x1034   :  { %10109 = vmatmul.mubr.msk.f32.vlgmr.msra.gmra.mxu1 %vm40_vm1, %v4772_v61 }
0x1035   :  { %10111 = vmatprep.mubr.msk.f32.mxu1 %vm40_vm1, %v4773_v53 }
0x1038   :  { %10112 = vmatmul.mubr.msk.f32.gmra.mxu1 %vm40_vm1, %v4774_v10 }
0x1039   :  { %10114 = vmatprep.mubr.msk.f32.mxu1 %vm40_vm1, %v4775_v55 }
0x103c   :  { %10115 = vmatmul.mubr.msk.f32.gmra.mxu1 %vm40_vm1, %v4776_v54  ;;  %v4951_v11 = vpop.permute.xlu0 %4950 }
0x103d   :  { %10117 = vmatprep.mubr.msk.f32.mxu1 %vm40_vm1, %v4777_v56 }
0x103e   :  { %v4956_v12 = vpop.permute.xlu1 %4955 }
0x1040   :  { %10118 = vmatmul.mubr.msk.f32.gmra.mxu1 %vm40_vm1, %v4778_v57  ;;  %v5007_v13 = vpop.permute.xlu0 %5006 }
0x1042   :  { %v5012_v15 = vpop.permute.xlu1 %5011 }
0x1044   :  { %v4961_v29 = vpop.permute.xlu0 %4960 }
0x1046   :  { %v4966_v17 = vpop.permute.xlu1 %4965 }
0x1048   :  { %v5017_v60 = vpop.permute.xlu0 %5016 }
0x104a   :  { %v5022_v33 = vpop.permute.xlu1 %5021 }
0x104c   :  { %v4971_v51 = vpop.permute.xlu0 %4970 }
0x104e   :  { %v4976_v7 = vpop.permute.xlu1 %4975 }
0x1050   :  { %v5027_v38 = vpop.permute.xlu0 %5026 }
0x1052   :  { %v5032_v37 = vpop.permute.xlu1 %5031 }
0x1056   :  { %v4986_v57 = vpop.permute.xlu1 %4985 }
0x1071   :  { %v10082_v3 = vpop.f32.mrf.mxu0 }
0x1073   :  { %v4732_v24 = vpop.f32.mrf.mxu0 }
0x1075   :  { %v10085_v31 = vpop.f32.mrf.mxu0 }
0x1077   :  { %v4742_v5 = vpop.f32.mrf.mxu0 }
0x1079   :  { %v10088_v50 = vpop.f32.mrf.mxu0 }
0x107b   :  { %v4752_v35 = vpop.f32.mrf.mxu0 }
0x107d   :  { %v10091_v46 = vpop.f32.mrf.mxu0 }
0x107f   :  { %v4762_v55 = vpop.f32.mrf.mxu0 }
0x10e4   :  { %v10054_v20 = vpop.f32.mrf.mxu1 }
0x10e5   :  { %v4738_v62 = vadd.f32 %v10082_v3, %v10054_v20  ;;  %v4981_v20 = vpop.permute.xlu0 %4980 }
0x10e6   :  { %v4603_v22 = vpop.f32.mrf.mxu1 }
0x10e7   :  { %v4733_v16 = vadd.f32 %v4732_v24, %v4603_v22 }
0x10e8   :  { %v10057_v18 = vpop.f32.mrf.mxu1 }
0x10e9   :  { %v4748_v4 = vadd.f32 %v10085_v31, %v10057_v18 }
0x10ea   :  { %v4613_v36 = vpop.f32.mrf.mxu1 }
0x10eb   :  { %v4743_v63 = vadd.f32 %v4742_v5, %v4613_v36 }
0x10ec   :  { %v10060_v40 = vpop.f32.mrf.mxu1 }
0x10ed   :  { %v4758_v21 = vadd.f32 %v10088_v50, %v10060_v40  ;;  %v5037_v50 = vpop.permute.xlu0 %5036 }
0x10ee   :  { %v4623_v58 = vpop.f32.mrf.mxu1 }
0x10ef   :  { %v4753_v52 = vadd.f32 %v4752_v35, %v4623_v58 }
0x10f0   :  { %v10063_v49 = vpop.f32.mrf.mxu1 }
0x10f2   :  { %v4633_v26 = vpop.f32.mrf.mxu1 }
0x10f3   :  { %v4763_v22 = vadd.f32 %v4762_v55, %v4633_v26  ;;  %v5669_v55 = vld [vmem:[#allocation2 + $0x7c8] sm:$0xff] }
0x10f4   :  { %v10110_v59 = vpop.f32.mrf.mxu1 }
0x10f5   :  { %v4933_v45 = vadd.f32 %v10110_v59, %v4738_v62 }
0x10f6   :  { %v4893_v2 = vpop.f32.mrf.mxu1 }
0x10f7   :  { %v4989_v27 = vmul.f32 %v4956_v12, %v4933_v45  ;;  %v4932_v32 = vadd.f32 %v4893_v2, %v4733_v16  ;;  %v4768_v12 = vadd.f32 %v10091_v46, %v10063_v49  ;;  %v5194_v46 = vld [vmem:[#allocation2 + $0x708] sm:$0xff] }
0x10f8   :  { %v10113_v14 = vpop.f32.mrf.mxu1 }
0x10f9   :  { %v4988_v41 = vmul.f32 %v4951_v11, %v4932_v32  ;;  %v4935_v6 = vadd.f32 %v10113_v14, %v4748_v4  ;;  %v5045_v28 = vadd.f32 %v5012_v15, %v4989_v27 }
0x10fa   :  { %v4903_v43 = vpop.f32.mrf.mxu1 }
0x10fb   :  { %v5044_v42 = vadd.f32 %v5007_v13, %v4988_v41  ;;  %v4991_v47 = vmul.f32 %v4966_v17, %v4935_v6  ;;  %v4934_v44 = vadd.f32 %v4903_v43, %v4743_v63  ;;  %v5053_v10 = vmax.f32 %v5045_v28, 0.0  ;;  %v5190_v63 = vld [vmem:[#allocation2 + $0x6e8] sm:$0xff]  ;;  %v5191_v41 = vld [vmem:[#allocation2 + $0x6f0] sm:$0xff]  ;;  %v5192_v6 = vld [vmem:[#allocation2 + $0x6f8] sm:$0xff] }
0x10fc   :  { %v10116_v30 = vpop.f32.mrf.mxu1  ;;  %v5193_v28 = vld [vmem:[#allocation2 + $0x700] sm:$0xff]  ;;  %v5195_v43 = vld [vmem:[#allocation2 + $0x710] sm:$0xff] }
0x10fd   :  { %v5052_v9 = vmax.f32 %v5044_v42, 0.0  ;;  %v4990_v61 = vmul.f32 %v4961_v29, %v4934_v44  ;;  %v4937_v53 = vadd.f32 %v10116_v30, %v4758_v21  ;;  %v5047_v54 = vadd.f32 %v5022_v33, %v4991_v47  ;;  %v5196_v21 = vld [vmem:[#allocation2 + $0x718] sm:$0xff]  ;;  %v5664_v42 = vld [vmem:[#allocation2 + $0x7a0] sm:$0xff]  ;;  %v5665_v47 = vld [vmem:[#allocation2 + $0x7a8] sm:$0xff] }
0x10fe   :  { %v4913_v56 = vpop.f32.mrf.mxu1  ;;  %v5720_v44 = vld [vmem:[#allocation2 + $0x7e0] sm:$0xff]  ;;  %v5721_v30 = vld [vmem:[#allocation2 + $0x7e8] sm:$0xff] }
0x10ff   :  { %v5046_v11 = vadd.f32 %v5017_v60, %v4990_v61  ;;  %v4993_v3 = vmul.f32 %v4976_v7, %v4937_v53  ;;  %v4936_v15 = vadd.f32 %v4913_v56, %v4753_v52  ;;  %10124 = vmatprep.mubr.msk.f32.mxu0 %vm2248_vm10, %v5052_v9  ;;  %v5055_v18 = vmax.f32 %v5047_v54, 0.0  ;;  %v5042_v60 = vpop.permute.xlu1 %5041  ;;  %v5666_v52 = vld [vmem:[#allocation2 + $0x7b0] sm:$0xff]  ;;  %v5667_v9 = vld [vmem:[#allocation2 + $0x7b8] sm:$0xff]  ;;  %v5724_v54 = vld [vmem:[#allocation2 + $0x800] sm:$0xff] }
0x1100   :  { %v10119_v13 = vpop.f32.mrf.mxu1  ;;  %10125 = vmatmul.mubr.msk.f32.vlgmr.msra.gmra.mxu0 %vm2248_vm10, %v5053_v10  ;;  %v5722_v61 = vld [vmem:[#allocation2 + $0x7f0] sm:$0xff]  ;;  %v5723_v53 = vld [vmem:[#allocation2 + $0x7f8] sm:$0xff]  ;;  %v5668_v10 = vld [vmem:[#allocation2 + $0x7c0] sm:$0xff] }
0x1101   :  { %v5054_v24 = vmax.f32 %v5046_v11, 0.0  ;;  %v4992_v17 = vmul.f32 %v4971_v51, %v4936_v15  ;;  %v4939_v29 = vadd.f32 %v10119_v13, %v4768_v12  ;;  %v5049_v36 = vadd.f32 %v5032_v37, %v4993_v3  ;;  %v5189_v37 = vld [vmem:[#allocation2 + $0x6e0] sm:$0xff]  ;;  %v5725_v56 = vld [vmem:[#allocation2 + $0x808] sm:$0xff]  ;;  %v5671_v12 = vld [vmem:[#allocation2 + $0x7d8] sm:$0xff] }
0x1102   :  { %v4923_v31 = vpop.f32.mrf.mxu1  ;;  %v5726_v11 = vld [vmem:[#allocation2 + $0x810] sm:$0xff]  ;;  %v5727_v3 = vld [vmem:[#allocation2 + $0x818] sm:$0xff] }
0x1103   :  { %v5048_v40 = vadd.f32 %v5027_v38, %v4992_v17  ;;  %v4995_v33 = vmul.f32 %v4986_v57, %v4939_v29  ;;  %v4938_v58 = vadd.f32 %v4923_v31, %v4763_v22  ;;  %10127 = vmatprep.mubr.msk.f32.mxu0 %vm2248_vm10, %v5054_v24  ;;  %v5057_v7 = vmax.f32 %v5049_v36, 0.0  ;;  %v5197_v38 = vld [vmem:[#allocation2 + $0x720] sm:$0xff]  ;;  %v5670_v57 = vld [vmem:[#allocation2 + $0x7d0] sm:$0xff]  ;;  %v5198_v36 = vld [vmem:[#allocation2 + $0x728] sm:$0xff] }
0x1104   :  { %10128 = vmatmul.mubr.msk.f32.gmra.mxu0 %vm2248_vm10, %v5055_v18  ;;  %10152 = vmatprep.mubr.msk.f32.mxu1 %vm40_vm1, %v5197_v38  ;;  %v5199_v31 = vld [vmem:[#allocation2 + $0x730] sm:$0xff]  ;;  %v5502_v38 = vld [vmem:[#allocation2 + $0x798] sm:$0xff] }
0x1105   :  { %v5056_v5 = vmax.f32 %v5048_v40, 0.0  ;;  %v4994_v49 = vmul.f32 %v4981_v20, %v4938_v58  ;;  %v5051_v62 = vadd.f32 %v5042_v60, %v4995_v33  ;;  %v5200_v58 = vld [vmem:[#allocation2 + $0x738] sm:$0xff]  ;;  %v5201_v60 = vld [vmem:[#allocation2 + $0x740] sm:$0xff] }
0x1107   :  { %v5050_v26 = vadd.f32 %v5037_v50, %v4994_v49  ;;  %10130 = vmatprep.mubr.msk.f32.mxu0 %vm2248_vm10, %v5056_v5  ;;  %v5059_v59 = vmax.f32 %v5051_v62, 0.0  ;;  %v5202_v50 = vld [vmem:[#allocation2 + $0x748] sm:$0xff] }
0x1108   :  { %10131 = vmatmul.mubr.msk.f32.gmra.mxu0 %vm2248_vm10, %v5057_v7  ;;  %v5203_v7 = vld [vmem:[#allocation2 + $0x750] sm:$0xff] }
0x1109   :  { %v5058_v51 = vmax.f32 %v5050_v26, 0.0 }
0x110b   :  { %10133 = vmatprep.mubr.msk.f32.mxu0 %vm2248_vm10, %v5058_v51  ;;  %v5204_v51 = vld [vmem:[#allocation2 + $0x758] sm:$0xff] }
0x110c   :  { %10134 = vmatmul.mubr.msk.f32.gmra.mxu0 %vm2248_vm10, %v5059_v59  ;;  %v5495_v59 = vld [vmem:[#allocation2 + $0x760] sm:$0xff] }
0x110d   :  { %10180 = vmatprep.mubr.msk.f32.mxu0 %vm40_vm1, %v5189_v37  ;;  %v5793_v37 = vld [vmem:[#allocation2 + $0x828] sm:$0x3f] }
0x11c0   :  { %v10126_v16 = vpop.f32.mrf.mxu0 }
0x11c2   :  { %v5150_v45 = vpop.f32.mrf.mxu0 }
0x11c4   :  { %v10129_v35 = vpop.f32.mrf.mxu0 }
0x11c6   :  { %v5160_v2 = vpop.f32.mrf.mxu0 }
0x11c8   :  { %v10132_v4 = vpop.f32.mrf.mxu0 }
0x11ca   :  { %v5170_v27 = vpop.f32.mrf.mxu0 }
0x11cc   :  { %v10135_v32 = vpop.f32.mrf.mxu0 }
0x11cd   :  { %5227 = vrot.lane.b32.xlu0 %v10135_v32, %s10681_s0  ;;  %10164 = vmatprep.subr.mxu0 %v10135_v32 }
0x11ce   :  { %v5180_v14 = vpop.f32.mrf.mxu0  ;;  %10165 = vmatpush3.msra.mxu0 %v10135_v32 }
0x11cf   :  { %5225 = vrot.lane.b32.xlu1 %v5180_v14, %s10681_s0  ;;  %10166 = vmatprep.subr.mxu0 %v5180_v14 }
0x11d0   :  { %10167 = vmatpush3.msra.mxu0 %v5180_v14 }
0x11d1   :  { %5223 = vrot.lane.b32.xlu0 %v10132_v4, %s10681_s0  ;;  %10168 = vmatprep.subr.mxu0 %v10132_v4 }
0x11d2   :  { %10169 = vmatpush3.msra.mxu0 %v10132_v4 }
0x11d3   :  { %5221 = vrot.lane.b32.xlu1 %v5170_v27, %s10681_s0  ;;  %10170 = vmatprep.subr.mxu0 %v5170_v27 }
0x11d4   :  { %10171 = vmatpush3.msra.mxu0 %v5170_v27 }
0x11d5   :  { %5219 = vrot.lane.b32.xlu0 %v10129_v35, %s10681_s0  ;;  %10172 = vmatprep.subr.mxu0 %v10129_v35 }
0x11d6   :  { %10173 = vmatpush3.msra.mxu0 %v10129_v35 }
0x11d7   :  { %5217 = vrot.lane.b32.xlu1 %v5160_v2, %s10681_s0  ;;  %10174 = vmatprep.subr.mxu0 %v5160_v2 }
0x11d8   :  { %10175 = vmatpush3.msra.mxu0 %v5160_v2 }
0x11d9   :  { %5215 = vrot.lane.b32.xlu0 %v10126_v16, %s10681_s0  ;;  %10176 = vmatprep.subr.mxu0 %v10126_v16 }
0x11da   :  { %10177 = vmatpush3.msra.mxu0 %v10126_v16 }
0x11db   :  { %5213 = vrot.lane.b32.xlu1 %v5150_v45, %s10681_s0  ;;  %10178 = vmatprep.subr.mxu0 %v5150_v45 }
0x11dc   :  { %10179 = vmatpush3.msra.mxu0 %v5150_v45 }
0x11dd   :  { %5517 = vrot.lane.b32.xlu0 %v10135_v32, %s10682_s1  ;;  %10181 = vmatmul.mubr.msk.f32.vlgmr.msra.gmra.mxu0 %vm40_vm1, %v5190_v63  ;;  %v5500_v32 = vld [vmem:[#allocation2 + $0x788] sm:$0xff]  ;;  %v5792_v63 = vld [vmem:[#allocation2 + $0x820] sm:$0xff] }
0x11de   :  { %10183 = vmatprep.mubr.msk.f32.mxu0 %vm40_vm1, %v5191_v41  ;;  %10220 = vmatprep.subr.msk.mxu0 %vm315_vm2, %v5793_v37 }
0x11df   :  { %5515 = vrot.lane.b32.xlu1 %v5180_v14, %s10682_s1  ;;  %v5501_v14 = vld [vmem:[#allocation2 + $0x790] sm:$0xff]  ;;  %10221 = vmatpush3.msk.msra.mxu0 %vm315_vm2, %v5793_v37 }
0x11e0   :  { %10222 = vmatprep.subr.mxu0 %v5792_v63 }
0x11e1   :  { %5513 = vrot.lane.b32.xlu0 %v10132_v4, %s10682_s1  ;;  %10184 = vmatmul.mubr.msk.f32.gmra.mxu0 %vm40_vm1, %v5192_v6  ;;  %v5498_v4 = vld [vmem:[#allocation2 + $0x778] sm:$0xff] }
0x11e2   :  { %10186 = vmatprep.mubr.msk.f32.mxu0 %vm40_vm1, %v5193_v28  ;;  %10223 = vmatpush3.msra.mxu0 %v5792_v63 }
0x11e3   :  { %5511 = vrot.lane.b32.xlu1 %v5170_v27, %s10682_s1  ;;  %v5499_v27 = vld [vmem:[#allocation2 + $0x780] sm:$0xff] }
0x11e5   :  { %5509 = vrot.lane.b32.xlu0 %v10129_v35, %s10682_s1  ;;  %10187 = vmatmul.mubr.msk.f32.gmra.mxu0 %vm40_vm1, %v5194_v46  ;;  %v5496_v35 = vld [vmem:[#allocation2 + $0x768] sm:$0xff] }
0x11e6   :  { %10189 = vmatprep.mubr.msk.f32.mxu0 %vm40_vm1, %v5195_v43 }
0x11e7   :  { %5507 = vrot.lane.b32.xlu1 %v5160_v2, %s10682_s1  ;;  %v5497_v2 = vld [vmem:[#allocation2 + $0x770] sm:$0xff] }
0x11e9   :  { %5505 = vrot.lane.b32.xlu0 %v10126_v16, %s10682_s1  ;;  %10190 = vmatmul.mubr.msk.f32.gmra.mxu0 %vm40_vm1, %v5196_v21 }
0x11eb   :  { %5503 = vrot.lane.b32.xlu1 %v5150_v45, %s10682_s1 }
0x11ed   :  { %5674 = vperm.xlu0 %10585, %v5664_v42  }
0x11ef   :  { %5679 = vperm.xlu1 %10586, %v5665_v47  }
0x11f1   :  { %5730 = vperm.xlu0 %10585, %v5720_v44  }
0x11f3   :  { %5735 = vperm.xlu1 %10586, %v5721_v30  }
0x11f5   :  { %5684 = vperm.xlu0 %10585, %v5666_v52  }
0x11f7   :  { %5689 = vperm.xlu1 %10586, %v5667_v9  }
0x11f9   :  { %5740 = vperm.xlu0 %10585, %v5722_v61  }
0x11fb   :  { %5745 = vperm.xlu1 %10586, %v5723_v53  }
0x11fd   :  { %5694 = vperm.xlu0 %10585, %v5668_v10  }
0x11ff   :  { %5699 = vperm.xlu1 %10586, %v5669_v55  }
0x1201   :  { %5750 = vperm.xlu0 %10585, %v5724_v54  }
0x1203   :  { %5755 = vperm.xlu1 %10586, %v5725_v56  }
0x1205   :  { %5704 = vperm.xlu0 %10585, %v5670_v57  }
0x1207   :  { %5709 = vperm.xlu1 %10586, %v5671_v12  }
0x1209   :  { %5760 = vperm.xlu0 %10585, %v5726_v11  }
0x120b   :  { %5765 = vperm.xlu1 %10586, %v5727_v3  }
0x123f   :  { %v5228_v15 = vpop.permute.xlu0 %5227 }
0x1240   :  { %10136 = vmatprep.subr.mxu1 %v5228_v15 }
0x1241   :  { %10137 = vmatpush3.msra.mxu1 %v5228_v15  ;;  %v5226_v20 = vpop.permute.xlu1 %5225 }
0x1242   :  { %10138 = vmatprep.subr.mxu1 %v5226_v20 }
0x1243   :  { %v5224_v13 = vpop.permute.xlu0 %5223  ;;  %10139 = vmatpush3.msra.mxu1 %v5226_v20 }
0x1244   :  { %10140 = vmatprep.subr.mxu1 %v5224_v13 }
0x1245   :  { %10141 = vmatpush3.msra.mxu1 %v5224_v13  ;;  %v5222_v22 = vpop.permute.xlu1 %5221 }
0x1246   :  { %10142 = vmatprep.subr.mxu1 %v5222_v22 }
0x1247   :  { %v5220_v24 = vpop.permute.xlu0 %5219  ;;  %10143 = vmatpush3.msra.mxu1 %v5222_v22 }
0x1248   :  { %10144 = vmatprep.subr.mxu1 %v5220_v24 }
0x1249   :  { %10145 = vmatpush3.msra.mxu1 %v5220_v24  ;;  %v5218_v17 = vpop.permute.xlu1 %5217 }
0x124a   :  { %10146 = vmatprep.subr.mxu1 %v5218_v17 }
0x124b   :  { %v5216_v29 = vpop.permute.xlu0 %5215  ;;  %10147 = vmatpush3.msra.mxu1 %v5218_v17 }
0x124c   :  { %10148 = vmatprep.subr.mxu1 %v5216_v29 }
0x124d   :  { %10149 = vmatpush3.msra.mxu1 %v5216_v29  ;;  %v5214_v18 = vpop.permute.xlu1 %5213 }
0x124e   :  { %10150 = vmatprep.subr.mxu1 %v5214_v18 }
0x124f   :  { %v5518_v40 = vpop.permute.xlu0 %5517  ;;  %10151 = vmatpush3.msra.mxu1 %v5214_v18 }
0x1250   :  { %10153 = vmatmul.mubr.msk.f32.vlgmr.msra.gmra.mxu1 %vm40_vm1, %v5198_v36  ;;  %10192 = vmatprep.subr.mxu1 %v5518_v40 }
0x1251   :  { %10193 = vmatpush3.msra.mxu1 %v5518_v40  ;;  %v5516_v33 = vpop.permute.xlu1 %5515  ;;  %10155 = vmatprep.mubr.msk.f32.mxu1 %vm40_vm1, %v5199_v31 }
0x1252   :  { %10194 = vmatprep.subr.mxu1 %v5516_v33 }
0x1253   :  { %v5514_v5 = vpop.permute.xlu0 %5513  ;;  %10195 = vmatpush3.msra.mxu1 %v5516_v33 }
0x1254   :  { %10156 = vmatmul.mubr.msk.f32.gmra.mxu1 %vm40_vm1, %v5200_v58  ;;  %10196 = vmatprep.subr.mxu1 %v5514_v5 }
0x1255   :  { %10197 = vmatpush3.msra.mxu1 %v5514_v5  ;;  %v5512_v49 = vpop.permute.xlu1 %5511  ;;  %10158 = vmatprep.mubr.msk.f32.mxu1 %vm40_vm1, %v5201_v60 }
0x1256   :  { %10198 = vmatprep.subr.mxu1 %v5512_v49 }
0x1257   :  { %v5510_v62 = vpop.permute.xlu0 %5509  ;;  %10199 = vmatpush3.msra.mxu1 %v5512_v49 }
0x1258   :  { %10159 = vmatmul.mubr.msk.f32.gmra.mxu1 %vm40_vm1, %v5202_v50  ;;  %10200 = vmatprep.subr.mxu1 %v5510_v62 }
0x1259   :  { %10201 = vmatpush3.msra.mxu1 %v5510_v62  ;;  %v5508_v26 = vpop.permute.xlu1 %5507  ;;  %10161 = vmatprep.mubr.msk.f32.mxu1 %vm40_vm1, %v5203_v7 }
0x125a   :  { %10202 = vmatprep.subr.mxu1 %v5508_v26 }
0x125b   :  { %v5506_v16 = vpop.permute.xlu0 %5505  ;;  %10203 = vmatpush3.msra.mxu1 %v5508_v26 }
0x125c   :  { %10162 = vmatmul.mubr.msk.f32.gmra.mxu1 %vm40_vm1, %v5204_v51  ;;  %10204 = vmatprep.subr.mxu1 %v5506_v16 }
0x125d   :  { %10205 = vmatpush3.msra.mxu1 %v5506_v16  ;;  %v5504_v45 = vpop.permute.xlu1 %5503  ;;  %10208 = vmatprep.mubr.msk.f32.mxu1 %vm40_vm1, %v5495_v59 }
0x125e   :  { %10206 = vmatprep.subr.mxu1 %v5504_v45 }
0x125f   :  { %10207 = vmatpush3.msra.mxu1 %v5504_v45 }
0x1260   :  { %10209 = vmatmul.mubr.msk.f32.vlgmr.msra.gmra.mxu1 %vm40_vm1, %v5496_v35 }
0x1261   :  { %10211 = vmatprep.mubr.msk.f32.mxu1 %vm40_vm1, %v5497_v2 }
0x1264   :  { %10212 = vmatmul.mubr.msk.f32.gmra.mxu1 %vm40_vm1, %v5498_v4 }
0x1265   :  { %10214 = vmatprep.mubr.msk.f32.mxu1 %vm40_vm1, %v5499_v27 }
0x1268   :  { %10215 = vmatmul.mubr.msk.f32.gmra.mxu1 %vm40_vm1, %v5500_v32  ;;  %v5675_v6 = vpop.permute.xlu0 %5674 }
0x1269   :  { %10217 = vmatprep.mubr.msk.f32.mxu1 %vm40_vm1, %v5501_v14 }
0x126a   :  { %v5680_v41 = vpop.permute.xlu1 %5679 }
0x126c   :  { %10218 = vmatmul.mubr.msk.f32.gmra.mxu1 %vm40_vm1, %v5502_v38  ;;  %v5731_v46 = vpop.permute.xlu0 %5730 }
0x126e   :  { %v5736_v28 = vpop.permute.xlu1 %5735 }
0x1270   :  { %v5685_v30 = vpop.permute.xlu0 %5684 }
0x1272   :  { %v5690_v42 = vpop.permute.xlu1 %5689 }
0x1274   :  { %v5741_v55 = vpop.permute.xlu0 %5740 }
0x1276   :  { %v5746_v53 = vpop.permute.xlu1 %5745 }
0x1278   :  { %v5695_v15 = vpop.permute.xlu0 %5694 }
0x127a   :  { %v5700_v12 = vpop.permute.xlu1 %5699 }
0x127c   :  { %v5751_v58 = vpop.permute.xlu0 %5750 }
0x127e   :  { %v5756_v18 = vpop.permute.xlu1 %5755 }
0x1282   :  { %v5710_v2 = vpop.permute.xlu1 %5709 }
0x129d   :  { %v10182_v43 = vpop.f32.mrf.mxu0 }
0x129f   :  { %v5456_v44 = vpop.f32.mrf.mxu0 }
0x12a1   :  { %v10185_v61 = vpop.f32.mrf.mxu0 }
0x12a3   :  { %v5466_v56 = vpop.f32.mrf.mxu0 }
0x12a5   :  { %v10188_v3 = vpop.f32.mrf.mxu0 }
0x12a7   :  { %v5476_v17 = vpop.f32.mrf.mxu0 }
0x12a9   :  { %v10191_v7 = vpop.f32.mrf.mxu0 }
0x12ab   :  { %v5486_v38 = vpop.f32.mrf.mxu0 }
0x1310   :  { %v10154_v21 = vpop.f32.mrf.mxu1 }
0x1311   :  { %v5462_v20 = vadd.f32 %v10182_v43, %v10154_v21  ;;  %v5705_v21 = vpop.permute.xlu0 %5704 }
0x1312   :  { %v5327_v47 = vpop.f32.mrf.mxu1 }
0x1313   :  { %v5457_v22 = vadd.f32 %v5456_v44, %v5327_v47 }
0x1314   :  { %v10157_v52 = vpop.f32.mrf.mxu1 }
0x1315   :  { %v5472_v36 = vadd.f32 %v10185_v61, %v10157_v52 }
0x1316   :  { %v5337_v9 = vpop.f32.mrf.mxu1 }
0x1317   :  { %v5467_v60 = vadd.f32 %v5466_v56, %v5337_v9 }
0x1318   :  { %v10160_v10 = vpop.f32.mrf.mxu1 }
0x1319   :  { %v5482_v16 = vadd.f32 %v10188_v3, %v10160_v10 }
0x131a   :  { %v5347_v54 = vpop.f32.mrf.mxu1 }
0x131b   :  { %v5477_v4 = vadd.f32 %v5476_v17, %v5347_v54 }
0x131c   :  { %v10163_v57 = vpop.f32.mrf.mxu1 }
0x131e   :  { %v5357_v11 = vpop.f32.mrf.mxu1 }
0x131f   :  { %v5487_v52 = vadd.f32 %v5486_v38, %v5357_v11 }
0x1320   :  { %v10210_v13 = vpop.f32.mrf.mxu1 }
0x1321   :  { %v5657_v24 = vadd.f32 %v10210_v13, %v5462_v20 }
0x1322   :  { %v5617_v29 = vpop.f32.mrf.mxu1 }
0x1323   :  { %v5713_v31 = vmul.f32 %v5680_v41, %v5657_v24  ;;  %v5656_v40 = vadd.f32 %v5617_v29, %v5457_v22  ;;  %v5492_v41 = vadd.f32 %v10191_v7, %v10163_v57  ;;  %v5766_v57 = vpop.permute.xlu1 %5765 }
0x1324   :  { %v10213_v33 = vpop.f32.mrf.mxu1 }
0x1325   :  { %v5769_v5 = vadd.f32 %v5736_v28, %v5713_v31  ;;  %v5712_v49 = vmul.f32 %v5675_v6, %v5656_v40  ;;  %v5659_v50 = vadd.f32 %v10213_v33, %v5472_v36 }
0x1326   :  { %v5627_v62 = vpop.f32.mrf.mxu1 }
0x1327   :  { %v5768_v26 = vadd.f32 %v5731_v46, %v5712_v49  ;;  %v5715_v51 = vmul.f32 %v5690_v42, %v5659_v50  ;;  %v5658_v59 = vadd.f32 %v5627_v62, %v5467_v60  ;;  %v5777_v45 = vmax.f32 %v5769_v5, 0.0  ;;  %v5927_v60 = vld [vmem:[#allocation2 + $0x838] sm:$0xff]  ;;  %v5928_v5 = vld [vmem:[#allocation2 + $0x840] sm:$0xff]  ;;  %v5929_v49 = vld [vmem:[#allocation2 + $0x848] sm:$0xff] }
0x1328   :  { %v10216_v35 = vpop.f32.mrf.mxu1  ;;  %v6289_v50 = vld [vmem:[#allocation2 + $0x890] sm:$0xff] }
0x1329   :  { %v5776_v27 = vmax.f32 %v5768_v26, 0.0  ;;  %v5771_v32 = vadd.f32 %v5746_v53, %v5715_v51  ;;  %v5714_v14 = vmul.f32 %v5685_v30, %v5658_v59  ;;  %v5661_v37 = vadd.f32 %v10216_v35, %v5482_v16 }
0x132a   :  { %v5637_v63 = vpop.f32.mrf.mxu1  ;;  %v5785_v46 = vadd.f32 %v5777_v45, %v11231_v25 }
0x132b   :  { %v5784_v6 = vadd.f32 %v5776_v27, %v11227_v19  ;;  %v5770_v28 = vadd.f32 %v5741_v55, %v5714_v14  ;;  %v5660_v43 = vadd.f32 %v5637_v63, %v5477_v4  ;;  %v5779_v42 = vmax.f32 %v5771_v32, 0.0  ;;  %v5932_v63 = vld [vmem:[#allocation2 + $0x860] sm:$0xff] }
0x132c   :  { %v5717_v47 = vmul.f32 %v5700_v12, %v5661_v37  ;;  %v10219_v44 = vpop.f32.mrf.mxu1  ;;  %v5931_v37 = vld [vmem:[#allocation2 + $0x858] sm:$0xff] }
0x132d   :  { %v5778_v9 = vmax.f32 %v5770_v28, 0.0  ;;  %v5716_v61 = vmul.f32 %v5695_v15, %v5660_v43  ;;  %v5663_v10 = vadd.f32 %v10219_v44, %v5492_v41  ;;  %10224 = vmatprep.mubr.msk.f32.mxu0 %vm2248_vm10, %v5784_v6  ;;  %v5787_v25 = vadd.f32 %v5779_v42, %v11243_v1  ;;  %v5761_v15 = vpop.permute.xlu0 %5760  ;;  %v5933_v42 = vld [vmem:[#allocation2 + $0x868] sm:$0xff]  ;;  %v6160_v44 = vld [vmem:[#allocation2 + $0x870] sm:$0xff] }
0x132e   :  { %v5773_v30 = vadd.f32 %v5756_v18, %v5717_v47  ;;  %v5647_v53 = vpop.f32.mrf.mxu1  ;;  %10225 = vmatmul.mubr.msk.f32.vlgmr.msra.gmra.mxu0 %vm2248_vm10, %v5785_v46 }
0x132f   :  { %v5786_v19 = vadd.f32 %v5778_v9, %v11239_v23  ;;  %v5772_v55 = vadd.f32 %v5751_v58, %v5716_v61  ;;  %v5719_v54 = vmul.f32 %v5710_v2, %v5663_v10  ;;  %v5662_v56 = vadd.f32 %v5647_v53, %v5487_v52  ;;  %v5930_v58 = vld [vmem:[#allocation2 + $0x850] sm:$0xff]  ;;  %v6161_v9 = vld [vmem:[#allocation2 + $0x878] sm:$0xff]  ;;  %v6162_v61 = vld [vmem:[#allocation2 + $0x880] sm:$0xff] }
0x1330   :  { %v5781_v12 = vmax.f32 %v5773_v30, 0.0  ;;  %10252 = vmatprep.mubr.msk.f32.mxu1 %vm40_vm1, %v5930_v58  ;;  %v6290_v53 = vld [vmem:[#allocation2 + $0x898] sm:$0xff] }
0x1331   :  { %v5780_v3 = vmax.f32 %v5772_v55, 0.0  ;;  %v5775_v11 = vadd.f32 %v5766_v57, %v5719_v54  ;;  %v5718_v20 = vmul.f32 %v5705_v21, %v5662_v56  ;;  %10227 = vmatprep.mubr.msk.f32.mxu0 %vm2248_vm10, %v5786_v19  ;;  %v6163_v19 = vld [vmem:[#allocation2 + $0x888] sm:$0xff]  ;;  %v6291_v55 = vld [vmem:[#allocation2 + $0x8a0] sm:$0xff] }
0x1332   :  { %10228 = vmatmul.mubr.msk.f32.gmra.mxu0 %vm2248_vm10, %v5787_v25  ;;  %v5789_v23 = vadd.f32 %v5781_v12, %v11255_v34  ;;  %v6292_v54 = vld [vmem:[#allocation2 + $0x8a8] sm:$0xff]  ;;  %v6420_v57 = vld [vmem:[#allocation2 + $0x8c0] sm:$0xff]  ;;  %v6419_v25 = vld [vmem:[#allocation2 + $0x8b8] sm:$0xff] }
0x1333   :  { %v5788_v13 = vadd.f32 %v5780_v3, %v11251_v39  ;;  %v5774_v22 = vadd.f32 %v5761_v15, %v5718_v20  ;;  %v5783_v24 = vmax.f32 %v5775_v11, 0.0  ;;  %v6421_v56 = vld [vmem:[#allocation2 + $0x8c8] sm:$0x3f]  ;;  %v6418_v12 = vld [vmem:[#allocation2 + $0x8b0] sm:$0xff] }
0x1335   :  { %v5782_v17 = vmax.f32 %v5774_v22, 0.0  ;;  %10230 = vmatprep.mubr.msk.f32.mxu0 %vm2248_vm10, %v5788_v13  ;;  %v5791_v29 = vadd.f32 %v5783_v24, %v11267_v48 }
0x1336   :  { %10231 = vmatmul.mubr.msk.f32.gmra.mxu0 %vm2248_vm10, %v5789_v23 }
0x1337   :  { %v5790_v1 = vadd.f32 %v5782_v17, %v11263_v8  ;;  %v5926_v8 = vld [vmem:[#allocation2 + $0x830] sm:$0xff] }
0x1339   :  { %10233 = vmatprep.mubr.msk.f32.mxu0 %vm2248_vm10, %v5790_v1 }
0x133a   :  { %10234 = vmatmul.mubr.msk.f32.gmra.mxu0 %vm2248_vm10, %v5791_v29 }
0x133b   :  { %10274 = vmatprep.mubr.msk.f32.mxu0 %vm40_vm1, %v5926_v8 }
0x13ee   :  { %v10226_v18 = vpop.f32.mrf.mxu0 }
0x13ef   :  { %5944 = vrot.lane.b32.xlu0 %v10226_v18, %s10681_s0 }
0x13f0   :  { %v5887_v39 = vpop.f32.mrf.mxu0 }
0x13f1   :  { %5942 = vrot.lane.b32.xlu1 %v5887_v39, %s10681_s0 }
0x13f2   :  { %v10229_v34 = vpop.f32.mrf.mxu0 }
0x13f3   :  { %5948 = vrot.lane.b32.xlu0 %v10229_v34, %s10681_s0 }
0x13f4   :  { %v5897_v36 = vpop.f32.mrf.mxu0 }
0x13f5   :  { %5946 = vrot.lane.b32.xlu1 %v5897_v36, %s10681_s0 }
0x13f6   :  { %v10232_v31 = vpop.f32.mrf.mxu0 }
0x13f7   :  { %5952 = vrot.lane.b32.xlu0 %v10232_v31, %s10681_s0 }
0x13f8   :  { %v5907_v48 = vpop.f32.mrf.mxu0 }
0x13f9   :  { %5950 = vrot.lane.b32.xlu1 %v5907_v48, %s10681_s0 }
0x13fa   :  { %v10235_v40 = vpop.f32.mrf.mxu0 }
0x13fb   :  { %5956 = vrot.lane.b32.xlu0 %v10235_v40, %s10681_s0  ;;  %10258 = vmatprep.subr.mxu0 %v10235_v40 }
0x13fc   :  { %v5917_v33 = vpop.f32.mrf.mxu0  ;;  %10259 = vmatpush3.msra.mxu0 %v10235_v40 }
0x13fd   :  { %5954 = vrot.lane.b32.xlu1 %v5917_v33, %s10681_s0  ;;  %10260 = vmatprep.subr.mxu0 %v5917_v33 }
0x13fe   :  { %10261 = vmatpush3.msra.mxu0 %v5917_v33 }
0x13ff   :  { %6178 = vrot.lane.b32.xlu0 %v10235_v40, %s10682_s1  ;;  %10262 = vmatprep.subr.mxu0 %v10232_v31 }
0x1400   :  { %10263 = vmatpush3.msra.mxu0 %v10232_v31 }
0x1401   :  { %6174 = vrot.lane.b32.xlu1 %v10232_v31, %s10682_s1  ;;  %10264 = vmatprep.subr.mxu0 %v5907_v48 }
0x1402   :  { %10265 = vmatpush3.msra.mxu0 %v5907_v48 }
0x1403   :  { %6307 = vrot.lane.b32.xlu0 %v10235_v40, %s10683_s22  ;;  %10266 = vmatprep.subr.mxu0 %v10229_v34 }
0x1404   :  { %10267 = vmatpush3.msra.mxu0 %v10229_v34 }
0x1405   :  { %6172 = vrot.lane.b32.xlu1 %v5907_v48, %s10682_s1  ;;  %10268 = vmatprep.subr.mxu0 %v5897_v36 }
0x1406   :  { %10269 = vmatpush3.msra.mxu0 %v5897_v36 }
0x1407   :  { %6303 = vrot.lane.b32.xlu0 %v10232_v31, %s10683_s22  ;;  %10270 = vmatprep.subr.mxu0 %v10226_v18 }
0x1408   :  { %10271 = vmatpush3.msra.mxu0 %v10226_v18 }
0x1409   :  { %6170 = vrot.lane.b32.xlu1 %v10229_v34, %s10682_s1  ;;  %10272 = vmatprep.subr.mxu0 %v5887_v39 }
0x140a   :  { %10273 = vmatpush3.msra.mxu0 %v5887_v39 }
0x140b   :  { %6301 = vrot.lane.b32.xlu0 %v5907_v48, %s10683_s22  ;;  %10275 = vmatmul.mubr.msk.f32.vlgmr.msra.gmra.mxu0 %vm40_vm1, %v5927_v60 }
0x140c   :  { %10277 = vmatprep.mubr.msk.f32.mxu0 %vm40_vm1, %v5928_v5 }
0x140d   :  { %6176 = vrot.lane.b32.xlu1 %v5917_v33, %s10682_s1 }
0x140f   :  { %6305 = vrot.lane.b32.xlu0 %v5917_v33, %s10683_s22  ;;  %10278 = vmatmul.mubr.msk.f32.gmra.mxu0 %vm40_vm1, %v5929_v49 }
0x1410   :  { %10318 = vmatprep.mubr.msk.f32.mxu0 %vm40_vm1, %v6289_v50 }
0x1411   :  { %6168 = vrot.lane.b32.xlu1 %v5897_v36, %s10682_s1 }
0x1413   :  { %6299 = vrot.lane.b32.xlu0 %v10229_v34, %s10683_s22 }
0x1415   :  { %6166 = vrot.lane.b32.xlu1 %v10226_v18, %s10682_s1 }
0x1417   :  { %6297 = vrot.lane.b32.xlu0 %v5897_v36, %s10683_s22 }
0x1419   :  { %6164 = vrot.lane.b32.xlu1 %v5887_v39, %s10682_s1 }
0x141b   :  { %6295 = vrot.lane.b32.xlu0 %v10226_v18, %s10683_s22 }
0x141d   :  { %6293 = vrot.lane.b32.xlu1 %v5887_v39, %s10683_s22 }
0x1461   :  { %v5945_v7 = vpop.permute.xlu0 %5944 }
0x1463   :  { %v5943_v62 = vpop.permute.xlu1 %5942 }
0x1465   :  { %v5949_v26 = vpop.permute.xlu0 %5948 }
0x1467   :  { %v5947_v51 = vpop.permute.xlu1 %5946 }
0x1469   :  { %v5953_v59 = vpop.permute.xlu0 %5952 }
0x146b   :  { %v5951_v16 = vpop.permute.xlu1 %5950 }
0x146d   :  { %v5957_v45 = vpop.permute.xlu0 %5956 }
0x146e   :  { %10236 = vmatprep.subr.mxu1 %v5957_v45 }
0x146f   :  { %10237 = vmatpush3.msra.mxu1 %v5957_v45  ;;  %v5955_v35 = vpop.permute.xlu1 %5954 }
0x1470   :  { %10238 = vmatprep.subr.mxu1 %v5955_v35 }
0x1471   :  { %v6179_v2 = vpop.permute.xlu0 %6178  ;;  %10239 = vmatpush3.msra.mxu1 %v5955_v35  ;;  %v6422_v35 = vld [vmem:[#allocation2 + $0x8d0] sm:$0x3] }
0x1472   :  { %10240 = vmatprep.subr.mxu1 %v5953_v59 }
0x1473   :  { %10241 = vmatpush3.msra.mxu1 %v5953_v59  ;;  %v6175_v4 = vpop.permute.xlu1 %6174 }
0x1474   :  { %10242 = vmatprep.subr.mxu1 %v5951_v16 }
0x1475   :  { %v6308_v27 = vpop.permute.xlu0 %6307  ;;  %10243 = vmatpush3.msra.mxu1 %v5951_v16 }
0x1476   :  { %10244 = vmatprep.subr.mxu1 %v5949_v26  ;;  %10302 = vmatprep.subr.mxu0 %v6308_v27 }
0x1477   :  { %10245 = vmatpush3.msra.mxu1 %v5949_v26  ;;  %v6173_v32 = vpop.permute.xlu1 %6172  ;;  %10303 = vmatpush3.msra.mxu0 %v6308_v27 }
0x1478   :  { %10246 = vmatprep.subr.mxu1 %v5947_v51 }
0x1479   :  { %v6304_v14 = vpop.permute.xlu0 %6303  ;;  %10247 = vmatpush3.msra.mxu1 %v5947_v51 }
0x147a   :  { %10248 = vmatprep.subr.mxu1 %v5945_v7 }
0x147b   :  { %10249 = vmatpush3.msra.mxu1 %v5945_v7  ;;  %v6171_v38 = vpop.permute.xlu1 %6170 }
0x147c   :  { %10250 = vmatprep.subr.mxu1 %v5943_v62 }
0x147d   :  { %v6302_v41 = vpop.permute.xlu0 %6301  ;;  %10251 = vmatpush3.msra.mxu1 %v5943_v62 }
0x147e   :  { %10280 = vmatprep.subr.mxu1 %v6179_v2  ;;  %10253 = vmatmul.mubr.msk.f32.vlgmr.msra.gmra.mxu1 %vm40_vm1, %v5931_v37 }
0x147f   :  { %10281 = vmatpush3.msra.mxu1 %v6179_v2  ;;  %v6177_v6 = vpop.permute.xlu1 %6176  ;;  %10255 = vmatprep.mubr.msk.f32.mxu1 %vm40_vm1, %v5932_v63 }
0x1480   :  { %10282 = vmatprep.subr.mxu1 %v6177_v6 }
0x1481   :  { %v6306_v28 = vpop.permute.xlu0 %6305  ;;  %10283 = vmatpush3.msra.mxu1 %v6177_v6 }
0x1482   :  { %10284 = vmatprep.subr.mxu1 %v6175_v4  ;;  %10304 = vmatprep.subr.mxu0 %v6306_v28 }
0x1483   :  { %10285 = vmatpush3.msra.mxu1 %v6175_v4  ;;  %v6169_v43 = vpop.permute.xlu1 %6168  ;;  %10305 = vmatpush3.msra.mxu0 %v6306_v28 }
0x1484   :  { %10286 = vmatprep.subr.mxu1 %v6173_v32  ;;  %10306 = vmatprep.subr.mxu0 %v6304_v14 }
0x1485   :  { %v6300_v21 = vpop.permute.xlu0 %6299  ;;  %10287 = vmatpush3.msra.mxu1 %v6173_v32  ;;  %10307 = vmatpush3.msra.mxu0 %v6304_v14 }
0x1486   :  { %10288 = vmatprep.subr.mxu1 %v6171_v38  ;;  %10308 = vmatprep.subr.mxu0 %v6302_v41 }
0x1487   :  { %10289 = vmatpush3.msra.mxu1 %v6171_v38  ;;  %v6167_v46 = vpop.permute.xlu1 %6166  ;;  %10309 = vmatpush3.msra.mxu0 %v6302_v41 }
0x1488   :  { %10290 = vmatprep.subr.mxu1 %v6169_v43  ;;  %10310 = vmatprep.subr.mxu0 %v6300_v21 }
0x1489   :  { %v6298_v47 = vpop.permute.xlu0 %6297  ;;  %10291 = vmatpush3.msra.mxu1 %v6169_v43  ;;  %10311 = vmatpush3.msra.mxu0 %v6300_v21 }
0x148a   :  { %10256 = vmatmul.mubr.msk.f32.gmra.mxu1 %vm40_vm1, %v5933_v42  ;;  %10292 = vmatprep.subr.mxu1 %v6167_v46 }
0x148b   :  { %10312 = vmatprep.subr.mxu0 %v6298_v47  ;;  %10293 = vmatpush3.msra.mxu1 %v6167_v46  ;;  %v6165_v52 = vpop.permute.xlu1 %6164 }
0x148c   :  { %10313 = vmatpush3.msra.mxu0 %v6298_v47  ;;  %10294 = vmatprep.subr.mxu1 %v6165_v52 }
0x148d   :  { %v6296_v10 = vpop.permute.xlu0 %6295  ;;  %10295 = vmatpush3.msra.mxu1 %v6165_v52  ;;  %10296 = vmatprep.mubr.msk.f32.mxu1 %vm40_vm1, %v6160_v44 }
0x148e   :  { %10297 = vmatmul.mubr.msk.f32.vlgmr.msra.gmra.mxu1 %vm40_vm1, %v6161_v9  ;;  %10314 = vmatprep.subr.mxu0 %v6296_v10 }
0x148f   :  { %v6294_v30 = vpop.permute.xlu1 %6293  ;;  %10315 = vmatpush3.msra.mxu0 %v6296_v10  ;;  %10299 = vmatprep.mubr.msk.f32.mxu1 %vm40_vm1, %v6162_v61 }
0x1490   :  { %10316 = vmatprep.subr.mxu0 %v6294_v30  ;;  %10324 = vmatprep.subr.msk.mxu1 %vm315_vm2, %v6421_v56 }
0x1491   :  { %10317 = vmatpush3.msra.mxu0 %v6294_v30  ;;  %10325 = vmatpush3.msk.msra.mxu1 %vm315_vm2, %v6421_v56 }
0x1492   :  { %10319 = vmatmul.mubr.msk.f32.vlgmr.msra.gmra.mxu0 %vm40_vm1, %v6290_v53  ;;  %10300 = vmatmul.mubr.msk.f32.gmra.mxu1 %vm40_vm1, %v6163_v19 }
0x1493   :  { %10321 = vmatprep.mubr.msk.f32.mxu0 %vm40_vm1, %v6291_v55  ;;  %10338 = vmatprep.subr.msk.mxu0 %vm315_vm2, %v6421_v56 }
0x1494   :  { %10339 = vmatpush3.msk.msra.mxu0 %vm315_vm2, %v6421_v56  ;;  %10326 = vmatprep.subr.mxu1 %v6420_v57 }
0x1495   :  { %10340 = vmatprep.subr.mxu0 %v6420_v57  ;;  %10327 = vmatpush3.msra.mxu1 %v6420_v57 }
0x1496   :  { %10322 = vmatmul.mubr.msk.f32.gmra.mxu0 %vm40_vm1, %v6292_v54  ;;  %10328 = vmatprep.subr.mxu1 %v6419_v25 }
0x1497   :  { %10341 = vmatpush3.msra.mxu0 %v6420_v57  ;;  %10329 = vmatpush3.msra.mxu1 %v6419_v25 }
0x1498   :  { %10342 = vmatprep.subr.mxu0 %v6419_v25  ;;  %10330 = vmatprep.subr.mxu1 %v6418_v12 }
0x1499   :  { %10343 = vmatpush3.msra.mxu0 %v6419_v25  ;;  %10331 = vmatpush3.msra.mxu1 %v6418_v12 }
0x149a   :  { %10344 = vmatprep.subr.mxu0 %v6418_v12  ;;  %10352 = vmatprep.subr.msk.mxu1 %vm502_vm4, %v6422_v35 }
0x149b   :  { %10345 = vmatpush3.msra.mxu0 %v6418_v12 }
0x149c   :  { %10360 = vmatprep.subr.msk.mxu0 %vm502_vm4, %v6422_v35 }
0x14cb   :  { %v10276_v11 = vpop.f32.mrf.mxu0 }
0x14cd   :  { %v6141_v15 = vpop.f32.mrf.mxu0 }
0x14cf   :  { %v10279_v23 = vpop.f32.mrf.mxu0 }
0x14d1   :  { %v6151_v1 = vpop.f32.mrf.mxu0 }
0x153e   :  { %v10254_v3 = vpop.f32.mrf.mxu1 }
0x153f   :  { %v6147_v17 = vadd.f32 %v10276_v11, %v10254_v3 }
0x1540   :  { %v6044_v20 = vpop.f32.mrf.mxu1 }
0x1541   :  { %v6142_v18 = vadd.f32 %v6141_v15, %v6044_v20 }
0x154a   :  { %v10257_v13 = vpop.f32.mrf.mxu1 }
0x154b   :  { %v6157_v8 = vadd.f32 %v10279_v23, %v10257_v13 }
0x154c   :  { %v6054_v22 = vpop.f32.mrf.mxu1 }
0x154d   :  { %v6152_v58 = vadd.f32 %v6151_v1, %v6054_v22 }
0x154e   :  { %v10298_v24 = vpop.f32.mrf.mxu1 }
0x154f   :  { %v6286_v39 = vadd.f32 %v10298_v24, %v6147_v17 }
0x1550   :  { %v6266_v29 = vpop.f32.mrf.mxu1 }
0x1551   :  { %v6285_v31 = vadd.f32 %v6266_v29, %v6142_v18 }
0x1552   :  { %v10320_v34 = vpop.f32.mrf.mxu0  ;;  %v10301_v36 = vpop.f32.mrf.mxu1 }
0x1553   :  { %v11425_v48 = vadd.f32 %v10320_v34, %v6286_v39  ;;  %v6288_v5 = vadd.f32 %v10301_v36, %v6157_v8  ;;  %v6873_v36 = vld [vmem:[#allocation2 + $0x8f0] sm:$0x3f]  ;;  %v6871_v8 = vld [vmem:[#allocation2 + $0x8e0] sm:$0xff] }
0x1554   :  { %v6395_v40 = vpop.f32.mrf.mxu0  ;;  %v6276_v33 = vpop.f32.mrf.mxu1 }
0x1555   :  { %v11427_v60 = vadd.f32 %v6395_v40, %v6285_v31  ;;  %v6287_v7 = vadd.f32 %v6276_v33, %v6152_v58  ;;  %v6525_v62 = vmul.f32 %v11425_v48, %v11425_v48  ;;  %v6872_v31 = vld [vmem:[#allocation2 + $0x8e8] sm:$0xff]  ;;  %v6870_v40 = vld [vmem:[#allocation2 + $0x8d8] sm:$0xff] }
0x1556   :  { %v10323_v49 = vpop.f32.mrf.mxu0 }
0x1557   :  { %v6524_v50 = vmul.f32 %v11427_v60, %v11427_v60  ;;  %10332 = vmatprep.mubr.msk.f32.mxu1 %vm6423_vm11, %v11427_v60  ;;  %v11435_v26 = vadd.f32 %v10323_v49, %v6288_v5 }
0x1558   :  { %v6405_v51 = vpop.f32.mrf.mxu0  ;;  %10333 = vmatmul.mubr.msk.f32.vlgmr.msra.gmra.mxu1 %vm6423_vm11, %v11425_v48 }
0x1559   :  { %v11439_v59 = vadd.f32 %v6405_v51, %v6287_v7  ;;  %10346 = vmatprep.mubr.msk.f32.mxu0 %vm6423_vm11, %v6524_v50  ;;  %v6527_v45 = vmul.f32 %v11435_v26, %v11435_v26  ;;  %10353 = vmatpush3.msk.msra.mxu1 %vm502_vm4, %v6422_v35 }
0x155a   :  { %10347 = vmatmul.mubr.msk.f32.vlgmr.msra.gmra.mxu0 %vm6423_vm11, %v6525_v62  ;;  %10368 = vmatprep.subr.msk.mxu1 %vm315_vm2, %v6873_v36 }
0x155b   :  { %v6526_v16 = vmul.f32 %v11439_v59, %v11439_v59  ;;  %10335 = vmatprep.mubr.msk.f32.mxu1 %vm6423_vm11, %v11439_v59  ;;  %10361 = vmatpush3.msk.msra.mxu0 %vm502_vm4, %v6422_v35 }
0x155c   :  { %10336 = vmatmul.mubr.msk.f32.gmra.mxu1 %vm6423_vm11, %v11435_v26 }
0x155d   :  { %10349 = vmatprep.mubr.msk.f32.mxu0 %vm6423_vm11, %v6526_v16 }
0x155e   :  { %10350 = vmatmul.mubr.msk.f32.gmra.mxu0 %vm6423_vm11, %v6527_v45 }
0x1618   :  { %v10334_v2 = vpop.f32.mrf.mxu1 }
0x1619   :  { %v6626_v4 = vmul.f32 0.06666667, %v10334_v2 }
0x161a   :  { %v6505_v27 = vpop.f32.mrf.mxu1  ;;  %v10348_v32 = vpop.f32.mrf.mxu0 }
0x161b   :  { %v6634_v14 = vmul.f32 %v6626_v4, %v6626_v4  ;;  %v6625_v38 = vmul.f32 0.06666667, %v6505_v27  ;;  %v6630_v37 = vmul.f32 0.06666667, %v10348_v32  ;;  %v6654_v22 = vsub.f32 0.0, %v6626_v4 }
0x161c   :  { %v10337_v63 = vpop.f32.mrf.mxu1  ;;  %v6606_v41 = vpop.f32.mrf.mxu0 }
0x161d   :  { %v6633_v6 = vmul.f32 %v6625_v38, %v6625_v38  ;;  %v6638_v28 = vsub.f32 %v6630_v37, %v6634_v14  ;;  %v6628_v43 = vmul.f32 0.06666667, %v10337_v63  ;;  %v6629_v21 = vmul.f32 0.06666667, %v6606_v41  ;;  %v6974_v63 = vld [vmem:[#allocation2 + $0x8f8] sm:$0xff] }
0x161e   :  { %v6515_v46 = vpop.f32.mrf.mxu1  ;;  %v10351_v42 = vpop.f32.mrf.mxu0  ;;  %v6653_v15 = vsub.f32 0.0, %v6625_v38 }
0x161f   :  { %v6642_v47 = vmax.f32 %v6638_v28, 0.0  ;;  %v6636_v44 = vmul.f32 %v6628_v43, %v6628_v43  ;;  %v6627_v52 = vmul.f32 0.06666667, %v6515_v46  ;;  %v6637_v9 = vsub.f32 %v6629_v21, %v6633_v6  ;;  %v7253_v21 = vld [vmem:[#allocation2 + $0x928] sm:$0xff] }
0x1620   :  { %v6632_v61 = vmul.f32 0.06666667, %v10351_v42  ;;  %v6616_v10 = vpop.f32.mrf.mxu0  ;;  %v6656_v18 = vsub.f32 0.0, %v6628_v43  ;;  %v6975_v43 = vld [vmem:[#allocation2 + $0x900] sm:$0xff] }
0x1621   :  { %v6646_v30 = vadd.f32 1e-05, %v6642_v47  ;;  %v6635_v53 = vmul.f32 %v6627_v52, %v6627_v52  ;;  %v6631_v19 = vmul.f32 0.06666667, %v6616_v10  ;;  %v6641_v55 = vmax.f32 %v6637_v9, 0.0 }
0x1622   :  { %v6640_v54 = vsub.f32 %v6632_v61, %v6636_v44  ;;  %v6655_v1 = vsub.f32 0.0, %v6627_v52  ;;  %v6977_v61 = vld [vmem:[#allocation2 + $0x910] sm:$0xff] }
0x1623   :  { %v6639_v56 = vsub.f32 %v6631_v19, %v6635_v53  ;;  %v6645_v57 = vadd.f32 1e-05, %v6641_v55  ;;  %10615 = vrsqrt.f32 %v6646_v30  ;;  %v7156_v30 = vld [vmem:[#allocation2 + $0x918] sm:$0xff] }
0x1624   :  { %v6644_v25 = vmax.f32 %v6640_v54, 0.0  ;;  %v7157_v54 = vld [vmem:[#allocation2 + $0x920] sm:$0xff] }
0x1625   :  { %v6643_v12 = vmax.f32 %v6639_v56, 0.0  ;;  %10617 = vrsqrt.f32 %v6645_v57  ;;  %v7357_v57 = vld [vmem:[#allocation2 + $0x970] sm:$0x3f] }
0x1626   :  { %v6648_v3 = vadd.f32 1e-05, %v6644_v25 }
0x1627   :  { %v6647_v11 = vadd.f32 1e-05, %v6643_v12  ;;  %v7254_v12 = vld [vmem:[#allocation2 + $0x930] sm:$0xff] }
0x1628   :  { %10619 = vrsqrt.f32 %v6648_v3  ;;  %v7356_v3 = vld [vmem:[#allocation2 + $0x968] sm:$0xff] }
0x1629   :  { %10621 = vrsqrt.f32 %v6647_v11  ;;  %v7355_v11 = vld [vmem:[#allocation2 + $0x960] sm:$0xff] }
0x1630   :  { %v10616_v20 = vpop.eup %10615 }
0x1631   :  { %v6658_v17 = vmul.f32 %v10616_v20, %v6654_v22  ;;  %v7351_v22 = vld [vmem:[#allocation2 + $0x940] sm:$0xff] }
0x1632   :  { %v10618_v13 = vpop.eup %10617 }
0x1633   :  { %10354 = vmatprep.mubr.msk.f32.mxu1 %vm495_vm5, %v10618_v13  ;;  %v6657_v23 = vmul.f32 %v10618_v13, %v6653_v15  ;;  %v7353_v15 = vld [vmem:[#allocation2 + $0x950] sm:$0xff]  ;;  %v7352_v13 = vld [vmem:[#allocation2 + $0x948] sm:$0xff] }
0x1634   :  { %10355 = vmatmul.mubr.msk.f32.vlgmr.msra.gmra.mxu1 %vm495_vm5, %v10616_v20  ;;  %v7354_v20 = vld [vmem:[#allocation2 + $0x958] sm:$0xff] }
0x1635   :  { %v10620_v24 = vpop.eup %10619  ;;  %10362 = vmatprep.mubr.msk.f32.mxu0 %vm495_vm5, %v6657_v23  ;;  %10369 = vmatpush3.msk.msra.mxu1 %vm315_vm2, %v6873_v36  ;;  %v7350_v23 = vld [vmem:[#allocation2 + $0x938] sm:$0xff] }
0x1636   :  { %v10622_v29 = vpop.eup %10621  ;;  %10363 = vmatmul.mubr.msk.f32.vlgmr.msra.gmra.mxu0 %vm495_vm5, %v6658_v17  ;;  %v6660_v34 = vmul.f32 %v10620_v24, %v6656_v18  ;;  %10370 = vmatprep.subr.mxu1 %v6872_v31 }
0x1637   :  { %10357 = vmatprep.mubr.msk.f32.mxu1 %vm495_vm5, %v10622_v29  ;;  %v6659_v39 = vmul.f32 %v10622_v29, %v6655_v1  ;;  %10371 = vmatpush3.msra.mxu1 %v6872_v31 }
0x1638   :  { %10358 = vmatmul.mubr.msk.f32.gmra.mxu1 %vm495_vm5, %v10620_v24  ;;  %10372 = vmatprep.subr.mxu1 %v6871_v8 }
0x1639   :  { %10365 = vmatprep.mubr.msk.f32.mxu0 %vm495_vm5, %v6659_v39  ;;  %10373 = vmatpush3.msra.mxu1 %v6871_v8 }
0x163a   :  { %10366 = vmatmul.mubr.msk.f32.gmra.mxu0 %vm495_vm5, %v6660_v34  ;;  %10374 = vmatprep.subr.mxu1 %v6870_v40 }
0x163b   :  { %10375 = vmatpush3.msra.mxu1 %v6870_v40 }
0x16f4   :  { %v10356_v33 = vpop.f32.mrf.mxu1 }
0x16f5   :  { %v6859_v58 = vmul.f32 %v10356_v33, %v11425_v48 }
0x16f6   :  { %v6742_v5 = vpop.f32.mrf.mxu1  ;;  %v10364_v49 = vpop.f32.mrf.mxu0 }
0x16f7   :  { %v6858_v50 = vmul.f32 %v6742_v5, %v11427_v60  ;;  %v6863_v7 = vadd.f32 %v10364_v49, %v6859_v58 }
0x16f8   :  { %v10359_v62 = vpop.f32.mrf.mxu1  ;;  %v6839_v51 = vpop.f32.mrf.mxu0 }
0x16f9   :  { %v6861_v16 = vmul.f32 %v10359_v62, %v11435_v26  ;;  %v6862_v45 = vadd.f32 %v6858_v50, %v6839_v51  ;;  %v6867_v32 = vmax.f32 %v6863_v7, 0.0  ;;  %v6976_v26 = vld [vmem:[#allocation2 + $0x908] sm:$0xff]  ;;  %v7358_v7 = vld [vmem:[#allocation2 + $0x978] sm:$0x3]  ;;  %v7722_v51 = vld [vmem:[#allocation2 + $0x9b0] sm:$0xff] }
0x16fa   :  { %v6752_v35 = vpop.f32.mrf.mxu1  ;;  %v10367_v2 = vpop.f32.mrf.mxu0  ;;  %10390 = vmatprep.mubr.msk.f32.mxu0 %vm1825_vm9, %v6976_v26  ;;  %v7723_v62 = vld [vmem:[#allocation2 + $0x9b8] sm:$0x3f] }
0x16fb   :  { %v6866_v4 = vmax.f32 %v6862_v45, 0.0  ;;  %v6860_v27 = vmul.f32 %v6752_v35, %v11439_v59  ;;  %v6865_v14 = vadd.f32 %v10367_v2, %v6861_v16 }
0x16fc   :  { %v6849_v38 = vpop.f32.mrf.mxu0 }
0x16fd   :  { %v6864_v37 = vadd.f32 %v6860_v27, %v6849_v38  ;;  %10376 = vmatprep.mubr.msk.f32.mxu1 %vm6423_vm11, %v6866_v4  ;;  %v6869_v60 = vmax.f32 %v6865_v14, 0.0 }
0x16fe   :  { %10377 = vmatmul.mubr.msk.f32.vlgmr.msra.gmra.mxu1 %vm6423_vm11, %v6867_v32 }
0x16ff   :  { %v6868_v48 = vmax.f32 %v6864_v37, 0.0 }
0x1701   :  { %10379 = vmatprep.mubr.msk.f32.mxu1 %vm6423_vm11, %v6868_v48 }
0x1702   :  { %10380 = vmatmul.mubr.msk.f32.gmra.mxu1 %vm6423_vm11, %v6869_v60 }
0x1703   :  { %10401 = vmatprep.mubr.msk.f32.mxu1 %vm1825_vm9, %v6974_v63 }
0x17be   :  { %v10378_v41 = vpop.f32.mrf.mxu1 }
0x17bf   :  { %6984 = vrot.lane.b32.xlu0 %v10378_v41, %s10681_s0 }
0x17c0   :  { %v6955_v59 = vpop.f32.mrf.mxu1 }
0x17c1   :  { %6982 = vrot.lane.b32.xlu1 %v6955_v59, %s10681_s0 }
0x17c2   :  { %v10381_v6 = vpop.f32.mrf.mxu1 }
0x17c3   :  { %6988 = vrot.lane.b32.xlu0 %v10381_v6, %s10681_s0  ;;  %10393 = vmatprep.subr.mxu1 %v10381_v6 }
0x17c4   :  { %v6965_v28 = vpop.f32.mrf.mxu1  ;;  %10394 = vmatpush3.msra.mxu1 %v10381_v6 }
0x17c5   :  { %6986 = vrot.lane.b32.xlu1 %v6965_v28, %s10681_s0  ;;  %10395 = vmatprep.subr.mxu1 %v6965_v28 }
0x17c6   :  { %10396 = vmatpush3.msra.mxu1 %v6965_v28 }
0x17c7   :  { %7164 = vrot.lane.b32.xlu0 %v10381_v6, %s10682_s1  ;;  %10397 = vmatprep.subr.mxu1 %v10378_v41 }
0x17c8   :  { %10398 = vmatpush3.msra.mxu1 %v10378_v41 }
0x17c9   :  { %7160 = vrot.lane.b32.xlu1 %v10378_v41, %s10682_s1  ;;  %10399 = vmatprep.subr.mxu1 %v6955_v59 }
0x17ca   :  { %10400 = vmatpush3.msra.mxu1 %v6955_v59 }
0x17cb   :  { %7261 = vrot.lane.b32.xlu0 %v10381_v6, %s10683_s22  ;;  %10402 = vmatmul.mubr.msk.f32.vlgmr.msra.gmra.mxu1 %vm1825_vm9, %v6975_v43 }
0x17cc   :  { %10423 = vmatprep.mubr.msk.f32.mxu1 %vm1825_vm9, %v7253_v21 }
0x17cd   :  { %7162 = vrot.lane.b32.xlu1 %v6965_v28, %s10682_s1 }
0x17cf   :  { %7259 = vrot.lane.b32.xlu0 %v6965_v28, %s10683_s22 }
0x17d1   :  { %7158 = vrot.lane.b32.xlu1 %v6955_v59, %s10682_s1 }
0x17d3   :  { %7257 = vrot.lane.b32.xlu0 %v10378_v41, %s10683_s22 }
0x17d5   :  { %7255 = vrot.lane.b32.xlu1 %v6955_v59, %s10683_s22 }
0x1831   :  { %v6985_v46 = vpop.permute.xlu0 %6984 }
0x1833   :  { %v6983_v42 = vpop.permute.xlu1 %6982 }
0x1835   :  { %v6989_v47 = vpop.permute.xlu0 %6988 }
0x1836   :  { %10382 = vmatprep.subr.mxu0 %v6989_v47 }
0x1837   :  { %10383 = vmatpush3.msra.mxu0 %v6989_v47  ;;  %v6987_v44 = vpop.permute.xlu1 %6986  ;;  %v7721_v47 = vld [vmem:[#allocation2 + $0x9a8] sm:$0xff] }
0x1838   :  { %10384 = vmatprep.subr.mxu0 %v6987_v44 }
0x1839   :  { %v7165_v52 = vpop.permute.xlu0 %7164  ;;  %10385 = vmatpush3.msra.mxu0 %v6987_v44  ;;  %v7720_v44 = vld [vmem:[#allocation2 + $0x9a0] sm:$0xff] }
0x183a   :  { %10386 = vmatprep.subr.mxu0 %v6985_v46 }
0x183b   :  { %10387 = vmatpush3.msra.mxu0 %v6985_v46  ;;  %v7161_v9 = vpop.permute.xlu1 %7160 }
0x183c   :  { %10388 = vmatprep.subr.mxu0 %v6983_v42 }
0x183d   :  { %v7262_v10 = vpop.permute.xlu0 %7261  ;;  %10389 = vmatpush3.msra.mxu0 %v6983_v42 }
0x183e   :  { %10404 = vmatprep.subr.mxu0 %v7165_v52  ;;  %10415 = vmatprep.subr.mxu1 %v7262_v10 }
0x183f   :  { %10391 = vmatmul.mubr.msk.f32.vlgmr.msra.gmra.mxu0 %vm1825_vm9, %v6977_v61  ;;  %v7163_v53 = vpop.permute.xlu1 %7162  ;;  %10416 = vmatpush3.msra.mxu1 %v7262_v10  ;;  %v7717_v61 = vld [vmem:[#allocation2 + $0x988] sm:$0xff]  ;;  %v7716_v10 = vld [vmem:[#allocation2 + $0x980] sm:$0xff] }
0x1840   :  { %10405 = vmatpush3.msra.mxu0 %v7165_v52  ;;  %10412 = vmatprep.mubr.msk.f32.mxu0 %vm1825_vm9, %v7156_v30  ;;  %v7719_v52 = vld [vmem:[#allocation2 + $0x998] sm:$0xff] }
0x1841   :  { %10406 = vmatprep.subr.mxu0 %v7163_v53  ;;  %v7260_v19 = vpop.permute.xlu0 %7259 }
0x1842   :  { %10407 = vmatpush3.msra.mxu0 %v7163_v53  ;;  %10417 = vmatprep.subr.mxu1 %v7260_v19 }
0x1843   :  { %10408 = vmatprep.subr.mxu0 %v7161_v9  ;;  %v7159_v55 = vpop.permute.xlu1 %7158  ;;  %10418 = vmatpush3.msra.mxu1 %v7260_v19 }
0x1844   :  { %10409 = vmatpush3.msra.mxu0 %v7161_v9  ;;  %v7718_v9 = vld [vmem:[#allocation2 + $0x990] sm:$0xff] }
0x1845   :  { %10410 = vmatprep.subr.mxu0 %v7159_v55  ;;  %v7258_v56 = vpop.permute.xlu0 %7257 }
0x1846   :  { %10411 = vmatpush3.msra.mxu0 %v7159_v55  ;;  %10419 = vmatprep.subr.mxu1 %v7258_v56 }
0x1847   :  { %v7256_v25 = vpop.permute.xlu1 %7255  ;;  %10420 = vmatpush3.msra.mxu1 %v7258_v56  ;;  %10413 = vmatmul.mubr.msk.f32.vlgmr.msra.gmra.mxu0 %vm1825_vm9, %v7157_v54 }
0x1848   :  { %10421 = vmatprep.subr.mxu1 %v7256_v25  ;;  %10426 = vmatprep.subr.msk.mxu0 %vm315_vm2, %v7357_v57 }
0x1849   :  { %10422 = vmatpush3.msra.mxu1 %v7256_v25  ;;  %10427 = vmatpush3.msk.msra.mxu0 %vm315_vm2, %v7357_v57 }
0x184a   :  { %10424 = vmatmul.mubr.msk.f32.vlgmr.msra.gmra.mxu1 %vm1825_vm9, %v7254_v12  ;;  %10428 = vmatprep.subr.mxu0 %v7356_v3 }
0x184b   :  { %10445 = vmatprep.subr.msk.mxu1 %vm315_vm2, %v7357_v57  ;;  %10429 = vmatpush3.msra.mxu0 %v7356_v3 }
0x184c   :  { %10446 = vmatpush3.msk.msra.mxu1 %vm315_vm2, %v7357_v57  ;;  %10430 = vmatprep.subr.mxu0 %v7355_v11 }
0x184d   :  { %10447 = vmatprep.subr.mxu1 %v7356_v3  ;;  %10431 = vmatpush3.msra.mxu0 %v7355_v11 }
0x184e   :  { %10448 = vmatpush3.msra.mxu1 %v7356_v3  ;;  %10432 = vmatprep.subr.mxu0 %v7354_v20 }
0x184f   :  { %10449 = vmatprep.subr.mxu1 %v7355_v11  ;;  %10433 = vmatpush3.msra.mxu0 %v7354_v20 }
0x1850   :  { %10450 = vmatpush3.msra.mxu1 %v7355_v11  ;;  %10434 = vmatprep.subr.mxu0 %v7353_v15 }
0x1851   :  { %10451 = vmatprep.subr.mxu1 %v7354_v20  ;;  %10435 = vmatpush3.msra.mxu0 %v7353_v15 }
0x1852   :  { %10452 = vmatpush3.msra.mxu1 %v7354_v20  ;;  %10436 = vmatprep.subr.mxu0 %v7352_v13 }
0x1853   :  { %10453 = vmatprep.subr.mxu1 %v7353_v15  ;;  %10437 = vmatpush3.msra.mxu0 %v7352_v13 }
0x1854   :  { %10454 = vmatpush3.msra.mxu1 %v7353_v15  ;;  %10438 = vmatprep.subr.mxu0 %v7351_v22  ;;  %v8450_v15 = vld [vmem:[#allocation2 + $0xa40] sm:$0x1] }
0x1855   :  { %10455 = vmatprep.subr.mxu1 %v7352_v13  ;;  %10439 = vmatpush3.msra.mxu0 %v7351_v22 }
0x1856   :  { %10456 = vmatpush3.msra.mxu1 %v7352_v13  ;;  %10440 = vmatprep.subr.mxu0 %v7350_v23 }
0x1857   :  { %10457 = vmatprep.subr.mxu1 %v7351_v22  ;;  %10441 = vmatpush3.msra.mxu0 %v7350_v23 }
0x1858   :  { %10458 = vmatpush3.msra.mxu1 %v7351_v22  ;;  %10464 = vmatprep.subr.msk.mxu0 %vm502_vm4, %v7358_v7  ;;  %v7809_v22 = vld [vmem:[#allocation2 + $0x9c8] sm:$0x1] }
0x1859   :  { %10459 = vmatprep.subr.mxu1 %v7350_v23 }
0x185a   :  { %10460 = vmatpush3.msra.mxu1 %v7350_v23 }
0x185b   :  { %10474 = vmatprep.subr.msk.mxu1 %vm315_vm2, %v7723_v62 }
0x188b   :  { %v10403_v17 = vpop.f32.mrf.mxu1 }
0x188d   :  { %v7147_v29 = vpop.f32.mrf.mxu1 }
0x18ff   :  { %v10392_v24 = vpop.f32.mrf.mxu0 }
0x1900   :  { %v7153_v39 = vadd.f32 %v10403_v17, %v10392_v24  ;;  %v7808_v17 = vld [vmem:[#allocation2 + $0x9c0] sm:$0x1] }
0x1901   :  { %v7066_v1 = vpop.f32.mrf.mxu0 }
0x1902   :  { %v7148_v34 = vadd.f32 %v7147_v29, %v7066_v1 }
0x1907   :  { %v10414_v18 = vpop.f32.mrf.mxu0 }
0x1908   :  { %v7252_v31 = vadd.f32 %v10414_v18, %v7153_v39  ;;  %v7964_v18 = vld [vmem:[#allocation2 + $0x9d0] sm:$0x1] }
0x1909   :  { %v7242_v36 = vpop.f32.mrf.mxu0 }
0x190a   :  { %v10425_v8 = vpop.f32.mrf.mxu1  ;;  %v7251_v40 = vadd.f32 %v7242_v36, %v7148_v34 }
0x190b   :  { %v11499_v33 = vadd.f32 %v10425_v8, %v7252_v31  ;;  %v8045_v31 = vld [vmem:[#allocation2 + $0x9d8] sm:$0x1]  ;;  %v8126_v8 = vld [vmem:[#allocation2 + $0x9e0] sm:$0x1] }
0x190c   :  { %v7339_v58 = vpop.f32.mrf.mxu1 }
0x190d   :  { %v11501_v5 = vadd.f32 %v7339_v58, %v7251_v40  ;;  %v7445_v50 = vmul.f32 %v11499_v33, %v11499_v33  ;;  %v8207_v58 = vld [vmem:[#allocation2 + $0x9e8] sm:$0x1] }
0x190f   :  { %v7444_v49 = vmul.f32 %v11501_v5, %v11501_v5  ;;  %10442 = vmatprep.mubr.msk.f32.mxu0 %vm7359_vm12, %v11501_v5 }
0x1910   :  { %10443 = vmatmul.mubr.msk.f32.vlgmr.msra.gmra.mxu0 %vm7359_vm12, %v11499_v33 }
0x1911   :  { %10461 = vmatprep.mubr.msk.f32.mxu1 %vm7359_vm12, %v7444_v49  ;;  %10465 = vmatpush3.msk.msra.mxu0 %vm502_vm4, %v7358_v7  ;;  %v8288_v49 = vld [vmem:[#allocation2 + $0x9f0] sm:$0x1] }
0x1912   :  { %10462 = vmatmul.mubr.msk.f32.vlgmr.msra.gmra.mxu1 %vm7359_vm12, %v7445_v50  ;;  %10469 = vmatprep.subr.msk.mxu0 %vm502_vm4, %v7358_v7 }
0x1913   :  { %10475 = vmatpush3.msk.msra.mxu1 %vm315_vm2, %v7723_v62  ;;  %v8369_v62 = vld [vmem:[#allocation2 + $0x9f8] sm:$0x1] }
0x1914   :  { %10476 = vmatprep.subr.mxu1 %v7722_v51 }
0x1915   :  { %10477 = vmatpush3.msra.mxu1 %v7722_v51 }
0x1916   :  { %10478 = vmatprep.subr.mxu1 %v7721_v47 }
0x1917   :  { %10479 = vmatpush3.msra.mxu1 %v7721_v47 }
0x1918   :  { %10480 = vmatprep.subr.mxu1 %v7720_v44 }
0x1919   :  { %10481 = vmatpush3.msra.mxu1 %v7720_v44 }
0x191a   :  { %10482 = vmatprep.subr.mxu1 %v7719_v52 }
0x191b   :  { %10483 = vmatpush3.msra.mxu1 %v7719_v52 }
0x191c   :  { %10484 = vmatprep.subr.mxu1 %v7718_v9 }
0x191d   :  { %10485 = vmatpush3.msra.mxu1 %v7718_v9 }
0x191e   :  { %10486 = vmatprep.subr.mxu1 %v7717_v61 }
0x191f   :  { %10487 = vmatpush3.msra.mxu1 %v7717_v61 }
0x1920   :  { %10488 = vmatprep.subr.mxu1 %v7716_v10 }
0x1921   :  { %10489 = vmatpush3.msra.mxu1 %v7716_v10 }
0x1922   :  { %10521 = vmatprep.subr.mxu1 %v10678_v0 }
0x19d0   :  { %v10444_v16 = vpop.f32.mrf.mxu0 }
0x19d1   :  { %v7528_v45 = vmul.f32 0.032258064, %v10444_v16  ;;  %v8464_v16 = vld [vmem:[#allocation2 + $0xa38] sm:$0xff] }
0x19d2   :  { %v7435_v35 = vpop.f32.mrf.mxu0  ;;  %v10463_v2 = vpop.f32.mrf.mxu1 }
0x19d3   :  { %v7532_v4 = vmul.f32 %v7528_v45, %v7528_v45  ;;  %v7527_v27 = vmul.f32 0.032258064, %v7435_v35  ;;  %v7530_v32 = vmul.f32 0.032258064, %v10463_v2  ;;  %v7542_v46 = vsub.f32 0.0, %v7528_v45  ;;  %v8463_v45 = vld [vmem:[#allocation2 + $0xa30] sm:$0xff] }
0x19d4   :  { %v7518_v14 = vpop.f32.mrf.mxu1  ;;  %v8462_v35 = vld [vmem:[#allocation2 + $0xa28] sm:$0xff]  ;;  %v8461_v2 = vld [vmem:[#allocation2 + $0xa20] sm:$0xff] }
0x19d5   :  { %v7531_v38 = vmul.f32 %v7527_v27, %v7527_v27  ;;  %v7534_v37 = vsub.f32 %v7530_v32, %v7532_v4  ;;  %v7529_v48 = vmul.f32 0.032258064, %v7518_v14  ;;  %v7541_v6 = vsub.f32 0.0, %v7527_v27  ;;  %v8460_v4 = vld [vmem:[#allocation2 + $0xa18] sm:$0xff]  ;;  %v8459_v27 = vld [vmem:[#allocation2 + $0xa10] sm:$0xff]  ;;  %v8458_v32 = vld [vmem:[#allocation2 + $0xa08] sm:$0xff] }
0x19d6   :  { %v8457_v14 = vld [vmem:[#allocation2 + $0xa00] sm:$0xff] }
0x19d7   :  { %v7536_v60 = vmax.f32 %v7534_v37, 0.0  ;;  %v7533_v26 = vsub.f32 %v7529_v48, %v7531_v38 }
0x19d9   :  { %v7535_v63 = vmax.f32 %v7533_v26, 0.0  ;;  %v7538_v41 = vadd.f32 1e-05, %v7536_v60 }
0x19db   :  { %v7537_v59 = vadd.f32 1e-05, %v7535_v63 }
0x19dd   :  { %10623 = vrsqrt.f32 %v7537_v59 }
0x19de   :  { %10625 = vrsqrt.f32 %v7538_v41 }
0x19ea   :  { %v10624_v28 = vpop.eup %10623 }
0x19eb   :  { %v10626_v43 = vpop.eup %10625  ;;  %10466 = vmatprep.mubr.msk.f32.mxu0 %vm495_vm5, %v10624_v28  ;;  %v7543_v21 = vmul.f32 %v10624_v28, %v7541_v6 }
0x19ec   :  { %10467 = vmatmul.mubr.msk.f32.vlgmr.msra.gmra.mxu0 %vm495_vm5, %v10626_v43  ;;  %v7544_v42 = vmul.f32 %v10626_v43, %v7542_v46 }
0x19ed   :  { %10471 = vmatprep.mubr.msk.f32.mxu0 %vm495_vm5, %v7543_v21  ;;  %10470 = vmatpush3.msk.msra.mxu0 %vm502_vm4, %v7358_v7 }
0x19ee   :  { %10493 = vmatprep.subr.mxu0 %v10678_v0 }
0x19f0   :  { %10472 = vmatmul.mubr.msk.f32.vlgmr.msra.gmra.mxu0 %vm495_vm5, %v7544_v42 }
0x19f1   :  { %10497 = vmatprep.mubr.msk.f32.mxu0 %vm10679_vm0, %v10678_v0 }
0x1aac   :  { %v10468_v30 = vpop.f32.mrf.mxu0 }
0x1aad   :  { %v7711_v19 = vmul.f32 %v10468_v30, %v11499_v33 }
0x1aae   :  { %v7620_v53 = vpop.f32.mrf.mxu0 }
0x1aaf   :  { %v7710_v54 = vmul.f32 %v7620_v53, %v11501_v5 }
0x1ab0   :  { %v10473_v55 = vpop.f32.mrf.mxu0 }
0x1ab1   :  { %v7713_v56 = vadd.f32 %v10473_v55, %v7711_v19 }
0x1ab2   :  { %v7701_v57 = vpop.f32.mrf.mxu0 }
0x1ab3   :  { %v7712_v25 = vadd.f32 %v7710_v54, %v7701_v57  ;;  %v7715_v3 = vmax.f32 %v7713_v56, 0.0 }
0x1ab5   :  { %v7714_v12 = vmax.f32 %v7712_v25, 0.0 }
0x1ab7   :  { %10490 = vmatprep.mubr.msk.f32.mxu1 %vm7359_vm12, %v7714_v12 }
0x1ab8   :  { %10491 = vmatmul.mubr.msk.f32.vlgmr.msra.gmra.mxu1 %vm7359_vm12, %v7715_v3 }
0x1ab9   :  { %10525 = vmatprep.mubr.msk.f32.mxu1 %vm10679_vm0, %v10678_v0 }
0x1b78   :  { %v10492_v11 = vpop.f32.mrf.mxu1 }
0x1b79   :  { %7814 = vrot.lane.b32.xlu0 %v10492_v11, %s10681_s0 }
0x1b7a   :  { %v7799_v20 = vpop.f32.mrf.mxu1 }
0x1b7b   :  { %7812 = vrot.lane.b32.xlu1 %v7799_v20, %s10681_s0 }
0x1b7d   :  { %7967 = vrot.lane.b32.xlu0 %v10492_v11, %s10682_s1 }
0x1b7f   :  { %7965 = vrot.lane.b32.xlu1 %v7799_v20, %s10682_s1 }
0x1b81   :  { %8048 = vrot.lane.b32.xlu0 %v10492_v11, %s10683_s22 }
0x1b83   :  { %8046 = vrot.lane.b32.xlu1 %v7799_v20, %s10683_s22 }
0x1b85   :  { %8129 = vrot.lane.b32.xlu0 %v10492_v11, %s10684_s23 }
0x1b87   :  { %8127 = vrot.lane.b32.xlu1 %v7799_v20, %s10684_s23 }
0x1b89   :  { %8210 = vrot.lane.b32.xlu0 %v10492_v11, %s10685_s24 }
0x1b8b   :  { %8208 = vrot.lane.b32.xlu1 %v7799_v20, %s10685_s24 }
0x1b8d   :  { %8291 = vrot.lane.b32.xlu0 %v10492_v11, %s10686_s25 }
0x1b8f   :  { %8289 = vrot.lane.b32.xlu1 %v7799_v20, %s10686_s25 }
0x1b91   :  { %8372 = vrot.lane.b32.xlu0 %v10492_v11, %s10687_s26 }
0x1b93   :  { %8370 = vrot.lane.b32.xlu1 %v7799_v20, %s10687_s26 }
0x1b95   :  { %8453 = vperm.xlu0 %10585, %v8450_v15  }
0x1beb   :  { %v7815_v13 = vpop.permute.xlu0 %7814 }
0x1bec   :  { %10494 = vmatpush3.msra.mxu0 %v7815_v13 }
0x1bed   :  { %10495 = vmatprep.subr.mxu0 %v10678_v0  ;;  %v7813_v23 = vpop.permute.xlu1 %7812 }
0x1bee   :  { %10496 = vmatpush3.msra.mxu0 %v7813_v23 }
0x1bef   :  { %v7968_v24 = vpop.permute.xlu0 %7967  ;;  %10500 = vmatprep.subr.mxu0 %v10678_v0  ;;  %10498 = vmatmul.mubr.msk.f32.vlgmr.msra.gmra.mxu0 %vm852_vm6, %v7809_v22 }
0x1bf0   :  { %10501 = vmatpush3.msra.mxu0 %v10492_v11  ;;  %10504 = vmatprep.mubr.msk.f32.mxu0 %vm10679_vm0, %v10678_v0 }
0x1bf1   :  { %10502 = vmatprep.subr.mxu0 %v10678_v0  ;;  %v7966_v1 = vpop.permute.xlu1 %7965 }
0x1bf2   :  { %10503 = vmatpush3.msra.mxu0 %v7799_v20 }
0x1bf3   :  { %v8049_v29 = vpop.permute.xlu0 %8048  ;;  %10507 = vmatprep.subr.mxu0 %v10678_v0  ;;  %10505 = vmatmul.mubr.msk.f32.vlgmr.msra.gmra.mxu0 %vm852_vm6, %v7808_v17 }
0x1bf4   :  { %10508 = vmatpush3.msra.mxu0 %v7968_v24  ;;  %10511 = vmatprep.mubr.msk.f32.mxu0 %vm10679_vm0, %v10678_v0 }
0x1bf5   :  { %10509 = vmatprep.subr.mxu0 %v10678_v0  ;;  %v8047_v39 = vpop.permute.xlu1 %8046 }
0x1bf6   :  { %10510 = vmatpush3.msra.mxu0 %v7966_v1 }
0x1bf7   :  { %v8130_v34 = vpop.permute.xlu0 %8129  ;;  %10514 = vmatprep.subr.mxu0 %v10678_v0  ;;  %10512 = vmatmul.mubr.msk.f32.vlgmr.msra.gmra.mxu0 %vm852_vm6, %v7964_v18 }
0x1bf8   :  { %10515 = vmatpush3.msra.mxu0 %v8049_v29  ;;  %10522 = vmatpush3.msra.mxu1 %v8130_v34 }
0x1bf9   :  { %10516 = vmatprep.subr.mxu0 %v10678_v0  ;;  %10523 = vmatprep.subr.mxu1 %v10678_v0  ;;  %v8128_v36 = vpop.permute.xlu1 %8127 }
0x1bfa   :  { %10517 = vmatpush3.msra.mxu0 %v8047_v39  ;;  %10524 = vmatpush3.msra.mxu1 %v8128_v36 }
0x1bfb   :  { %v8211_v40 = vpop.permute.xlu0 %8210  ;;  %10518 = vmatprep.mubr.msk.f32.mxu0 %vm10679_vm0, %v10678_v0  ;;  %10528 = vmatprep.subr.mxu0 %v10678_v0 }
0x1bfc   :  { %10519 = vmatmul.mubr.msk.f32.vlgmr.msra.gmra.mxu0 %vm852_vm6, %v8045_v31  ;;  %10535 = vmatprep.subr.mxu1 %v10678_v0 }
0x1bfd   :  { %10529 = vmatpush3.msra.mxu0 %v8211_v40  ;;  %v8209_v33 = vpop.permute.xlu1 %8208  ;;  %10526 = vmatmul.mubr.msk.f32.vlgmr.msra.gmra.mxu1 %vm852_vm6, %v8126_v8 }
0x1bfe   :  { %10530 = vmatprep.subr.mxu0 %v10678_v0  ;;  %10532 = vmatprep.mubr.msk.f32.mxu0 %vm10679_vm0, %v10678_v0 }
0x1bff   :  { %10531 = vmatpush3.msra.mxu0 %v8209_v33  ;;  %v8292_v5 = vpop.permute.xlu0 %8291  ;;  %10539 = vmatprep.mubr.msk.f32.mxu1 %vm10679_vm0, %v10678_v0 }
0x1c00   :  { %10536 = vmatpush3.msra.mxu1 %v8292_v5  ;;  %10533 = vmatmul.mubr.msk.f32.vlgmr.msra.gmra.mxu0 %vm852_vm6, %v8207_v58 }
0x1c01   :  { %10537 = vmatprep.subr.mxu1 %v10678_v0  ;;  %v8290_v50 = vpop.permute.xlu1 %8289  ;;  %10542 = vmatprep.subr.mxu0 %v10678_v0 }
0x1c02   :  { %10538 = vmatpush3.msra.mxu1 %v8290_v50  ;;  %10546 = vmatprep.mubr.msk.f32.mxu0 %vm10679_vm0, %v10678_v0 }
0x1c03   :  { %v8373_v7 = vpop.permute.xlu0 %8372  ;;  %10540 = vmatmul.mubr.msk.f32.vlgmr.msra.gmra.mxu1 %vm852_vm6, %v8288_v49  ;;  %10549 = vmatprep.subr.mxu1 %v10678_v0 }
0x1c04   :  { %10543 = vmatpush3.msra.mxu0 %v8373_v7  ;;  %10565 = vmatprep.mubr.msk.f32.mxu1 %vm10679_vm0, %v10678_v0 }
0x1c05   :  { %10544 = vmatprep.subr.mxu0 %v10678_v0  ;;  %v8371_v51 = vpop.permute.xlu1 %8370  ;;  %10550 = vmatpush3.msra.mxu1 %v8464_v16 }
0x1c06   :  { %10545 = vmatpush3.msra.mxu0 %v8371_v51  ;;  %10551 = vmatprep.subr.mxu1 %v10678_v0 }
0x1c07   :  { %10547 = vmatmul.mubr.msk.f32.vlgmr.msra.gmra.mxu0 %vm852_vm6, %v8369_v62  ;;  %10552 = vmatpush3.msra.mxu1 %v8463_v45 }
0x1c08   :  { %10553 = vmatprep.subr.mxu1 %v10678_v0 }
0x1c09   :  { %10554 = vmatpush3.msra.mxu1 %v8462_v35 }
0x1c0a   :  { %10555 = vmatprep.subr.mxu1 %v10678_v0 }
0x1c0b   :  { %10556 = vmatpush3.msra.mxu1 %v8461_v2 }
0x1c0c   :  { %10557 = vmatprep.subr.mxu1 %v10678_v0 }
0x1c0d   :  { %10558 = vmatpush3.msra.mxu1 %v8460_v4 }
0x1c0e   :  { %10559 = vmatprep.subr.mxu1 %v10678_v0 }
0x1c0f   :  { %10560 = vmatpush3.msra.mxu1 %v8459_v27 }
0x1c10   :  { %10561 = vmatprep.subr.mxu1 %v10678_v0  ;;  %v8454_v53 = vpop.permute.xlu0 %8453 }
0x1c11   :  { %10562 = vmatpush3.msra.mxu1 %v8458_v32 }
0x1c12   :  { %10563 = vmatprep.subr.mxu1 %v10678_v0 }
0x1c13   :  { %10564 = vmatpush3.msra.mxu1 %v8457_v14 }
0x1caf   :  { %v7887_v38 = vpop.f32.mrf.mxu0 }
0x1cb1   :  { %v10499_v37 = vpop.f32.mrf.mxu0 }
0x1cb3   :  { %v7960_v48 = vpop.f32.mrf.mxu0 }
0x1cb4   :  { %v7961_v63 = vadd.f32 %v7960_v48, %v7887_v38 }
0x1cb5   :  { %v10506_v60 = vpop.f32.mrf.mxu0 }
0x1cb7   :  { %v8040_v26 = vpop.f32.mrf.mxu0 }
0x1cb8   :  { %v8044_v59 = vadd.f32 %v8040_v26, %v7961_v63 }
0x1cb9   :  { %v10513_v41 = vpop.f32.mrf.mxu0 }
0x1cbc   :  { %v8121_v6 = vpop.f32.mrf.mxu0 }
0x1cbd   :  { %v8125_v28 = vadd.f32 %v8121_v6, %v8044_v59  ;;  %v8202_v43 = vpop.f32.mrf.mxu1 }
0x1cbe   :  { %v10520_v21 = vpop.f32.mrf.mxu0 }
0x1cbf   :  { %v10527_v46 = vpop.f32.mrf.mxu1  ;;  %v8206_v42 = vadd.f32 %v8202_v43, %v8125_v28 }
0x1cc0   :  { %v8283_v47 = vpop.f32.mrf.mxu0 }
0x1cc1   :  { %v8287_v9 = vadd.f32 %v8283_v47, %v8206_v42 }
0x1cc2   :  { %v10534_v44 = vpop.f32.mrf.mxu0 }
0x1cc3   :  { %v8364_v52 = vpop.f32.mrf.mxu1 }
0x1cc4   :  { %v8368_v61 = vadd.f32 %v8364_v52, %v8287_v9 }
0x1cc5   :  { %v10541_v0 = vpop.f32.mrf.mxu1 }
0x1cc7   :  { %v8445_v10 = vpop.f32.mrf.mxu0 }
0x1cc8   :  { %v8449_v30 = vadd.f32 %v8445_v10, %v8368_v61 }
0x1cc9   :  { %v10548_v19 = vpop.f32.mrf.mxu0 }
0x1cca   :  { %v8456_v55 = vadd.f32 %v8454_v53, %v8449_v30 }
0x1ccc   :  { %10566 = vmatmul.mubr.msk.f32.vlgmr.msra.gmra.mxu1 %vm40_vm1, %v8456_v55 }
0x1d8c   :  { %v8534_v54 = vpop.f32.mrf.mxu1 }
0x1d8d   :  { %10627 = vtanh.f32 %v8534_v54 }
0x1d8e   :  { %v10567_v56 = vpop.f32.mrf.mxu1 }
0x1d9a   :  { %v10628_v57 = vpop.eup %10627 }
0x1d9b   :  { %8542 = vrot.lane.b32.xlu1 %v10628_v57, %s10688_s27  ;;  %8540 = vst.msk [vmem:[#allocation5] sm:$0x1] %vm8539_vm13, %v10628_v57 }
0x1e0d   :  { %v8543_v25 = vpop.permute.xlu1 %8542 }
0x1e0e   :  { %8546 = vst.msk [vmem:[#allocation5 + $0x1] sm:$0x1] %vm8539_vm13, %v8543_v25 }
0x1e0f   :  { %10662 = shalt.err (!%p10659_p9)
}
0x1e10   :  { %s10690_s4 = smov 16   ;;  %s10691_s5 = smov 1  }
0x1e11   :  { %8558 = dma.vmem_to_hbm [thread:$0]  %s8553_s29, 32, %s11598_s3, [#allocation4], %s10690_s4, %s10690_s4, %s10691_s5  }
0x1e12   :  { %10673 = dma.done.wait [#allocation4], 32  }
0x1e13   :  { %10674 = vsyncadd [#allocation4], 4294967264 }
0x1e14   :  { %8562 = vsyncpa [#allocation3], 1 }
0x1e15   :  { %8563 = vsyncpa [#allocation4], 1 }

</bundles_post_ra>
